<compile_context>
chip_gen: v6e
topology: v6e:2x2x1
jax: 0.10.0
libtpu: 0.0.40
codegen_flags: <defaults>
</compile_context>

<pallas_src>
import functools
import numpy as np
import jax
import jax.numpy as jnp
from jax import lax
from jax.experimental import pallas as pl
from jax.experimental.pallas import tpu as pltpu


# ----------------------------------------------------------------------------
# Fused Pallas kernel: 2-layer BiLSTM (directions fused) + classifier, all in VMEM
# ----------------------------------------------------------------------------
def fused_tagger_kernel(x_ref, lens_ref, w_ref, b_ref, logits_ref,
                        out0_scr, out1_scr, *, T, B, H, E):
    """
    x_ref:      (T*B, E)   time-major embedded tokens (rows ordered t*B + b), B padded to 8
    lens_ref:   (B, 1)     int32 sequence lengths (0 for padded batch rows)
    w_ref:      (E+8H, 8H) packed weight slab:
                  rows [0,E)        W_ih layer0, fused cols [i_f i_b f_f f_b g_f g_b o_f o_b]
                  rows [E,E+2H)     W_ih layer1 (fused cols, rows = [h_fwd ; h_bwd] inputs)
                  rows [E+2H,E+4H)  W_hh layer0, block-diagonal per 2H gate block
                  rows [E+4H,E+6H)  W_hh layer1, block-diagonal
                  rows [E+6H,E+8H)  classifier weight, cols [0,128) used
    b_ref:      (8, 8H)    row0 = layer0 fused bias, row1 = layer1, row2 = classifier bias
    logits_ref: (T*B, 128) output (lane-dense store)
    out0/1_scr: (T*B, 2H)  per-layer bidirectional hidden states (fwd lanes [0,H), bwd [H,2H))
    """
    f32 = jnp.float32
    G = 8 * H
    O_WIH0, O_WIH1 = 0, E
    O_WHH0, O_WHH1 = E + 2 * H, E + 4 * H
    O_WOUT = E + 6 * H

    # ---- hoisted weight / bias loads (once per kernel) ----
    wih0 = w_ref[O_WIH0:O_WIH0 + E, :]
    wih1 = w_ref[O_WIH1:O_WIH1 + 2 * H, :]
    whh0 = w_ref[O_WHH0:O_WHH0 + 2 * H, :]
    whh1 = w_ref[O_WHH1:O_WHH1 + 2 * H, :]
    wout = w_ref[O_WOUT:O_WOUT + 2 * H, 0:128]
    b0 = b_ref[0:1, :]
    b1 = b_ref[1:2, :]
    bout = b_ref[2:3, 0:128]

    # ---- hoisted lane constants & validity masks (no per-step broadcasts) ----
    lane_g = lax.broadcasted_iota(jnp.int32, (B, G), 1)
    fwd_cols = (lane_g % (2 * H)) < H                 # fwd-direction gate columns
    g_cols = (lane_g >= 4 * H) & (lane_g < 6 * H)     # tanh ("g") gate block (1 vreg)

    lane_h = lax.broadcasted_iota(jnp.int32, (B, 2 * H), 1)
    fwd_lanes = lane_h < H                            # fwd half of the (B, 2H) state
    bwd_lanes = jnp.logical_not(fwd_lanes)
    lens = lens_ref[...]                              # (B, 1) int32
    # fwd valid while s < len ; bwd (which visits time T-1-s) valid while s >= T-len
    start = jnp.where(fwd_lanes, 0, T - lens)         # (B, 2H)
    stop = jnp.where(fwd_lanes, lens, T)              # (B, 2H)
    step_mask = [jnp.logical_and(start <= s, s < stop) for s in range(T)]

    def run_layer(gx, whh, out_scr):
        """One bidirectional layer, both directions fused in a single time loop.
        State h/c is (B, 2H): fwd lanes [0,H), bwd lanes [H,2H).  At step s the
        fwd direction consumes time s and the bwd direction consumes time T-1-s;
        whh is block-diagonal so each half only feeds its own gate columns."""
        h = jnp.zeros((B, 2 * H), f32)
        c = jnp.zeros((B, 2 * H), f32)
        for s in range(T):                            # static, fully unrolled
            # per-direction input gates: fwd cols from time s, bwd cols from T-1-s
            gates = jnp.where(fwd_cols,
                              gx[s * B:(s + 1) * B, :],
                              gx[(T - 1 - s) * B:(T - s) * B, :])
            gates = gates + jnp.dot(h, whh, preferred_element_type=f32)
            sig = jax.nn.sigmoid(gates)
            tah = jnp.tanh(gates)
            act = jnp.where(g_cols, tah, sig)
            i_g = act[:, 0:2 * H]
            f_g = act[:, 2 * H:4 * H]
            g_g = act[:, 4 * H:6 * H]
            o_g = act[:, 6 * H:8 * H]
            c_cand = f_g * c + i_g * g_g
            h_cand = o_g * jnp.tanh(c_cand)
            m = step_mask[s]                          # (B, 2H) bool, hoisted
            # hold state at zero/previous outside each row's valid window (exact
            # packed-sequence semantics for both directions)
            h = jnp.where(m, h_cand, h)
            c = jnp.where(m, c_cand, c)
            out_valid = jnp.where(m, h_cand, 0.0)
            # lane-masked stores keep each direction at its natural lane offset
            # (no per-step lane shifts): fwd half -> time-s rows, bwd half -> time-(T-1-s) rows.
            pltpu.store(out_scr.at[s * B:(s + 1) * B, :], out_valid, mask=fwd_lanes)
            pltpu.store(out_scr.at[(T - 1 - s) * B:(T - s) * B, :], out_valid, mask=bwd_lanes)

    # ---- layer 0: hoisted whole-sequence input projection, fused recurrence ----
    gx0 = jnp.dot(x_ref[...], wih0, preferred_element_type=f32) + b0
    run_layer(gx0, whh0, out0_scr)

    # ---- layer 1 (input = layer-0 bidirectional states, never leave VMEM) ----
    gx1 = jnp.dot(out0_scr[...], wih1, preferred_element_type=f32) + b1
    run_layer(gx1, whh1, out1_scr)

    # ---- classifier: one (T*B, 2H) @ (2H, 128) matmul, lane-dense output store ----
    logits_ref[...] = jnp.dot(out1_scr[...], wout,
                              preferred_element_type=f32) + bout


# ----------------------------------------------------------------------------
# Host-side parameter packing (done once, outside the jitted forward)
# ----------------------------------------------------------------------------
def _fuse_gate_cols(w_f, w_b, H):
    """(D, 4H) fwd/bwd -> (D, 8H) with per-gate [fwd|bwd] 2H-wide column blocks."""
    cols = []
    for g in range(4):
        cols.append(w_f[:, g * H:(g + 1) * H])
        cols.append(w_b[:, g * H:(g + 1) * H])
    return jnp.concatenate(cols, axis=1)


def _fuse_block_diag_hh(w_f, w_b, H):
    """(H, 4H) fwd/bwd -> block-diagonal (2H, 8H): fwd state feeds only fwd gate
    columns and bwd state only bwd gate columns."""
    z = jnp.zeros((H, H), jnp.float32)
    blocks = []
    for g in range(4):
        top = jnp.concatenate([w_f[:, g * H:(g + 1) * H], z], axis=1)   # h_fwd rows
        bot = jnp.concatenate([z, w_b[:, g * H:(g + 1) * H]], axis=1)   # h_bwd rows
        blocks.append(jnp.concatenate([top, bot], axis=0))              # (2H, 2H)
    return jnp.concatenate(blocks, axis=1)                              # (2H, 8H)


def pack_params(params):
    E = params["emb"].shape[1]
    H = params["l0_fwd"][1].shape[0]
    L = params["w_out"].shape[1]
    assert E % 8 == 0 and H % 16 == 0 and L <= 128

    wih_f0, whh_f0, b_f0 = params["l0_fwd"]
    wih_b0, whh_b0, b_b0 = params["l0_bwd"]
    wih_f1, whh_f1, b_f1 = params["l1_fwd"]
    wih_b1, whh_b1, b_b1 = params["l1_bwd"]

    wih0 = _fuse_gate_cols(wih_f0, wih_b0, H)               # (E, 8H)
    wih1 = _fuse_gate_cols(wih_f1, wih_b1, H)               # (2H, 8H)
    whh0 = _fuse_block_diag_hh(whh_f0, whh_b0, H)           # (2H, 8H)
    whh1 = _fuse_block_diag_hh(whh_f1, whh_b1, H)           # (2H, 8H)
    wout = jnp.zeros((2 * H, 8 * H), jnp.float32).at[:, :L].set(params["w_out"])
    wslab = jnp.concatenate([wih0, wih1, whh0, whh1, wout], axis=0)   # (E+8H, 8H)

    b0 = _fuse_gate_cols(b_f0, b_b0, H)                     # (1, 8H)
    b1 = _fuse_gate_cols(b_f1, b_b1, H)
    bout = jnp.zeros((1, 8 * H), jnp.float32).at[:, :L].set(params["b_out"])
    bslab = jnp.concatenate([b0, b1, bout,
                             jnp.zeros((5, 8 * H), jnp.float32)], axis=0)  # (8, 8H)

    return {"emb": params["emb"], "wslab": wslab, "bslab": bslab}


# ----------------------------------------------------------------------------
# Wrapper: embedding lookup + single fused pallas_call + ragged gather epilogue
# ----------------------------------------------------------------------------
def lstm_tagger_forward(packed, tokens, lengths, gather_idx, label_size):
    """tokens: (B, T) int32; lengths: (B,) int32 device array (not baked into the
    kernel trace); gather_idx: precomputed row indices for the ragged concat.
    Returns (sum(lengths), label_size) like the PyTorch module."""
    B, T = tokens.shape
    E = packed["emb"].shape[1]
    H = packed["wslab"].shape[1] // 8
    Bp = max(8, -(-B // 8) * 8)     # pad batch to sublane granularity
    Lp = 128                        # pad label dim to full lane width

    # Embedding lookup (padding_idx=0 row is zero); dropout -> identity (eval).
    embedded = packed["emb"][tokens]                       # (B, T, E)
    x_tm = jnp.transpose(embedded, (1, 0, 2))              # (T, B, E) time-major
    x_tm = jnp.pad(x_tm, ((0, 0), (0, Bp - B), (0, 0)))    # (T, Bp, E)
    x2d = x_tm.reshape(T * Bp, E)                          # rows ordered t*Bp + b

    lens = jnp.pad(lengths.astype(jnp.int32), (0, Bp - B)).reshape(Bp, 1)

    kernel = functools.partial(fused_tagger_kernel, T=T, B=Bp, H=H, E=E)

    def full2(shape):
        return pl.BlockSpec(shape, lambda i: (0, 0))

    logits = pl.pallas_call(
        kernel,
        out_shape=jax.ShapeDtypeStruct((T * Bp, Lp), jnp.float32),
        grid_spec=pltpu.PrefetchScalarGridSpec(
            num_scalar_prefetch=0,
            grid=(1,),
            in_specs=[full2(x2d.shape), full2(lens.shape),
                      full2(packed["wslab"].shape), full2(packed["bslab"].shape)],
            out_specs=full2((T * Bp, Lp)),
            scratch_shapes=[
                pltpu.VMEM((T * Bp, 2 * H), jnp.float32),   # layer-0 bidir hidden
                pltpu.VMEM((T * Bp, 2 * H), jnp.float32),   # layer-1 bidir hidden
            ],
        ),
        compiler_params=pltpu.CompilerParams(
            dimension_semantics=("arbitrary",),
            vmem_limit_bytes=32 * 1024 * 1024,
        ),
    )(x2d, lens, packed["wslab"], packed["bslab"])

    # torch.cat([y_pred[b, :len(b)]], dim=0): one device gather (rows = t*Bp + b).
    return jnp.take(logits, gather_idx, axis=0)[:, :label_size]


# ----------------------------------------------------------------------------
# Deterministic parameter init (shapes from LSTMTagger.__init__, weights stored
# transposed vs torch: w_ih (D,4H), w_hh (H,4H), gate order (i,f,g,o))
# ----------------------------------------------------------------------------
def init_params(key, vocab_size, embedding_dim, hidden_dim, label_size):
    ks = list(jax.random.split(key, 24))
    kit = iter(ks)
    scale = 1.0 / np.sqrt(hidden_dim)

    def u(k, shape):
        return jax.random.uniform(k, shape, jnp.float32, -scale, scale)

    emb = jax.random.normal(next(kit), (vocab_size, embedding_dim), jnp.float32)
    emb = emb.at[0].set(0.0)  # padding_idx=0

    def lstm_dir(d_in):
        w_ih = u(next(kit), (d_in, 4 * hidden_dim))
        w_hh = u(next(kit), (hidden_dim, 4 * hidden_dim))
        b = u(next(kit), (1, 4 * hidden_dim)) + u(next(kit), (1, 4 * hidden_dim))
        return (w_ih, w_hh, b)

    return {
        "emb": emb,
        "l0_fwd": lstm_dir(embedding_dim),
        "l0_bwd": lstm_dir(embedding_dim),
        "l1_fwd": lstm_dir(2 * hidden_dim),
        "l1_bwd": lstm_dir(2 * hidden_dim),
        "w_out": u(next(kit), (2 * hidden_dim, label_size)),
        "b_out": u(next(kit), (1, label_size)),
    }


# ----------------------------------------------------------------------------
# Pure-NumPy reference (unfused, per-row) for a correctness self-check
# ----------------------------------------------------------------------------
def reference_forward(params, tokens_np, lengths_np):
    def sigmoid(z):
        return 1.0 / (1.0 + np.exp(-z))

    emb = np.asarray(params["emb"])
    w_out = np.asarray(params["w_out"])
    b_out = np.asarray(params["b_out"])[0]
    x = emb[tokens_np]                                     # (B, T, E)
    B, T, _ = x.shape
    H = np.asarray(params["l0_fwd"][1]).shape[0]

    def run_dir(seq, length, w_ih, w_hh, b, reverse):
        w_ih = np.asarray(w_ih); w_hh = np.asarray(w_hh); b = np.asarray(b)[0]
        out = np.zeros((T, H), np.float32)
        h = np.zeros((H,), np.float32)
        c = np.zeros((H,), np.float32)
        ts = range(length - 1, -1, -1) if reverse else range(length)
        for t in ts:
            g = seq[t] @ w_ih + h @ w_hh + b
            i = sigmoid(g[0:H]); f = sigmoid(g[H:2 * H])
            gg = np.tanh(g[2 * H:3 * H]); o = sigmoid(g[3 * H:4 * H])
            c = f * c + i * gg
            h = o * np.tanh(c)
            out[t] = h
        return out

    outs = []
    for b in range(B):
        lb = int(lengths_np[b])
        l0 = np.concatenate([run_dir(x[b], lb, *params["l0_fwd"], reverse=False),
                             run_dir(x[b], lb, *params["l0_bwd"], reverse=True)], axis=1)
        l1 = np.concatenate([run_dir(l0, lb, *params["l1_fwd"], reverse=False),
                             run_dir(l0, lb, *params["l1_bwd"], reverse=True)], axis=1)
        outs.append(l1[:lb] @ w_out + b_out)
    return np.concatenate(outs, axis=0)


# ----------------------------------------------------------------------------
if __name__ == "__main__":
    B, T = 4, 8
    embedding_dim, hidden_dim = 16, 32
    vocab_size, label_size = 50, 8

    key = jax.random.PRNGKey(0)
    k_par, k_tok = jax.random.split(key)
    params = init_params(k_par, vocab_size, embedding_dim, hidden_dim, label_size)
    packed = pack_params(params)

    lengths_np = np.array([5, 8, 3, 6], dtype=np.int32)
    tokens = jax.random.randint(k_tok, (B, T), 1, vocab_size, dtype=jnp.int32)
    # zero out pad positions (padding_idx = 0)
    pad_mask = np.arange(T)[None, :] < lengths_np[:, None]
    tokens = tokens * jnp.asarray(pad_mask.astype(np.int32))

    # ragged-concat gather indices (kernel rows ordered t*Bp + b); output length is
    # data-dependent, so this lives on the host while the kernel itself only sees
    # the lengths array (no per-lengths-pattern recompile of the pallas_call).
    Bp = max(8, -(-B // 8) * 8)
    gather_idx = np.concatenate(
        [np.arange(int(lengths_np[b]), dtype=np.int32) * Bp + b for b in range(B)])

    fwd = jax.jit(lambda pk, tok, lens, gidx:
                  lstm_tagger_forward(pk, tok, lens, gidx, label_size))
    out = jax.block_until_ready(
        fwd(packed, tokens, jnp.asarray(lengths_np), jnp.asarray(gather_idx)))

    expected_rows = int(lengths_np.sum())
    assert out.shape == (expected_rows, label_size), out.shape
    assert bool(jnp.all(jnp.isfinite(out)))

    ref = reference_forward(params, np.asarray(tokens), lengths_np)
    max_err = float(np.max(np.abs(np.asarray(out) - ref)))
    assert max_err < 5e-2, f"max abs error vs reference: {max_err}"

    print("KERNEL_OK")
</pallas_src>

<mosaic_0001>
module attributes {stable_mosaic.version = 11 : i64} {
  func.func @fused_tagger_kernel(%arg0: i32, %arg1: memref<64x16xf32, #tpu.memory_space<vmem>>, %arg2: memref<8x1xi32, #tpu.memory_space<vmem>>, %arg3: memref<272x256xf32, #tpu.memory_space<vmem>>, %arg4: memref<8x256xf32, #tpu.memory_space<vmem>>, %arg5: memref<64x128xf32, #tpu.memory_space<vmem>>, %arg6: memref<64x64xf32, #tpu.memory_space<vmem>>, %arg7: memref<64x64xf32, #tpu.memory_space<vmem>>) attributes {dimension_semantics = [#tpu.dimension_semantics<arbitrary>], iteration_bounds = array<i64: 1>, scalar_prefetch = 0 : i64, scratch_operands = 2 : i64, tpu.core_type = #tpu.core_type<tc>, window_params = [{pipeline_mode = #tpu.pipeline_mode<synchronous>, transform_indices = @transform_0, window_bounds = array<i64: 64, 16>}, {pipeline_mode = #tpu.pipeline_mode<synchronous>, transform_indices = @transform_1, window_bounds = array<i64: 8, 1>}, {pipeline_mode = #tpu.pipeline_mode<synchronous>, transform_indices = @transform_2, window_bounds = array<i64: 272, 256>}, {pipeline_mode = #tpu.pipeline_mode<synchronous>, transform_indices = @transform_3, window_bounds = array<i64: 8, 256>}, {pipeline_mode = #tpu.pipeline_mode<synchronous>, transform_indices = @transform_4, window_bounds = array<i64: 64, 128>}]} {
    %c0 = arith.constant 0 : index
    %c0_0 = arith.constant 0 : index
    %0 = vector.load %arg3[%c0, %c0_0] : memref<272x256xf32, #tpu.memory_space<vmem>>, vector<16x256xf32>
    %c16 = arith.constant 16 : index
    %c0_1 = arith.constant 0 : index
    %1 = vector.load %arg3[%c16, %c0_1] : memref<272x256xf32, #tpu.memory_space<vmem>>, vector<64x256xf32>
    %c80 = arith.constant 80 : index
    %c0_2 = arith.constant 0 : index
    %2 = vector.load %arg3[%c80, %c0_2] : memref<272x256xf32, #tpu.memory_space<vmem>>, vector<64x256xf32>
    %c144 = arith.constant 144 : index
    %c0_3 = arith.constant 0 : index
    %3 = vector.load %arg3[%c144, %c0_3] : memref<272x256xf32, #tpu.memory_space<vmem>>, vector<64x256xf32>
    %c208 = arith.constant 208 : index
    %c0_4 = arith.constant 0 : index
    %4 = vector.load %arg3[%c208, %c0_4] : memref<272x256xf32, #tpu.memory_space<vmem>>, vector<64x128xf32>
    %c0_5 = arith.constant 0 : index
    %c0_6 = arith.constant 0 : index
    %5 = vector.load %arg4[%c0_5, %c0_6] : memref<8x256xf32, #tpu.memory_space<vmem>>, vector<1x256xf32>
    %c1 = arith.constant 1 : index
    %c0_7 = arith.constant 0 : index
    %6 = vector.load %arg4[%c1, %c0_7] : memref<8x256xf32, #tpu.memory_space<vmem>>, vector<1x256xf32>
    %c2 = arith.constant 2 : index
    %c0_8 = arith.constant 0 : index
    %7 = vector.load %arg4[%c2, %c0_8] : memref<8x256xf32, #tpu.memory_space<vmem>>, vector<1x128xf32>
    %8 = tpu.iota {dimensions = array<i32: 1>} : vector<8x256xi32>
    %c64_i32 = arith.constant 64 : i32
    %c0_i32 = arith.constant 0 : i32
    %9 = arith.cmpi eq, %c64_i32, %c0_i32 : i32
    %c1_i32 = arith.constant 1 : i32
    %10 = arith.select %9, %c1_i32, %c64_i32 : i32
    %11 = vector.broadcast %10 : i32 to vector<8x256xi32>
    %12 = arith.remsi %8, %11 : vector<8x256xi32>
    %c0_i32_9 = arith.constant 0 : i32
    %13 = vector.broadcast %c0_i32_9 : i32 to vector<8x256xi32>
    %14 = arith.cmpi ne, %12, %13 : vector<8x256xi32>
    %c0_i32_10 = arith.constant 0 : i32
    %15 = vector.broadcast %c0_i32_10 : i32 to vector<8x256xi32>
    %16 = arith.cmpi slt, %12, %15 : vector<8x256xi32>
    %c0_i32_11 = arith.constant 0 : i32
    %17 = arith.cmpi slt, %10, %c0_i32_11 : i32
    %18 = vector.broadcast %17 : i1 to vector<8x256xi1>
    %19 = vector.broadcast %18 : vector<8x256xi1> to vector<8x256xi1>
    %20 = arith.xori %16, %19 : vector<8x256xi1>
    %21 = arith.andi %20, %14 : vector<8x256xi1>
    %22 = vector.broadcast %10 : i32 to vector<8x256xi32>
    %23 = arith.addi %12, %22 : vector<8x256xi32>
    %24 = arith.select %21, %23, %12 : vector<8x256xi1>, vector<8x256xi32>
    %c32_i32 = arith.constant 32 : i32
    %25 = vector.broadcast %c32_i32 : i32 to vector<8x256xi32>
    %26 = arith.cmpi slt, %24, %25 : vector<8x256xi32>
    %c128_i32 = arith.constant 128 : i32
    %27 = vector.broadcast %c128_i32 : i32 to vector<8x256xi32>
    %28 = arith.cmpi sge, %8, %27 : vector<8x256xi32>
    %c192_i32 = arith.constant 192 : i32
    %29 = vector.broadcast %c192_i32 : i32 to vector<8x256xi32>
    %30 = arith.cmpi slt, %8, %29 : vector<8x256xi32>
    %31 = arith.andi %28, %30 : vector<8x256xi1>
    %32 = tpu.iota {dimensions = array<i32: 1>} : vector<8x64xi32>
    %c32_i32_12 = arith.constant 32 : i32
    %33 = vector.broadcast %c32_i32_12 : i32 to vector<8x64xi32>
    %34 = arith.cmpi slt, %32, %33 : vector<8x64xi32>
    %cst = arith.constant dense<true> : vector<8x64xi1>
    %35 = arith.xori %34, %cst : vector<8x64xi1>
    %c0_13 = arith.constant 0 : index
    %c0_14 = arith.constant 0 : index
    %36 = vector.load %arg2[%c0_13, %c0_14] : memref<8x1xi32, #tpu.memory_space<vmem>>, vector<8x1xi32>
    %c8_i32 = arith.constant 8 : i32
    %37 = vector.broadcast %c8_i32 : i32 to vector<8x1xi32>
    %38 = arith.subi %37, %36 : vector<8x1xi32>
    %c0_i32_15 = arith.constant 0 : i32
    %39 = vector.broadcast %c0_i32_15 : i32 to vector<8x64xi32>
    %40 = vector.shape_cast %38 : vector<8x1xi32> to vector<8x1xi32>
    %41 = vector.broadcast %40 : vector<8x1xi32> to vector<8x64xi32>
    %42 = arith.select %34, %39, %41 : vector<8x64xi1>, vector<8x64xi32>
    %c8_i32_16 = arith.constant 8 : i32
    %43 = vector.shape_cast %36 : vector<8x1xi32> to vector<8x1xi32>
    %44 = vector.broadcast %43 : vector<8x1xi32> to vector<8x64xi32>
    %45 = vector.broadcast %c8_i32_16 : i32 to vector<8x64xi32>
    %46 = arith.select %34, %44, %45 : vector<8x64xi1>, vector<8x64xi32>
    %c0_i32_17 = arith.constant 0 : i32
    %47 = vector.broadcast %c0_i32_17 : i32 to vector<8x64xi32>
    %48 = arith.cmpi sle, %42, %47 : vector<8x64xi32>
    %c0_i32_18 = arith.constant 0 : i32
    %49 = vector.broadcast %c0_i32_18 : i32 to vector<8x64xi32>
    %50 = arith.cmpi sgt, %46, %49 : vector<8x64xi32>
    %51 = arith.andi %48, %50 : vector<8x64xi1>
    %c1_i32_19 = arith.constant 1 : i32
    %52 = vector.broadcast %c1_i32_19 : i32 to vector<8x64xi32>
    %53 = arith.cmpi sle, %42, %52 : vector<8x64xi32>
    %c1_i32_20 = arith.constant 1 : i32
    %54 = vector.broadcast %c1_i32_20 : i32 to vector<8x64xi32>
    %55 = arith.cmpi sgt, %46, %54 : vector<8x64xi32>
    %56 = arith.andi %53, %55 : vector<8x64xi1>
    %c2_i32 = arith.constant 2 : i32
    %57 = vector.broadcast %c2_i32 : i32 to vector<8x64xi32>
    %58 = arith.cmpi sle, %42, %57 : vector<8x64xi32>
    %c2_i32_21 = arith.constant 2 : i32
    %59 = vector.broadcast %c2_i32_21 : i32 to vector<8x64xi32>
    %60 = arith.cmpi sgt, %46, %59 : vector<8x64xi32>
    %61 = arith.andi %58, %60 : vector<8x64xi1>
    %c3_i32 = arith.constant 3 : i32
    %62 = vector.broadcast %c3_i32 : i32 to vector<8x64xi32>
    %63 = arith.cmpi sle, %42, %62 : vector<8x64xi32>
    %c3_i32_22 = arith.constant 3 : i32
    %64 = vector.broadcast %c3_i32_22 : i32 to vector<8x64xi32>
    %65 = arith.cmpi sgt, %46, %64 : vector<8x64xi32>
    %66 = arith.andi %63, %65 : vector<8x64xi1>
    %c4_i32 = arith.constant 4 : i32
    %67 = vector.broadcast %c4_i32 : i32 to vector<8x64xi32>
    %68 = arith.cmpi sle, %42, %67 : vector<8x64xi32>
    %c4_i32_23 = arith.constant 4 : i32
    %69 = vector.broadcast %c4_i32_23 : i32 to vector<8x64xi32>
    %70 = arith.cmpi sgt, %46, %69 : vector<8x64xi32>
    %71 = arith.andi %68, %70 : vector<8x64xi1>
    %c5_i32 = arith.constant 5 : i32
    %72 = vector.broadcast %c5_i32 : i32 to vector<8x64xi32>
    %73 = arith.cmpi sle, %42, %72 : vector<8x64xi32>
    %c5_i32_24 = arith.constant 5 : i32
    %74 = vector.broadcast %c5_i32_24 : i32 to vector<8x64xi32>
    %75 = arith.cmpi sgt, %46, %74 : vector<8x64xi32>
    %76 = arith.andi %73, %75 : vector<8x64xi1>
    %c6_i32 = arith.constant 6 : i32
    %77 = vector.broadcast %c6_i32 : i32 to vector<8x64xi32>
    %78 = arith.cmpi sle, %42, %77 : vector<8x64xi32>
    %c6_i32_25 = arith.constant 6 : i32
    %79 = vector.broadcast %c6_i32_25 : i32 to vector<8x64xi32>
    %80 = arith.cmpi sgt, %46, %79 : vector<8x64xi32>
    %81 = arith.andi %78, %80 : vector<8x64xi1>
    %c7_i32 = arith.constant 7 : i32
    %82 = vector.broadcast %c7_i32 : i32 to vector<8x64xi32>
    %83 = arith.cmpi sle, %42, %82 : vector<8x64xi32>
    %c7_i32_26 = arith.constant 7 : i32
    %84 = vector.broadcast %c7_i32_26 : i32 to vector<8x64xi32>
    %85 = arith.cmpi sgt, %46, %84 : vector<8x64xi32>
    %86 = arith.andi %83, %85 : vector<8x64xi1>
    %c0_27 = arith.constant 0 : index
    %c0_28 = arith.constant 0 : index
    %87 = vector.load %arg1[%c0_27, %c0_28] : memref<64x16xf32, #tpu.memory_space<vmem>>, vector<64x16xf32>
    %cst_29 = arith.constant dense<0.000000e+00> : vector<64x256xf32>
    %88 = tpu.matmul %87, %0, %cst_29 {dimension_numbers = #tpu.dot_dimension_numbers<[1], [0], [0], [1], [0, 0, 1, 1], [], []>} : vector<64x16xf32>, vector<16x256xf32>, vector<64x256xf32> -> vector<64x256xf32>
    %89 = vector.broadcast %5 : vector<1x256xf32> to vector<64x256xf32>
    %90 = arith.addf %88, %89 : vector<64x256xf32>
    %cst_30 = arith.constant 0.000000e+00 : f32
    %91 = vector.broadcast %cst_30 : f32 to vector<8x64xf32>
    %cst_31 = arith.constant 0.000000e+00 : f32
    %92 = vector.broadcast %cst_31 : f32 to vector<8x64xf32>
    %93 = vector.extract_strided_slice %90 {offsets = [0, 0], sizes = [8, 256], strides = [1, 1]} : vector<64x256xf32> to vector<8x256xf32>
    %94 = vector.extract_strided_slice %90 {offsets = [56, 0], sizes = [8, 256], strides = [1, 1]} : vector<64x256xf32> to vector<8x256xf32>
    %95 = arith.select %26, %93, %94 : vector<8x256xi1>, vector<8x256xf32>
    %cst_32 = arith.constant dense<0.000000e+00> : vector<8x256xf32>
    %96 = tpu.matmul %91, %2, %cst_32 {dimension_numbers = #tpu.dot_dimension_numbers<[1], [0], [0], [1], [0, 0, 1, 1], [], []>} : vector<8x64xf32>, vector<64x256xf32>, vector<8x256xf32> -> vector<8x256xf32>
    %97 = arith.addf %95, %96 : vector<8x256xf32>
    %98 = arith.negf %97 : vector<8x256xf32>
    %99 = math.exp %98 : vector<8x256xf32>
    %cst_33 = arith.constant 1.000000e+00 : f32
    %100 = vector.broadcast %cst_33 : f32 to vector<8x256xf32>
    %101 = arith.addf %100, %99 : vector<8x256xf32>
    %102 = arith.divf %100, %101 : vector<8x256xf32>
    %103 = math.tanh %97 : vector<8x256xf32>
    %104 = arith.select %31, %103, %102 : vector<8x256xi1>, vector<8x256xf32>
    %105 = vector.extract_strided_slice %104 {offsets = [0, 0], sizes = [8, 64], strides = [1, 1]} : vector<8x256xf32> to vector<8x64xf32>
    %106 = vector.extract_strided_slice %104 {offsets = [0, 64], sizes = [8, 64], strides = [1, 1]} : vector<8x256xf32> to vector<8x64xf32>
    %107 = vector.extract_strided_slice %104 {offsets = [0, 128], sizes = [8, 64], strides = [1, 1]} : vector<8x256xf32> to vector<8x64xf32>
    %108 = vector.extract_strided_slice %104 {offsets = [0, 192], sizes = [8, 64], strides = [1, 1]} : vector<8x256xf32> to vector<8x64xf32>
    %109 = arith.mulf %106, %92 : vector<8x64xf32>
    %110 = arith.mulf %105, %107 : vector<8x64xf32>
    %111 = arith.addf %109, %110 : vector<8x64xf32>
    %112 = math.tanh %111 : vector<8x64xf32>
    %113 = arith.mulf %108, %112 : vector<8x64xf32>
    %114 = arith.select %51, %113, %91 : vector<8x64xi1>, vector<8x64xf32>
    %115 = arith.select %51, %111, %92 : vector<8x64xi1>, vector<8x64xf32>
    %cst_34 = arith.constant 0.000000e+00 : f32
    %116 = vector.broadcast %cst_34 : f32 to vector<8x64xf32>
    %117 = arith.select %51, %113, %116 : vector<8x64xi1>, vector<8x64xf32>
    %c0_35 = arith.constant 0 : index
    %c0_36 = arith.constant 0 : index
    %118 = vector.load %arg6[%c0_35, %c0_36] : memref<64x64xf32, #tpu.memory_space<vmem>>, vector<8x64xf32>
    tpu.vector_store %arg6[%c0_35, %c0_36], %117 masked %34 {strides = array<i32>} : memref<64x64xf32, #tpu.memory_space<vmem>>, vector<8x64xf32>, vector<8x64xi1>
    %c56 = arith.constant 56 : index
    %c0_37 = arith.constant 0 : index
    %119 = vector.load %arg6[%c56, %c0_37] : memref<64x64xf32, #tpu.memory_space<vmem>>, vector<8x64xf32>
    tpu.vector_store %arg6[%c56, %c0_37], %117 masked %35 {strides = array<i32>} : memref<64x64xf32, #tpu.memory_space<vmem>>, vector<8x64xf32>, vector<8x64xi1>
    %120 = vector.extract_strided_slice %90 {offsets = [8, 0], sizes = [8, 256], strides = [1, 1]} : vector<64x256xf32> to vector<8x256xf32>
    %121 = vector.extract_strided_slice %90 {offsets = [48, 0], sizes = [8, 256], strides = [1, 1]} : vector<64x256xf32> to vector<8x256xf32>
    %122 = arith.select %26, %120, %121 : vector<8x256xi1>, vector<8x256xf32>
    %cst_38 = arith.constant dense<0.000000e+00> : vector<8x256xf32>
    %123 = tpu.matmul %114, %2, %cst_38 {dimension_numbers = #tpu.dot_dimension_numbers<[1], [0], [0], [1], [0, 0, 1, 1], [], []>} : vector<8x64xf32>, vector<64x256xf32>, vector<8x256xf32> -> vector<8x256xf32>
    %124 = arith.addf %122, %123 : vector<8x256xf32>
    %125 = arith.negf %124 : vector<8x256xf32>
    %126 = math.exp %125 : vector<8x256xf32>
    %cst_39 = arith.constant 1.000000e+00 : f32
    %127 = vector.broadcast %cst_39 : f32 to vector<8x256xf32>
    %128 = arith.addf %127, %126 : vector<8x256xf32>
    %129 = arith.divf %127, %128 : vector<8x256xf32>
    %130 = math.tanh %124 : vector<8x256xf32>
    %131 = arith.select %31, %130, %129 : vector<8x256xi1>, vector<8x256xf32>
    %132 = vector.extract_strided_slice %131 {offsets = [0, 0], sizes = [8, 64], strides = [1, 1]} : vector<8x256xf32> to vector<8x64xf32>
    %133 = vector.extract_strided_slice %131 {offsets = [0, 64], sizes = [8, 64], strides = [1, 1]} : vector<8x256xf32> to vector<8x64xf32>
    %134 = vector.extract_strided_slice %131 {offsets = [0, 128], sizes = [8, 64], strides = [1, 1]} : vector<8x256xf32> to vector<8x64xf32>
    %135 = vector.extract_strided_slice %131 {offsets = [0, 192], sizes = [8, 64], strides = [1, 1]} : vector<8x256xf32> to vector<8x64xf32>
    %136 = arith.mulf %133, %115 : vector<8x64xf32>
    %137 = arith.mulf %132, %134 : vector<8x64xf32>
    %138 = arith.addf %136, %137 : vector<8x64xf32>
    %139 = math.tanh %138 : vector<8x64xf32>
    %140 = arith.mulf %135, %139 : vector<8x64xf32>
    %141 = arith.select %56, %140, %114 : vector<8x64xi1>, vector<8x64xf32>
    %142 = arith.select %56, %138, %115 : vector<8x64xi1>, vector<8x64xf32>
    %cst_40 = arith.constant 0.000000e+00 : f32
    %143 = vector.broadcast %cst_40 : f32 to vector<8x64xf32>
    %144 = arith.select %56, %140, %143 : vector<8x64xi1>, vector<8x64xf32>
    %c8 = arith.constant 8 : index
    %c0_41 = arith.constant 0 : index
    %145 = vector.load %arg6[%c8, %c0_41] : memref<64x64xf32, #tpu.memory_space<vmem>>, vector<8x64xf32>
    tpu.vector_store %arg6[%c8, %c0_41], %144 masked %34 {strides = array<i32>} : memref<64x64xf32, #tpu.memory_space<vmem>>, vector<8x64xf32>, vector<8x64xi1>
    %c48 = arith.constant 48 : index
    %c0_42 = arith.constant 0 : index
    %146 = vector.load %arg6[%c48, %c0_42] : memref<64x64xf32, #tpu.memory_space<vmem>>, vector<8x64xf32>
    tpu.vector_store %arg6[%c48, %c0_42], %144 masked %35 {strides = array<i32>} : memref<64x64xf32, #tpu.memory_space<vmem>>, vector<8x64xf32>, vector<8x64xi1>
    %147 = vector.extract_strided_slice %90 {offsets = [16, 0], sizes = [8, 256], strides = [1, 1]} : vector<64x256xf32> to vector<8x256xf32>
    %148 = vector.extract_strided_slice %90 {offsets = [40, 0], sizes = [8, 256], strides = [1, 1]} : vector<64x256xf32> to vector<8x256xf32>
    %149 = arith.select %26, %147, %148 : vector<8x256xi1>, vector<8x256xf32>
    %cst_43 = arith.constant dense<0.000000e+00> : vector<8x256xf32>
    %150 = tpu.matmul %141, %2, %cst_43 {dimension_numbers = #tpu.dot_dimension_numbers<[1], [0], [0], [1], [0, 0, 1, 1], [], []>} : vector<8x64xf32>, vector<64x256xf32>, vector<8x256xf32> -> vector<8x256xf32>
    %151 = arith.addf %149, %150 : vector<8x256xf32>
    %152 = arith.negf %151 : vector<8x256xf32>
    %153 = math.exp %152 : vector<8x256xf32>
    %cst_44 = arith.constant 1.000000e+00 : f32
    %154 = vector.broadcast %cst_44 : f32 to vector<8x256xf32>
    %155 = arith.addf %154, %153 : vector<8x256xf32>
    %156 = arith.divf %154, %155 : vector<8x256xf32>
    %157 = math.tanh %151 : vector<8x256xf32>
    %158 = arith.select %31, %157, %156 : vector<8x256xi1>, vector<8x256xf32>
    %159 = vector.extract_strided_slice %158 {offsets = [0, 0], sizes = [8, 64], strides = [1, 1]} : vector<8x256xf32> to vector<8x64xf32>
    %160 = vector.extract_strided_slice %158 {offsets = [0, 64], sizes = [8, 64], strides = [1, 1]} : vector<8x256xf32> to vector<8x64xf32>
    %161 = vector.extract_strided_slice %158 {offsets = [0, 128], sizes = [8, 64], strides = [1, 1]} : vector<8x256xf32> to vector<8x64xf32>
    %162 = vector.extract_strided_slice %158 {offsets = [0, 192], sizes = [8, 64], strides = [1, 1]} : vector<8x256xf32> to vector<8x64xf32>
    %163 = arith.mulf %160, %142 : vector<8x64xf32>
    %164 = arith.mulf %159, %161 : vector<8x64xf32>
    %165 = arith.addf %163, %164 : vector<8x64xf32>
    %166 = math.tanh %165 : vector<8x64xf32>
    %167 = arith.mulf %162, %166 : vector<8x64xf32>
    %168 = arith.select %61, %167, %141 : vector<8x64xi1>, vector<8x64xf32>
    %169 = arith.select %61, %165, %142 : vector<8x64xi1>, vector<8x64xf32>
    %cst_45 = arith.constant 0.000000e+00 : f32
    %170 = vector.broadcast %cst_45 : f32 to vector<8x64xf32>
    %171 = arith.select %61, %167, %170 : vector<8x64xi1>, vector<8x64xf32>
    %c16_46 = arith.constant 16 : index
    %c0_47 = arith.constant 0 : index
    %172 = vector.load %arg6[%c16_46, %c0_47] : memref<64x64xf32, #tpu.memory_space<vmem>>, vector<8x64xf32>
    tpu.vector_store %arg6[%c16_46, %c0_47], %171 masked %34 {strides = array<i32>} : memref<64x64xf32, #tpu.memory_space<vmem>>, vector<8x64xf32>, vector<8x64xi1>
    %c40 = arith.constant 40 : index
    %c0_48 = arith.constant 0 : index
    %173 = vector.load %arg6[%c40, %c0_48] : memref<64x64xf32, #tpu.memory_space<vmem>>, vector<8x64xf32>
    tpu.vector_store %arg6[%c40, %c0_48], %171 masked %35 {strides = array<i32>} : memref<64x64xf32, #tpu.memory_space<vmem>>, vector<8x64xf32>, vector<8x64xi1>
    %174 = vector.extract_strided_slice %90 {offsets = [24, 0], sizes = [8, 256], strides = [1, 1]} : vector<64x256xf32> to vector<8x256xf32>
    %175 = vector.extract_strided_slice %90 {offsets = [32, 0], sizes = [8, 256], strides = [1, 1]} : vector<64x256xf32> to vector<8x256xf32>
    %176 = arith.select %26, %174, %175 : vector<8x256xi1>, vector<8x256xf32>
    %cst_49 = arith.constant dense<0.000000e+00> : vector<8x256xf32>
    %177 = tpu.matmul %168, %2, %cst_49 {dimension_numbers = #tpu.dot_dimension_numbers<[1], [0], [0], [1], [0, 0, 1, 1], [], []>} : vector<8x64xf32>, vector<64x256xf32>, vector<8x256xf32> -> vector<8x256xf32>
    %178 = arith.addf %176, %177 : vector<8x256xf32>
    %179 = arith.negf %178 : vector<8x256xf32>
    %180 = math.exp %179 : vector<8x256xf32>
    %cst_50 = arith.constant 1.000000e+00 : f32
    %181 = vector.broadcast %cst_50 : f32 to vector<8x256xf32>
    %182 = arith.addf %181, %180 : vector<8x256xf32>
    %183 = arith.divf %181, %182 : vector<8x256xf32>
    %184 = math.tanh %178 : vector<8x256xf32>
    %185 = arith.select %31, %184, %183 : vector<8x256xi1>, vector<8x256xf32>
    %186 = vector.extract_strided_slice %185 {offsets = [0, 0], sizes = [8, 64], strides = [1, 1]} : vector<8x256xf32> to vector<8x64xf32>
    %187 = vector.extract_strided_slice %185 {offsets = [0, 64], sizes = [8, 64], strides = [1, 1]} : vector<8x256xf32> to vector<8x64xf32>
    %188 = vector.extract_strided_slice %185 {offsets = [0, 128], sizes = [8, 64], strides = [1, 1]} : vector<8x256xf32> to vector<8x64xf32>
    %189 = vector.extract_strided_slice %185 {offsets = [0, 192], sizes = [8, 64], strides = [1, 1]} : vector<8x256xf32> to vector<8x64xf32>
    %190 = arith.mulf %187, %169 : vector<8x64xf32>
    %191 = arith.mulf %186, %188 : vector<8x64xf32>
    %192 = arith.addf %190, %191 : vector<8x64xf32>
    %193 = math.tanh %192 : vector<8x64xf32>
    %194 = arith.mulf %189, %193 : vector<8x64xf32>
    %195 = arith.select %66, %194, %168 : vector<8x64xi1>, vector<8x64xf32>
    %196 = arith.select %66, %192, %169 : vector<8x64xi1>, vector<8x64xf32>
    %cst_51 = arith.constant 0.000000e+00 : f32
    %197 = vector.broadcast %cst_51 : f32 to vector<8x64xf32>
    %198 = arith.select %66, %194, %197 : vector<8x64xi1>, vector<8x64xf32>
    %c24 = arith.constant 24 : index
    %c0_52 = arith.constant 0 : index
    %199 = vector.load %arg6[%c24, %c0_52] : memref<64x64xf32, #tpu.memory_space<vmem>>, vector<8x64xf32>
    tpu.vector_store %arg6[%c24, %c0_52], %198 masked %34 {strides = array<i32>} : memref<64x64xf32, #tpu.memory_space<vmem>>, vector<8x64xf32>, vector<8x64xi1>
    %c32 = arith.constant 32 : index
    %c0_53 = arith.constant 0 : index
    %200 = vector.load %arg6[%c32, %c0_53] : memref<64x64xf32, #tpu.memory_space<vmem>>, vector<8x64xf32>
    tpu.vector_store %arg6[%c32, %c0_53], %198 masked %35 {strides = array<i32>} : memref<64x64xf32, #tpu.memory_space<vmem>>, vector<8x64xf32>, vector<8x64xi1>
    %201 = vector.extract_strided_slice %90 {offsets = [32, 0], sizes = [8, 256], strides = [1, 1]} : vector<64x256xf32> to vector<8x256xf32>
    %202 = vector.extract_strided_slice %90 {offsets = [24, 0], sizes = [8, 256], strides = [1, 1]} : vector<64x256xf32> to vector<8x256xf32>
    %203 = arith.select %26, %201, %202 : vector<8x256xi1>, vector<8x256xf32>
    %cst_54 = arith.constant dense<0.000000e+00> : vector<8x256xf32>
    %204 = tpu.matmul %195, %2, %cst_54 {dimension_numbers = #tpu.dot_dimension_numbers<[1], [0], [0], [1], [0, 0, 1, 1], [], []>} : vector<8x64xf32>, vector<64x256xf32>, vector<8x256xf32> -> vector<8x256xf32>
    %205 = arith.addf %203, %204 : vector<8x256xf32>
    %206 = arith.negf %205 : vector<8x256xf32>
    %207 = math.exp %206 : vector<8x256xf32>
    %cst_55 = arith.constant 1.000000e+00 : f32
    %208 = vector.broadcast %cst_55 : f32 to vector<8x256xf32>
    %209 = arith.addf %208, %207 : vector<8x256xf32>
    %210 = arith.divf %208, %209 : vector<8x256xf32>
    %211 = math.tanh %205 : vector<8x256xf32>
    %212 = arith.select %31, %211, %210 : vector<8x256xi1>, vector<8x256xf32>
    %213 = vector.extract_strided_slice %212 {offsets = [0, 0], sizes = [8, 64], strides = [1, 1]} : vector<8x256xf32> to vector<8x64xf32>
    %214 = vector.extract_strided_slice %212 {offsets = [0, 64], sizes = [8, 64], strides = [1, 1]} : vector<8x256xf32> to vector<8x64xf32>
    %215 = vector.extract_strided_slice %212 {offsets = [0, 128], sizes = [8, 64], strides = [1, 1]} : vector<8x256xf32> to vector<8x64xf32>
    %216 = vector.extract_strided_slice %212 {offsets = [0, 192], sizes = [8, 64], strides = [1, 1]} : vector<8x256xf32> to vector<8x64xf32>
    %217 = arith.mulf %214, %196 : vector<8x64xf32>
    %218 = arith.mulf %213, %215 : vector<8x64xf32>
    %219 = arith.addf %217, %218 : vector<8x64xf32>
    %220 = math.tanh %219 : vector<8x64xf32>
    %221 = arith.mulf %216, %220 : vector<8x64xf32>
    %222 = arith.select %71, %221, %195 : vector<8x64xi1>, vector<8x64xf32>
    %223 = arith.select %71, %219, %196 : vector<8x64xi1>, vector<8x64xf32>
    %cst_56 = arith.constant 0.000000e+00 : f32
    %224 = vector.broadcast %cst_56 : f32 to vector<8x64xf32>
    %225 = arith.select %71, %221, %224 : vector<8x64xi1>, vector<8x64xf32>
    %c32_57 = arith.constant 32 : index
    %c0_58 = arith.constant 0 : index
    %226 = vector.load %arg6[%c32_57, %c0_58] : memref<64x64xf32, #tpu.memory_space<vmem>>, vector<8x64xf32>
    tpu.vector_store %arg6[%c32_57, %c0_58], %225 masked %34 {strides = array<i32>} : memref<64x64xf32, #tpu.memory_space<vmem>>, vector<8x64xf32>, vector<8x64xi1>
    %c24_59 = arith.constant 24 : index
    %c0_60 = arith.constant 0 : index
    %227 = vector.load %arg6[%c24_59, %c0_60] : memref<64x64xf32, #tpu.memory_space<vmem>>, vector<8x64xf32>
    tpu.vector_store %arg6[%c24_59, %c0_60], %225 masked %35 {strides = array<i32>} : memref<64x64xf32, #tpu.memory_space<vmem>>, vector<8x64xf32>, vector<8x64xi1>
    %228 = vector.extract_strided_slice %90 {offsets = [40, 0], sizes = [8, 256], strides = [1, 1]} : vector<64x256xf32> to vector<8x256xf32>
    %229 = vector.extract_strided_slice %90 {offsets = [16, 0], sizes = [8, 256], strides = [1, 1]} : vector<64x256xf32> to vector<8x256xf32>
    %230 = arith.select %26, %228, %229 : vector<8x256xi1>, vector<8x256xf32>
    %cst_61 = arith.constant dense<0.000000e+00> : vector<8x256xf32>
    %231 = tpu.matmul %222, %2, %cst_61 {dimension_numbers = #tpu.dot_dimension_numbers<[1], [0], [0], [1], [0, 0, 1, 1], [], []>} : vector<8x64xf32>, vector<64x256xf32>, vector<8x256xf32> -> vector<8x256xf32>
    %232 = arith.addf %230, %231 : vector<8x256xf32>
    %233 = arith.negf %232 : vector<8x256xf32>
    %234 = math.exp %233 : vector<8x256xf32>
    %cst_62 = arith.constant 1.000000e+00 : f32
    %235 = vector.broadcast %cst_62 : f32 to vector<8x256xf32>
    %236 = arith.addf %235, %234 : vector<8x256xf32>
    %237 = arith.divf %235, %236 : vector<8x256xf32>
    %238 = math.tanh %232 : vector<8x256xf32>
    %239 = arith.select %31, %238, %237 : vector<8x256xi1>, vector<8x256xf32>
    %240 = vector.extract_strided_slice %239 {offsets = [0, 0], sizes = [8, 64], strides = [1, 1]} : vector<8x256xf32> to vector<8x64xf32>
    %241 = vector.extract_strided_slice %239 {offsets = [0, 64], sizes = [8, 64], strides = [1, 1]} : vector<8x256xf32> to vector<8x64xf32>
    %242 = vector.extract_strided_slice %239 {offsets = [0, 128], sizes = [8, 64], strides = [1, 1]} : vector<8x256xf32> to vector<8x64xf32>
    %243 = vector.extract_strided_slice %239 {offsets = [0, 192], sizes = [8, 64], strides = [1, 1]} : vector<8x256xf32> to vector<8x64xf32>
    %244 = arith.mulf %241, %223 : vector<8x64xf32>
    %245 = arith.mulf %240, %242 : vector<8x64xf32>
    %246 = arith.addf %244, %245 : vector<8x64xf32>
    %247 = math.tanh %246 : vector<8x64xf32>
    %248 = arith.mulf %243, %247 : vector<8x64xf32>
    %249 = arith.select %76, %248, %222 : vector<8x64xi1>, vector<8x64xf32>
    %250 = arith.select %76, %246, %223 : vector<8x64xi1>, vector<8x64xf32>
    %cst_63 = arith.constant 0.000000e+00 : f32
    %251 = vector.broadcast %cst_63 : f32 to vector<8x64xf32>
    %252 = arith.select %76, %248, %251 : vector<8x64xi1>, vector<8x64xf32>
    %c40_64 = arith.constant 40 : index
    %c0_65 = arith.constant 0 : index
    %253 = vector.load %arg6[%c40_64, %c0_65] : memref<64x64xf32, #tpu.memory_space<vmem>>, vector<8x64xf32>
    tpu.vector_store %arg6[%c40_64, %c0_65], %252 masked %34 {strides = array<i32>} : memref<64x64xf32, #tpu.memory_space<vmem>>, vector<8x64xf32>, vector<8x64xi1>
    %c16_66 = arith.constant 16 : index
    %c0_67 = arith.constant 0 : index
    %254 = vector.load %arg6[%c16_66, %c0_67] : memref<64x64xf32, #tpu.memory_space<vmem>>, vector<8x64xf32>
    tpu.vector_store %arg6[%c16_66, %c0_67], %252 masked %35 {strides = array<i32>} : memref<64x64xf32, #tpu.memory_space<vmem>>, vector<8x64xf32>, vector<8x64xi1>
    %255 = vector.extract_strided_slice %90 {offsets = [48, 0], sizes = [8, 256], strides = [1, 1]} : vector<64x256xf32> to vector<8x256xf32>
    %256 = vector.extract_strided_slice %90 {offsets = [8, 0], sizes = [8, 256], strides = [1, 1]} : vector<64x256xf32> to vector<8x256xf32>
    %257 = arith.select %26, %255, %256 : vector<8x256xi1>, vector<8x256xf32>
    %cst_68 = arith.constant dense<0.000000e+00> : vector<8x256xf32>
    %258 = tpu.matmul %249, %2, %cst_68 {dimension_numbers = #tpu.dot_dimension_numbers<[1], [0], [0], [1], [0, 0, 1, 1], [], []>} : vector<8x64xf32>, vector<64x256xf32>, vector<8x256xf32> -> vector<8x256xf32>
    %259 = arith.addf %257, %258 : vector<8x256xf32>
    %260 = arith.negf %259 : vector<8x256xf32>
    %261 = math.exp %260 : vector<8x256xf32>
    %cst_69 = arith.constant 1.000000e+00 : f32
    %262 = vector.broadcast %cst_69 : f32 to vector<8x256xf32>
    %263 = arith.addf %262, %261 : vector<8x256xf32>
    %264 = arith.divf %262, %263 : vector<8x256xf32>
    %265 = math.tanh %259 : vector<8x256xf32>
    %266 = arith.select %31, %265, %264 : vector<8x256xi1>, vector<8x256xf32>
    %267 = vector.extract_strided_slice %266 {offsets = [0, 0], sizes = [8, 64], strides = [1, 1]} : vector<8x256xf32> to vector<8x64xf32>
    %268 = vector.extract_strided_slice %266 {offsets = [0, 64], sizes = [8, 64], strides = [1, 1]} : vector<8x256xf32> to vector<8x64xf32>
    %269 = vector.extract_strided_slice %266 {offsets = [0, 128], sizes = [8, 64], strides = [1, 1]} : vector<8x256xf32> to vector<8x64xf32>
    %270 = vector.extract_strided_slice %266 {offsets = [0, 192], sizes = [8, 64], strides = [1, 1]} : vector<8x256xf32> to vector<8x64xf32>
    %271 = arith.mulf %268, %250 : vector<8x64xf32>
    %272 = arith.mulf %267, %269 : vector<8x64xf32>
    %273 = arith.addf %271, %272 : vector<8x64xf32>
    %274 = math.tanh %273 : vector<8x64xf32>
    %275 = arith.mulf %270, %274 : vector<8x64xf32>
    %276 = arith.select %81, %275, %249 : vector<8x64xi1>, vector<8x64xf32>
    %277 = arith.select %81, %273, %250 : vector<8x64xi1>, vector<8x64xf32>
    %cst_70 = arith.constant 0.000000e+00 : f32
    %278 = vector.broadcast %cst_70 : f32 to vector<8x64xf32>
    %279 = arith.select %81, %275, %278 : vector<8x64xi1>, vector<8x64xf32>
    %c48_71 = arith.constant 48 : index
    %c0_72 = arith.constant 0 : index
    %280 = vector.load %arg6[%c48_71, %c0_72] : memref<64x64xf32, #tpu.memory_space<vmem>>, vector<8x64xf32>
    tpu.vector_store %arg6[%c48_71, %c0_72], %279 masked %34 {strides = array<i32>} : memref<64x64xf32, #tpu.memory_space<vmem>>, vector<8x64xf32>, vector<8x64xi1>
    %c8_73 = arith.constant 8 : index
    %c0_74 = arith.constant 0 : index
    %281 = vector.load %arg6[%c8_73, %c0_74] : memref<64x64xf32, #tpu.memory_space<vmem>>, vector<8x64xf32>
    tpu.vector_store %arg6[%c8_73, %c0_74], %279 masked %35 {strides = array<i32>} : memref<64x64xf32, #tpu.memory_space<vmem>>, vector<8x64xf32>, vector<8x64xi1>
    %282 = vector.extract_strided_slice %90 {offsets = [56, 0], sizes = [8, 256], strides = [1, 1]} : vector<64x256xf32> to vector<8x256xf32>
    %283 = vector.extract_strided_slice %90 {offsets = [0, 0], sizes = [8, 256], strides = [1, 1]} : vector<64x256xf32> to vector<8x256xf32>
    %284 = arith.select %26, %282, %283 : vector<8x256xi1>, vector<8x256xf32>
    %cst_75 = arith.constant dense<0.000000e+00> : vector<8x256xf32>
    %285 = tpu.matmul %276, %2, %cst_75 {dimension_numbers = #tpu.dot_dimension_numbers<[1], [0], [0], [1], [0, 0, 1, 1], [], []>} : vector<8x64xf32>, vector<64x256xf32>, vector<8x256xf32> -> vector<8x256xf32>
    %286 = arith.addf %284, %285 : vector<8x256xf32>
    %287 = arith.negf %286 : vector<8x256xf32>
    %288 = math.exp %287 : vector<8x256xf32>
    %cst_76 = arith.constant 1.000000e+00 : f32
    %289 = vector.broadcast %cst_76 : f32 to vector<8x256xf32>
    %290 = arith.addf %289, %288 : vector<8x256xf32>
    %291 = arith.divf %289, %290 : vector<8x256xf32>
    %292 = math.tanh %286 : vector<8x256xf32>
    %293 = arith.select %31, %292, %291 : vector<8x256xi1>, vector<8x256xf32>
    %294 = vector.extract_strided_slice %293 {offsets = [0, 0], sizes = [8, 64], strides = [1, 1]} : vector<8x256xf32> to vector<8x64xf32>
    %295 = vector.extract_strided_slice %293 {offsets = [0, 64], sizes = [8, 64], strides = [1, 1]} : vector<8x256xf32> to vector<8x64xf32>
    %296 = vector.extract_strided_slice %293 {offsets = [0, 128], sizes = [8, 64], strides = [1, 1]} : vector<8x256xf32> to vector<8x64xf32>
    %297 = vector.extract_strided_slice %293 {offsets = [0, 192], sizes = [8, 64], strides = [1, 1]} : vector<8x256xf32> to vector<8x64xf32>
    %298 = arith.mulf %295, %277 : vector<8x64xf32>
    %299 = arith.mulf %294, %296 : vector<8x64xf32>
    %300 = arith.addf %298, %299 : vector<8x64xf32>
    %301 = math.tanh %300 : vector<8x64xf32>
    %302 = arith.mulf %297, %301 : vector<8x64xf32>
    %cst_77 = arith.constant 0.000000e+00 : f32
    %303 = vector.broadcast %cst_77 : f32 to vector<8x64xf32>
    %304 = arith.select %86, %302, %303 : vector<8x64xi1>, vector<8x64xf32>
    %c56_78 = arith.constant 56 : index
    %c0_79 = arith.constant 0 : index
    %305 = vector.load %arg6[%c56_78, %c0_79] : memref<64x64xf32, #tpu.memory_space<vmem>>, vector<8x64xf32>
    tpu.vector_store %arg6[%c56_78, %c0_79], %304 masked %34 {strides = array<i32>} : memref<64x64xf32, #tpu.memory_space<vmem>>, vector<8x64xf32>, vector<8x64xi1>
    %c0_80 = arith.constant 0 : index
    %c0_81 = arith.constant 0 : index
    %306 = vector.load %arg6[%c0_80, %c0_81] : memref<64x64xf32, #tpu.memory_space<vmem>>, vector<8x64xf32>
    tpu.vector_store %arg6[%c0_80, %c0_81], %304 masked %35 {strides = array<i32>} : memref<64x64xf32, #tpu.memory_space<vmem>>, vector<8x64xf32>, vector<8x64xi1>
    %c0_82 = arith.constant 0 : index
    %c0_83 = arith.constant 0 : index
    %307 = vector.load %arg6[%c0_82, %c0_83] : memref<64x64xf32, #tpu.memory_space<vmem>>, vector<64x64xf32>
    %cst_84 = arith.constant dense<0.000000e+00> : vector<64x256xf32>
    %308 = tpu.matmul %307, %1, %cst_84 {dimension_numbers = #tpu.dot_dimension_numbers<[1], [0], [0], [1], [0, 0, 1, 1], [], []>} : vector<64x64xf32>, vector<64x256xf32>, vector<64x256xf32> -> vector<64x256xf32>
    %309 = vector.broadcast %6 : vector<1x256xf32> to vector<64x256xf32>
    %310 = arith.addf %308, %309 : vector<64x256xf32>
    %cst_85 = arith.constant 0.000000e+00 : f32
    %311 = vector.broadcast %cst_85 : f32 to vector<8x64xf32>
    %cst_86 = arith.constant 0.000000e+00 : f32
    %312 = vector.broadcast %cst_86 : f32 to vector<8x64xf32>
    %313 = vector.extract_strided_slice %310 {offsets = [0, 0], sizes = [8, 256], strides = [1, 1]} : vector<64x256xf32> to vector<8x256xf32>
    %314 = vector.extract_strided_slice %310 {offsets = [56, 0], sizes = [8, 256], strides = [1, 1]} : vector<64x256xf32> to vector<8x256xf32>
    %315 = arith.select %26, %313, %314 : vector<8x256xi1>, vector<8x256xf32>
    %cst_87 = arith.constant dense<0.000000e+00> : vector<8x256xf32>
    %316 = tpu.matmul %311, %3, %cst_87 {dimension_numbers = #tpu.dot_dimension_numbers<[1], [0], [0], [1], [0, 0, 1, 1], [], []>} : vector<8x64xf32>, vector<64x256xf32>, vector<8x256xf32> -> vector<8x256xf32>
    %317 = arith.addf %315, %316 : vector<8x256xf32>
    %318 = arith.negf %317 : vector<8x256xf32>
    %319 = math.exp %318 : vector<8x256xf32>
    %cst_88 = arith.constant 1.000000e+00 : f32
    %320 = vector.broadcast %cst_88 : f32 to vector<8x256xf32>
    %321 = arith.addf %320, %319 : vector<8x256xf32>
    %322 = arith.divf %320, %321 : vector<8x256xf32>
    %323 = math.tanh %317 : vector<8x256xf32>
    %324 = arith.select %31, %323, %322 : vector<8x256xi1>, vector<8x256xf32>
    %325 = vector.extract_strided_slice %324 {offsets = [0, 0], sizes = [8, 64], strides = [1, 1]} : vector<8x256xf32> to vector<8x64xf32>
    %326 = vector.extract_strided_slice %324 {offsets = [0, 64], sizes = [8, 64], strides = [1, 1]} : vector<8x256xf32> to vector<8x64xf32>
    %327 = vector.extract_strided_slice %324 {offsets = [0, 128], sizes = [8, 64], strides = [1, 1]} : vector<8x256xf32> to vector<8x64xf32>
    %328 = vector.extract_strided_slice %324 {offsets = [0, 192], sizes = [8, 64], strides = [1, 1]} : vector<8x256xf32> to vector<8x64xf32>
    %329 = arith.mulf %326, %312 : vector<8x64xf32>
    %330 = arith.mulf %325, %327 : vector<8x64xf32>
    %331 = arith.addf %329, %330 : vector<8x64xf32>
    %332 = math.tanh %331 : vector<8x64xf32>
    %333 = arith.mulf %328, %332 : vector<8x64xf32>
    %334 = arith.select %51, %333, %311 : vector<8x64xi1>, vector<8x64xf32>
    %335 = arith.select %51, %331, %312 : vector<8x64xi1>, vector<8x64xf32>
    %cst_89 = arith.constant 0.000000e+00 : f32
    %336 = vector.broadcast %cst_89 : f32 to vector<8x64xf32>
    %337 = arith.select %51, %333, %336 : vector<8x64xi1>, vector<8x64xf32>
    %c0_90 = arith.constant 0 : index
    %c0_91 = arith.constant 0 : index
    %338 = vector.load %arg7[%c0_90, %c0_91] : memref<64x64xf32, #tpu.memory_space<vmem>>, vector<8x64xf32>
    tpu.vector_store %arg7[%c0_90, %c0_91], %337 masked %34 {strides = array<i32>} : memref<64x64xf32, #tpu.memory_space<vmem>>, vector<8x64xf32>, vector<8x64xi1>
    %c56_92 = arith.constant 56 : index
    %c0_93 = arith.constant 0 : index
    %339 = vector.load %arg7[%c56_92, %c0_93] : memref<64x64xf32, #tpu.memory_space<vmem>>, vector<8x64xf32>
    tpu.vector_store %arg7[%c56_92, %c0_93], %337 masked %35 {strides = array<i32>} : memref<64x64xf32, #tpu.memory_space<vmem>>, vector<8x64xf32>, vector<8x64xi1>
    %340 = vector.extract_strided_slice %310 {offsets = [8, 0], sizes = [8, 256], strides = [1, 1]} : vector<64x256xf32> to vector<8x256xf32>
    %341 = vector.extract_strided_slice %310 {offsets = [48, 0], sizes = [8, 256], strides = [1, 1]} : vector<64x256xf32> to vector<8x256xf32>
    %342 = arith.select %26, %340, %341 : vector<8x256xi1>, vector<8x256xf32>
    %cst_94 = arith.constant dense<0.000000e+00> : vector<8x256xf32>
    %343 = tpu.matmul %334, %3, %cst_94 {dimension_numbers = #tpu.dot_dimension_numbers<[1], [0], [0], [1], [0, 0, 1, 1], [], []>} : vector<8x64xf32>, vector<64x256xf32>, vector<8x256xf32> -> vector<8x256xf32>
    %344 = arith.addf %342, %343 : vector<8x256xf32>
    %345 = arith.negf %344 : vector<8x256xf32>
    %346 = math.exp %345 : vector<8x256xf32>
    %cst_95 = arith.constant 1.000000e+00 : f32
    %347 = vector.broadcast %cst_95 : f32 to vector<8x256xf32>
    %348 = arith.addf %347, %346 : vector<8x256xf32>
    %349 = arith.divf %347, %348 : vector<8x256xf32>
    %350 = math.tanh %344 : vector<8x256xf32>
    %351 = arith.select %31, %350, %349 : vector<8x256xi1>, vector<8x256xf32>
    %352 = vector.extract_strided_slice %351 {offsets = [0, 0], sizes = [8, 64], strides = [1, 1]} : vector<8x256xf32> to vector<8x64xf32>
    %353 = vector.extract_strided_slice %351 {offsets = [0, 64], sizes = [8, 64], strides = [1, 1]} : vector<8x256xf32> to vector<8x64xf32>
    %354 = vector.extract_strided_slice %351 {offsets = [0, 128], sizes = [8, 64], strides = [1, 1]} : vector<8x256xf32> to vector<8x64xf32>
    %355 = vector.extract_strided_slice %351 {offsets = [0, 192], sizes = [8, 64], strides = [1, 1]} : vector<8x256xf32> to vector<8x64xf32>
    %356 = arith.mulf %353, %335 : vector<8x64xf32>
    %357 = arith.mulf %352, %354 : vector<8x64xf32>
    %358 = arith.addf %356, %357 : vector<8x64xf32>
    %359 = math.tanh %358 : vector<8x64xf32>
    %360 = arith.mulf %355, %359 : vector<8x64xf32>
    %361 = arith.select %56, %360, %334 : vector<8x64xi1>, vector<8x64xf32>
    %362 = arith.select %56, %358, %335 : vector<8x64xi1>, vector<8x64xf32>
    %cst_96 = arith.constant 0.000000e+00 : f32
    %363 = vector.broadcast %cst_96 : f32 to vector<8x64xf32>
    %364 = arith.select %56, %360, %363 : vector<8x64xi1>, vector<8x64xf32>
    %c8_97 = arith.constant 8 : index
    %c0_98 = arith.constant 0 : index
    %365 = vector.load %arg7[%c8_97, %c0_98] : memref<64x64xf32, #tpu.memory_space<vmem>>, vector<8x64xf32>
    tpu.vector_store %arg7[%c8_97, %c0_98], %364 masked %34 {strides = array<i32>} : memref<64x64xf32, #tpu.memory_space<vmem>>, vector<8x64xf32>, vector<8x64xi1>
    %c48_99 = arith.constant 48 : index
    %c0_100 = arith.constant 0 : index
    %366 = vector.load %arg7[%c48_99, %c0_100] : memref<64x64xf32, #tpu.memory_space<vmem>>, vector<8x64xf32>
    tpu.vector_store %arg7[%c48_99, %c0_100], %364 masked %35 {strides = array<i32>} : memref<64x64xf32, #tpu.memory_space<vmem>>, vector<8x64xf32>, vector<8x64xi1>
    %367 = vector.extract_strided_slice %310 {offsets = [16, 0], sizes = [8, 256], strides = [1, 1]} : vector<64x256xf32> to vector<8x256xf32>
    %368 = vector.extract_strided_slice %310 {offsets = [40, 0], sizes = [8, 256], strides = [1, 1]} : vector<64x256xf32> to vector<8x256xf32>
    %369 = arith.select %26, %367, %368 : vector<8x256xi1>, vector<8x256xf32>
    %cst_101 = arith.constant dense<0.000000e+00> : vector<8x256xf32>
    %370 = tpu.matmul %361, %3, %cst_101 {dimension_numbers = #tpu.dot_dimension_numbers<[1], [0], [0], [1], [0, 0, 1, 1], [], []>} : vector<8x64xf32>, vector<64x256xf32>, vector<8x256xf32> -> vector<8x256xf32>
    %371 = arith.addf %369, %370 : vector<8x256xf32>
    %372 = arith.negf %371 : vector<8x256xf32>
    %373 = math.exp %372 : vector<8x256xf32>
    %cst_102 = arith.constant 1.000000e+00 : f32
    %374 = vector.broadcast %cst_102 : f32 to vector<8x256xf32>
    %375 = arith.addf %374, %373 : vector<8x256xf32>
    %376 = arith.divf %374, %375 : vector<8x256xf32>
    %377 = math.tanh %371 : vector<8x256xf32>
    %378 = arith.select %31, %377, %376 : vector<8x256xi1>, vector<8x256xf32>
    %379 = vector.extract_strided_slice %378 {offsets = [0, 0], sizes = [8, 64], strides = [1, 1]} : vector<8x256xf32> to vector<8x64xf32>
    %380 = vector.extract_strided_slice %378 {offsets = [0, 64], sizes = [8, 64], strides = [1, 1]} : vector<8x256xf32> to vector<8x64xf32>
    %381 = vector.extract_strided_slice %378 {offsets = [0, 128], sizes = [8, 64], strides = [1, 1]} : vector<8x256xf32> to vector<8x64xf32>
    %382 = vector.extract_strided_slice %378 {offsets = [0, 192], sizes = [8, 64], strides = [1, 1]} : vector<8x256xf32> to vector<8x64xf32>
    %383 = arith.mulf %380, %362 : vector<8x64xf32>
    %384 = arith.mulf %379, %381 : vector<8x64xf32>
    %385 = arith.addf %383, %384 : vector<8x64xf32>
    %386 = math.tanh %385 : vector<8x64xf32>
    %387 = arith.mulf %382, %386 : vector<8x64xf32>
    %388 = arith.select %61, %387, %361 : vector<8x64xi1>, vector<8x64xf32>
    %389 = arith.select %61, %385, %362 : vector<8x64xi1>, vector<8x64xf32>
    %cst_103 = arith.constant 0.000000e+00 : f32
    %390 = vector.broadcast %cst_103 : f32 to vector<8x64xf32>
    %391 = arith.select %61, %387, %390 : vector<8x64xi1>, vector<8x64xf32>
    %c16_104 = arith.constant 16 : index
    %c0_105 = arith.constant 0 : index
    %392 = vector.load %arg7[%c16_104, %c0_105] : memref<64x64xf32, #tpu.memory_space<vmem>>, vector<8x64xf32>
    tpu.vector_store %arg7[%c16_104, %c0_105], %391 masked %34 {strides = array<i32>} : memref<64x64xf32, #tpu.memory_space<vmem>>, vector<8x64xf32>, vector<8x64xi1>
    %c40_106 = arith.constant 40 : index
    %c0_107 = arith.constant 0 : index
    %393 = vector.load %arg7[%c40_106, %c0_107] : memref<64x64xf32, #tpu.memory_space<vmem>>, vector<8x64xf32>
    tpu.vector_store %arg7[%c40_106, %c0_107], %391 masked %35 {strides = array<i32>} : memref<64x64xf32, #tpu.memory_space<vmem>>, vector<8x64xf32>, vector<8x64xi1>
    %394 = vector.extract_strided_slice %310 {offsets = [24, 0], sizes = [8, 256], strides = [1, 1]} : vector<64x256xf32> to vector<8x256xf32>
    %395 = vector.extract_strided_slice %310 {offsets = [32, 0], sizes = [8, 256], strides = [1, 1]} : vector<64x256xf32> to vector<8x256xf32>
    %396 = arith.select %26, %394, %395 : vector<8x256xi1>, vector<8x256xf32>
    %cst_108 = arith.constant dense<0.000000e+00> : vector<8x256xf32>
    %397 = tpu.matmul %388, %3, %cst_108 {dimension_numbers = #tpu.dot_dimension_numbers<[1], [0], [0], [1], [0, 0, 1, 1], [], []>} : vector<8x64xf32>, vector<64x256xf32>, vector<8x256xf32> -> vector<8x256xf32>
    %398 = arith.addf %396, %397 : vector<8x256xf32>
    %399 = arith.negf %398 : vector<8x256xf32>
    %400 = math.exp %399 : vector<8x256xf32>
    %cst_109 = arith.constant 1.000000e+00 : f32
    %401 = vector.broadcast %cst_109 : f32 to vector<8x256xf32>
    %402 = arith.addf %401, %400 : vector<8x256xf32>
    %403 = arith.divf %401, %402 : vector<8x256xf32>
    %404 = math.tanh %398 : vector<8x256xf32>
    %405 = arith.select %31, %404, %403 : vector<8x256xi1>, vector<8x256xf32>
    %406 = vector.extract_strided_slice %405 {offsets = [0, 0], sizes = [8, 64], strides = [1, 1]} : vector<8x256xf32> to vector<8x64xf32>
    %407 = vector.extract_strided_slice %405 {offsets = [0, 64], sizes = [8, 64], strides = [1, 1]} : vector<8x256xf32> to vector<8x64xf32>
    %408 = vector.extract_strided_slice %405 {offsets = [0, 128], sizes = [8, 64], strides = [1, 1]} : vector<8x256xf32> to vector<8x64xf32>
    %409 = vector.extract_strided_slice %405 {offsets = [0, 192], sizes = [8, 64], strides = [1, 1]} : vector<8x256xf32> to vector<8x64xf32>
    %410 = arith.mulf %407, %389 : vector<8x64xf32>
    %411 = arith.mulf %406, %408 : vector<8x64xf32>
    %412 = arith.addf %410, %411 : vector<8x64xf32>
    %413 = math.tanh %412 : vector<8x64xf32>
    %414 = arith.mulf %409, %413 : vector<8x64xf32>
    %415 = arith.select %66, %414, %388 : vector<8x64xi1>, vector<8x64xf32>
    %416 = arith.select %66, %412, %389 : vector<8x64xi1>, vector<8x64xf32>
    %cst_110 = arith.constant 0.000000e+00 : f32
    %417 = vector.broadcast %cst_110 : f32 to vector<8x64xf32>
    %418 = arith.select %66, %414, %417 : vector<8x64xi1>, vector<8x64xf32>
    %c24_111 = arith.constant 24 : index
    %c0_112 = arith.constant 0 : index
    %419 = vector.load %arg7[%c24_111, %c0_112] : memref<64x64xf32, #tpu.memory_space<vmem>>, vector<8x64xf32>
    tpu.vector_store %arg7[%c24_111, %c0_112], %418 masked %34 {strides = array<i32>} : memref<64x64xf32, #tpu.memory_space<vmem>>, vector<8x64xf32>, vector<8x64xi1>
    %c32_113 = arith.constant 32 : index
    %c0_114 = arith.constant 0 : index
    %420 = vector.load %arg7[%c32_113, %c0_114] : memref<64x64xf32, #tpu.memory_space<vmem>>, vector<8x64xf32>
    tpu.vector_store %arg7[%c32_113, %c0_114], %418 masked %35 {strides = array<i32>} : memref<64x64xf32, #tpu.memory_space<vmem>>, vector<8x64xf32>, vector<8x64xi1>
    %421 = vector.extract_strided_slice %310 {offsets = [32, 0], sizes = [8, 256], strides = [1, 1]} : vector<64x256xf32> to vector<8x256xf32>
    %422 = vector.extract_strided_slice %310 {offsets = [24, 0], sizes = [8, 256], strides = [1, 1]} : vector<64x256xf32> to vector<8x256xf32>
    %423 = arith.select %26, %421, %422 : vector<8x256xi1>, vector<8x256xf32>
    %cst_115 = arith.constant dense<0.000000e+00> : vector<8x256xf32>
    %424 = tpu.matmul %415, %3, %cst_115 {dimension_numbers = #tpu.dot_dimension_numbers<[1], [0], [0], [1], [0, 0, 1, 1], [], []>} : vector<8x64xf32>, vector<64x256xf32>, vector<8x256xf32> -> vector<8x256xf32>
    %425 = arith.addf %423, %424 : vector<8x256xf32>
    %426 = arith.negf %425 : vector<8x256xf32>
    %427 = math.exp %426 : vector<8x256xf32>
    %cst_116 = arith.constant 1.000000e+00 : f32
    %428 = vector.broadcast %cst_116 : f32 to vector<8x256xf32>
    %429 = arith.addf %428, %427 : vector<8x256xf32>
    %430 = arith.divf %428, %429 : vector<8x256xf32>
    %431 = math.tanh %425 : vector<8x256xf32>
    %432 = arith.select %31, %431, %430 : vector<8x256xi1>, vector<8x256xf32>
    %433 = vector.extract_strided_slice %432 {offsets = [0, 0], sizes = [8, 64], strides = [1, 1]} : vector<8x256xf32> to vector<8x64xf32>
    %434 = vector.extract_strided_slice %432 {offsets = [0, 64], sizes = [8, 64], strides = [1, 1]} : vector<8x256xf32> to vector<8x64xf32>
    %435 = vector.extract_strided_slice %432 {offsets = [0, 128], sizes = [8, 64], strides = [1, 1]} : vector<8x256xf32> to vector<8x64xf32>
    %436 = vector.extract_strided_slice %432 {offsets = [0, 192], sizes = [8, 64], strides = [1, 1]} : vector<8x256xf32> to vector<8x64xf32>
    %437 = arith.mulf %434, %416 : vector<8x64xf32>
    %438 = arith.mulf %433, %435 : vector<8x64xf32>
    %439 = arith.addf %437, %438 : vector<8x64xf32>
    %440 = math.tanh %439 : vector<8x64xf32>
    %441 = arith.mulf %436, %440 : vector<8x64xf32>
    %442 = arith.select %71, %441, %415 : vector<8x64xi1>, vector<8x64xf32>
    %443 = arith.select %71, %439, %416 : vector<8x64xi1>, vector<8x64xf32>
    %cst_117 = arith.constant 0.000000e+00 : f32
    %444 = vector.broadcast %cst_117 : f32 to vector<8x64xf32>
    %445 = arith.select %71, %441, %444 : vector<8x64xi1>, vector<8x64xf32>
    %c32_118 = arith.constant 32 : index
    %c0_119 = arith.constant 0 : index
    %446 = vector.load %arg7[%c32_118, %c0_119] : memref<64x64xf32, #tpu.memory_space<vmem>>, vector<8x64xf32>
    tpu.vector_store %arg7[%c32_118, %c0_119], %445 masked %34 {strides = array<i32>} : memref<64x64xf32, #tpu.memory_space<vmem>>, vector<8x64xf32>, vector<8x64xi1>
    %c24_120 = arith.constant 24 : index
    %c0_121 = arith.constant 0 : index
    %447 = vector.load %arg7[%c24_120, %c0_121] : memref<64x64xf32, #tpu.memory_space<vmem>>, vector<8x64xf32>
    tpu.vector_store %arg7[%c24_120, %c0_121], %445 masked %35 {strides = array<i32>} : memref<64x64xf32, #tpu.memory_space<vmem>>, vector<8x64xf32>, vector<8x64xi1>
    %448 = vector.extract_strided_slice %310 {offsets = [40, 0], sizes = [8, 256], strides = [1, 1]} : vector<64x256xf32> to vector<8x256xf32>
    %449 = vector.extract_strided_slice %310 {offsets = [16, 0], sizes = [8, 256], strides = [1, 1]} : vector<64x256xf32> to vector<8x256xf32>
    %450 = arith.select %26, %448, %449 : vector<8x256xi1>, vector<8x256xf32>
    %cst_122 = arith.constant dense<0.000000e+00> : vector<8x256xf32>
    %451 = tpu.matmul %442, %3, %cst_122 {dimension_numbers = #tpu.dot_dimension_numbers<[1], [0], [0], [1], [0, 0, 1, 1], [], []>} : vector<8x64xf32>, vector<64x256xf32>, vector<8x256xf32> -> vector<8x256xf32>
    %452 = arith.addf %450, %451 : vector<8x256xf32>
    %453 = arith.negf %452 : vector<8x256xf32>
    %454 = math.exp %453 : vector<8x256xf32>
    %cst_123 = arith.constant 1.000000e+00 : f32
    %455 = vector.broadcast %cst_123 : f32 to vector<8x256xf32>
    %456 = arith.addf %455, %454 : vector<8x256xf32>
    %457 = arith.divf %455, %456 : vector<8x256xf32>
    %458 = math.tanh %452 : vector<8x256xf32>
    %459 = arith.select %31, %458, %457 : vector<8x256xi1>, vector<8x256xf32>
    %460 = vector.extract_strided_slice %459 {offsets = [0, 0], sizes = [8, 64], strides = [1, 1]} : vector<8x256xf32> to vector<8x64xf32>
    %461 = vector.extract_strided_slice %459 {offsets = [0, 64], sizes = [8, 64], strides = [1, 1]} : vector<8x256xf32> to vector<8x64xf32>
    %462 = vector.extract_strided_slice %459 {offsets = [0, 128], sizes = [8, 64], strides = [1, 1]} : vector<8x256xf32> to vector<8x64xf32>
    %463 = vector.extract_strided_slice %459 {offsets = [0, 192], sizes = [8, 64], strides = [1, 1]} : vector<8x256xf32> to vector<8x64xf32>
    %464 = arith.mulf %461, %443 : vector<8x64xf32>
    %465 = arith.mulf %460, %462 : vector<8x64xf32>
    %466 = arith.addf %464, %465 : vector<8x64xf32>
    %467 = math.tanh %466 : vector<8x64xf32>
    %468 = arith.mulf %463, %467 : vector<8x64xf32>
    %469 = arith.select %76, %468, %442 : vector<8x64xi1>, vector<8x64xf32>
    %470 = arith.select %76, %466, %443 : vector<8x64xi1>, vector<8x64xf32>
    %cst_124 = arith.constant 0.000000e+00 : f32
    %471 = vector.broadcast %cst_124 : f32 to vector<8x64xf32>
    %472 = arith.select %76, %468, %471 : vector<8x64xi1>, vector<8x64xf32>
    %c40_125 = arith.constant 40 : index
    %c0_126 = arith.constant 0 : index
    %473 = vector.load %arg7[%c40_125, %c0_126] : memref<64x64xf32, #tpu.memory_space<vmem>>, vector<8x64xf32>
    tpu.vector_store %arg7[%c40_125, %c0_126], %472 masked %34 {strides = array<i32>} : memref<64x64xf32, #tpu.memory_space<vmem>>, vector<8x64xf32>, vector<8x64xi1>
    %c16_127 = arith.constant 16 : index
    %c0_128 = arith.constant 0 : index
    %474 = vector.load %arg7[%c16_127, %c0_128] : memref<64x64xf32, #tpu.memory_space<vmem>>, vector<8x64xf32>
    tpu.vector_store %arg7[%c16_127, %c0_128], %472 masked %35 {strides = array<i32>} : memref<64x64xf32, #tpu.memory_space<vmem>>, vector<8x64xf32>, vector<8x64xi1>
    %475 = vector.extract_strided_slice %310 {offsets = [48, 0], sizes = [8, 256], strides = [1, 1]} : vector<64x256xf32> to vector<8x256xf32>
    %476 = vector.extract_strided_slice %310 {offsets = [8, 0], sizes = [8, 256], strides = [1, 1]} : vector<64x256xf32> to vector<8x256xf32>
    %477 = arith.select %26, %475, %476 : vector<8x256xi1>, vector<8x256xf32>
    %cst_129 = arith.constant dense<0.000000e+00> : vector<8x256xf32>
    %478 = tpu.matmul %469, %3, %cst_129 {dimension_numbers = #tpu.dot_dimension_numbers<[1], [0], [0], [1], [0, 0, 1, 1], [], []>} : vector<8x64xf32>, vector<64x256xf32>, vector<8x256xf32> -> vector<8x256xf32>
    %479 = arith.addf %477, %478 : vector<8x256xf32>
    %480 = arith.negf %479 : vector<8x256xf32>
    %481 = math.exp %480 : vector<8x256xf32>
    %cst_130 = arith.constant 1.000000e+00 : f32
    %482 = vector.broadcast %cst_130 : f32 to vector<8x256xf32>
    %483 = arith.addf %482, %481 : vector<8x256xf32>
    %484 = arith.divf %482, %483 : vector<8x256xf32>
    %485 = math.tanh %479 : vector<8x256xf32>
    %486 = arith.select %31, %485, %484 : vector<8x256xi1>, vector<8x256xf32>
    %487 = vector.extract_strided_slice %486 {offsets = [0, 0], sizes = [8, 64], strides = [1, 1]} : vector<8x256xf32> to vector<8x64xf32>
    %488 = vector.extract_strided_slice %486 {offsets = [0, 64], sizes = [8, 64], strides = [1, 1]} : vector<8x256xf32> to vector<8x64xf32>
    %489 = vector.extract_strided_slice %486 {offsets = [0, 128], sizes = [8, 64], strides = [1, 1]} : vector<8x256xf32> to vector<8x64xf32>
    %490 = vector.extract_strided_slice %486 {offsets = [0, 192], sizes = [8, 64], strides = [1, 1]} : vector<8x256xf32> to vector<8x64xf32>
    %491 = arith.mulf %488, %470 : vector<8x64xf32>
    %492 = arith.mulf %487, %489 : vector<8x64xf32>
    %493 = arith.addf %491, %492 : vector<8x64xf32>
    %494 = math.tanh %493 : vector<8x64xf32>
    %495 = arith.mulf %490, %494 : vector<8x64xf32>
    %496 = arith.select %81, %495, %469 : vector<8x64xi1>, vector<8x64xf32>
    %497 = arith.select %81, %493, %470 : vector<8x64xi1>, vector<8x64xf32>
    %cst_131 = arith.constant 0.000000e+00 : f32
    %498 = vector.broadcast %cst_131 : f32 to vector<8x64xf32>
    %499 = arith.select %81, %495, %498 : vector<8x64xi1>, vector<8x64xf32>
    %c48_132 = arith.constant 48 : index
    %c0_133 = arith.constant 0 : index
    %500 = vector.load %arg7[%c48_132, %c0_133] : memref<64x64xf32, #tpu.memory_space<vmem>>, vector<8x64xf32>
    tpu.vector_store %arg7[%c48_132, %c0_133], %499 masked %34 {strides = array<i32>} : memref<64x64xf32, #tpu.memory_space<vmem>>, vector<8x64xf32>, vector<8x64xi1>
    %c8_134 = arith.constant 8 : index
    %c0_135 = arith.constant 0 : index
    %501 = vector.load %arg7[%c8_134, %c0_135] : memref<64x64xf32, #tpu.memory_space<vmem>>, vector<8x64xf32>
    tpu.vector_store %arg7[%c8_134, %c0_135], %499 masked %35 {strides = array<i32>} : memref<64x64xf32, #tpu.memory_space<vmem>>, vector<8x64xf32>, vector<8x64xi1>
    %502 = vector.extract_strided_slice %310 {offsets = [56, 0], sizes = [8, 256], strides = [1, 1]} : vector<64x256xf32> to vector<8x256xf32>
    %503 = vector.extract_strided_slice %310 {offsets = [0, 0], sizes = [8, 256], strides = [1, 1]} : vector<64x256xf32> to vector<8x256xf32>
    %504 = arith.select %26, %502, %503 : vector<8x256xi1>, vector<8x256xf32>
    %cst_136 = arith.constant dense<0.000000e+00> : vector<8x256xf32>
    %505 = tpu.matmul %496, %3, %cst_136 {dimension_numbers = #tpu.dot_dimension_numbers<[1], [0], [0], [1], [0, 0, 1, 1], [], []>} : vector<8x64xf32>, vector<64x256xf32>, vector<8x256xf32> -> vector<8x256xf32>
    %506 = arith.addf %504, %505 : vector<8x256xf32>
    %507 = arith.negf %506 : vector<8x256xf32>
    %508 = math.exp %507 : vector<8x256xf32>
    %cst_137 = arith.constant 1.000000e+00 : f32
    %509 = vector.broadcast %cst_137 : f32 to vector<8x256xf32>
    %510 = arith.addf %509, %508 : vector<8x256xf32>
    %511 = arith.divf %509, %510 : vector<8x256xf32>
    %512 = math.tanh %506 : vector<8x256xf32>
    %513 = arith.select %31, %512, %511 : vector<8x256xi1>, vector<8x256xf32>
    %514 = vector.extract_strided_slice %513 {offsets = [0, 0], sizes = [8, 64], strides = [1, 1]} : vector<8x256xf32> to vector<8x64xf32>
    %515 = vector.extract_strided_slice %513 {offsets = [0, 64], sizes = [8, 64], strides = [1, 1]} : vector<8x256xf32> to vector<8x64xf32>
    %516 = vector.extract_strided_slice %513 {offsets = [0, 128], sizes = [8, 64], strides = [1, 1]} : vector<8x256xf32> to vector<8x64xf32>
    %517 = vector.extract_strided_slice %513 {offsets = [0, 192], sizes = [8, 64], strides = [1, 1]} : vector<8x256xf32> to vector<8x64xf32>
    %518 = arith.mulf %515, %497 : vector<8x64xf32>
    %519 = arith.mulf %514, %516 : vector<8x64xf32>
    %520 = arith.addf %518, %519 : vector<8x64xf32>
    %521 = math.tanh %520 : vector<8x64xf32>
    %522 = arith.mulf %517, %521 : vector<8x64xf32>
    %cst_138 = arith.constant 0.000000e+00 : f32
    %523 = vector.broadcast %cst_138 : f32 to vector<8x64xf32>
    %524 = arith.select %86, %522, %523 : vector<8x64xi1>, vector<8x64xf32>
    %c56_139 = arith.constant 56 : index
    %c0_140 = arith.constant 0 : index
    %525 = vector.load %arg7[%c56_139, %c0_140] : memref<64x64xf32, #tpu.memory_space<vmem>>, vector<8x64xf32>
    tpu.vector_store %arg7[%c56_139, %c0_140], %524 masked %34 {strides = array<i32>} : memref<64x64xf32, #tpu.memory_space<vmem>>, vector<8x64xf32>, vector<8x64xi1>
    %c0_141 = arith.constant 0 : index
    %c0_142 = arith.constant 0 : index
    %526 = vector.load %arg7[%c0_141, %c0_142] : memref<64x64xf32, #tpu.memory_space<vmem>>, vector<8x64xf32>
    tpu.vector_store %arg7[%c0_141, %c0_142], %524 masked %35 {strides = array<i32>} : memref<64x64xf32, #tpu.memory_space<vmem>>, vector<8x64xf32>, vector<8x64xi1>
    %c0_143 = arith.constant 0 : index
    %c0_144 = arith.constant 0 : index
    %527 = vector.load %arg7[%c0_143, %c0_144] : memref<64x64xf32, #tpu.memory_space<vmem>>, vector<64x64xf32>
    %cst_145 = arith.constant dense<0.000000e+00> : vector<64x128xf32>
    %528 = tpu.matmul %527, %4, %cst_145 {dimension_numbers = #tpu.dot_dimension_numbers<[1], [0], [0], [1], [0, 0, 1, 1], [], []>} : vector<64x64xf32>, vector<64x128xf32>, vector<64x128xf32> -> vector<64x128xf32>
    %529 = vector.broadcast %7 : vector<1x128xf32> to vector<64x128xf32>
    %530 = arith.addf %528, %529 : vector<64x128xf32>
    %c0_146 = arith.constant 0 : index
    %c0_147 = arith.constant 0 : index
    %531 = vector.load %arg5[%c0_146, %c0_147] : memref<64x128xf32, #tpu.memory_space<vmem>>, vector<64x128xf32>
    tpu.vector_store %arg5[%c0_146, %c0_147], %530 {strides = array<i32>} : memref<64x128xf32, #tpu.memory_space<vmem>>, vector<64x128xf32>,
    return
  }
  func.func @transform_0(%arg0: i32) -> (i32, i32) {
    %c0_i32 = arith.constant 0 : i32
    %c0_i32_0 = arith.constant 0 : i32
    %c0_i32_1 = arith.constant 0 : i32
    return %c0_i32, %c0_i32_0 : i32, i32
  }
  func.func @transform_1(%arg0: i32) -> (i32, i32) {
    %c0_i32 = arith.constant 0 : i32
    %c0_i32_0 = arith.constant 0 : i32
    %c0_i32_1 = arith.constant 0 : i32
    return %c0_i32, %c0_i32_0 : i32, i32
  }
  func.func @transform_2(%arg0: i32) -> (i32, i32) {
    %c0_i32 = arith.constant 0 : i32
    %c0_i32_0 = arith.constant 0 : i32
    %c0_i32_1 = arith.constant 0 : i32
    return %c0_i32, %c0_i32_0 : i32, i32
  }
  func.func @transform_3(%arg0: i32) -> (i32, i32) {
    %c0_i32 = arith.constant 0 : i32
    %c0_i32_0 = arith.constant 0 : i32
    %c0_i32_1 = arith.constant 0 : i32
    return %c0_i32, %c0_i32_0 : i32, i32
  }
  func.func @transform_4(%arg0: i32) -> (i32, i32) {
    %c0_i32 = arith.constant 0 : i32
    %c0_i32_0 = arith.constant 0 : i32
    %c0_i32_1 = arith.constant 0 : i32
    return %c0_i32, %c0_i32_0 : i32, i32
  }
}

</mosaic_0001>

<bundles_post_ra>
// kernel: _lambda_.1
= control target key start
LH: loop header
LB: loop body
LE: loop exit
PB: predicated region body
PF: predicated region fallthrough
CT: control target
= control target key end

     0   :  { %v2829_v3 = vmov 0.0   ;;  %vm171_vm0 = vcmask 130048   ;;  %v81_v29 = vlaneseq  ;;  %v4157_v57 = vmov 0  ;;  %s2831_s22 = smov 64   ;;  %s4141_s2 = inlined_call_operand.vmem [shape: f32[272,256], index: 2, kind: input, shape index: {}]   ;;  %s4142_s0 = inlined_call_operand.vmem [shape: f32[64,16], index: 0, kind: input, shape index: {}]   ;;  %s4143_s3 = inlined_call_operand.vmem [shape: f32[8,256], index: 3, kind: input, shape index: {}]   ;;  %s4144_s1 = inlined_call_operand.vmem [shape: s32[8,1], index: 1, kind: input, shape index: {}]   ;;  %s4145_s4 = inlined_call_operand.vmem [shape: f32[64,128], index: 4, kind: output, shape index: {}]  }
   0x1   :  { %v20_v0 = vld [vmem:[%s4141_s2 + $0x18] sm:$0xff]  ;;  %v19_v1 = vld [vmem:[%s4141_s2 + $0x10] sm:$0xff]  ;;  %v18_v2 = vld [vmem:[%s4141_s2 + $0x8] sm:$0xff]  ;;  %260 = vmatprep.mubr.f32.mxu0 %v2829_v3  ;;  %284 = vmatprep.mubr.f32.mxu1 %v2829_v3 }
   0x2   :  { %224 = vmatprep.subr.mxu0 %v20_v0  ;;  %2627 = vmatprep.subr.mxu1 %v20_v0  ;;  %v17_v4 = vld [vmem:[%s4141_s2] sm:$0xff]  ;;  %v2881_v7 = vld [vmem:[%s4141_s2 + $0x118] sm:$0xff]  ;;  %v2886_v8 = vld [vmem:[%s4141_s2 + $0x110] sm:$0xff]  ;;  %v3044_v30 = vshrl.u32 %v81_v29, 7  ;;  %v3053_v35 = vand.u32 127, %v81_v29 }
   0x3   :  { %225 = vmatpush1.msra.mxu0 %v19_v1  ;;  %2629 = vmatpush1.msra.mxu1 %v19_v1  ;;  %v152_v5 = vld [vmem:[%s4142_s0] sm:$0xff]  ;;  %v2893_v9 = vld [vmem:[%s4141_s2 + $0x108] sm:$0xff]  ;;  %v2913_v13 = vld [vmem:[%s4141_s2 + $0xf8] sm:$0xff] }
   0x4   :  { %v156_v6 = vld [vmem:[%s4142_s0 + $0x20] sm:$0xff]  ;;  %226 = vmatprep.subr.mxu0 %v18_v2  ;;  %2628 = vmatprep.subr.mxu1 %v18_v2  ;;  %v153_v11 = vld [vmem:[%s4142_s0 + $0x8] sm:$0xff]  ;;  %v2919_v14 = vld [vmem:[%s4141_s2 + $0xf0] sm:$0xff]  ;;  %v4147_v31 = vsub.s32 0, %v3044_v30  ;;  %v4146_v33 = vsub.s32 1, %v3044_v30  ;;  %v3060_v40 = vadd.s32 128, %v3053_v35 }
   0x5   :  { %227 = vmatpush1.msra.mxu0 %v17_v4  ;;  %2630 = vmatpush1.msra.mxu1 %v17_v4  ;;  %v2900_v10 = vld [vmem:[%s4141_s2 + $0x100] sm:$0xff]  ;;  %v157_v12 = vld [vmem:[%s4142_s0 + $0x28] sm:$0xff]  ;;  %v154_v17 = vld [vmem:[%s4142_s0 + $0x10] sm:$0xff]  ;;  %v88_v44 = vand.u32 63, %v3053_v35  ;;  %vm4149_vm4 = vcmp.lt.s32.totalorder %v3053_v35, 32 }
   0x6   :  { %2513 = vmatmul.mubr.msk.f32.vlgmr.msra.gmra.mxu0 %vm171_vm0, %v152_v5  ;;  %2517 = vmatmul.mubr.msk.f32.vlgmr.msra.gmra.mxu1 %vm171_vm0, %v156_v6  ;;  %v2927_v15 = vld [vmem:[%s4141_s2 + $0xe8] sm:$0xff]  ;;  %v2934_v16 = vld [vmem:[%s4141_s2 + $0xe0] sm:$0xff]  ;;  %v158_v18 = vld [vmem:[%s4142_s0 + $0x30] sm:$0xff]  ;;  %v95_v47 = vand.u32 63, %v3060_v40  ;;  %vm4148_vm3 = vcmp.lt.s32.totalorder %v3060_v40, 192 }
   0x7   :  { %331 = vmatprep.subr.mxu1 %v2881_v7  ;;  %266 = vmatprep.mubr.f32.mxu0 %v2829_v3  ;;  %v2947_v19 = vld [vmem:[%s4141_s2 + $0xd8] sm:$0xff]  ;;  %v2954_v20 = vld [vmem:[%s4141_s2 + $0xd0] sm:$0xff]  ;;  %v2961_v21 = vld [vmem:[%s4141_s2 + $0xc8] sm:$0xff]  ;;  %vm3068_vm1 = vcmp.lt.s32.totalorder %v88_v44, 32 }
   0x8   :  { %332 = vmatpush1.msra.mxu1 %v2886_v8  ;;  %290 = vmatprep.mubr.f32.mxu1 %v2829_v3  ;;  %v2968_v22 = vld [vmem:[%s4141_s2 + $0xc0] sm:$0xff]  ;;  %v155_v23 = vld [vmem:[%s4142_s0 + $0x18] sm:$0xff]  ;;  %v2988_v26 = vld [vmem:[%s4141_s2 + $0xb0] sm:$0xff]  ;;  %vm3078_vm2 = vcmp.lt.s32.totalorder %v95_v47, 32 }
   0x9   :  { %333 = vmatprep.subr.mxu1 %v2893_v9  ;;  %568 = vmatprep.subr.mxu0 %v2881_v7  ;;  %v159_v24 = vld [vmem:[%s4142_s0 + $0x38] sm:$0xff]  ;;  %v2995_v27 = vld [vmem:[%s4141_s2 + $0xa8] sm:$0xff]  ;;  %v3002_v28 = vld [vmem:[%s4141_s2 + $0xa0] sm:$0xff]  ;;  %v4158_v57 = vsel %vm3078_vm2, 4294967295, %v4157_v57 }
   0xa   :  { %334 = vmatpush1.msra.mxu1 %v2900_v10  ;;  %2514 = vmatmul.mubr.msk.f32.gmra.mxu0 %vm171_vm0, %v153_v11  ;;  %v2981_v25 = vld [vmem:[%s4141_s2 + $0xb8] sm:$0xff]  ;;  %v77_v32 = vld [vmem:[%s4143_s3] ss:$8 sm:$0x3] }
   0xb   :  { %2518 = vmatmul.mubr.msk.f32.gmra.mxu1 %vm171_vm0, %v157_v12  ;;  %335 = vmatprep.subr.mxu1 %v2913_v13  ;;  %v164_v34 = vrot.slane %v77_v32, %v4147_v31  ;;  %v168_v36 = vrot.slane %v77_v32, %v4146_v33  ;;  %v118_v31 = vld [vmem:[%s4144_s1] sm:$0xff] }
   0xc   :  { %336 = vmatpush1.msra.mxu1 %v2919_v14  ;;  %272 = vmatprep.mubr.f32.mxu0 %v2829_v3 }
   0xd   :  { %337 = vmatprep.subr.mxu1 %v2927_v15  ;;  %296 = vmatprep.mubr.f32.mxu1 %v2829_v3 }
   0xe   :  { %338 = vmatpush1.msra.mxu1 %v2934_v16  ;;  %2515 = vmatmul.mubr.msk.f32.gmra.mxu0 %vm171_vm0, %v154_v17 }
   0xf   :  { %2519 = vmatmul.mubr.msk.f32.gmra.mxu1 %vm171_vm0, %v158_v18  ;;  %339 = vmatprep.subr.mxu1 %v2947_v19 }
  0x10   :  { %340 = vmatpush1.msra.mxu1 %v2954_v20  ;;  %278 = vmatprep.mubr.f32.mxu0 %v2829_v3 }
  0x11   :  { %341 = vmatprep.subr.mxu1 %v2961_v21  ;;  %302 = vmatprep.mubr.f32.mxu1 %v2829_v3 }
  0x12   :  { %342 = vmatpush1.msra.mxu1 %v2968_v22  ;;  %2516 = vmatmul.mubr.msk.f32.gmra.mxu0 %vm171_vm0, %v155_v23 }
  0x13   :  { %2520 = vmatmul.mubr.msk.f32.gmra.mxu1 %vm171_vm0, %v159_v24  ;;  %343 = vmatprep.subr.mxu1 %v2981_v25 }
  0x14   :  { %344 = vmatpush1.msra.mxu1 %v2988_v26  ;;  %379 = vmatprep.mubr.f32.mxu1 %v2829_v3 }
  0x15   :  { %345 = vmatprep.subr.mxu1 %v2995_v27  ;;  %569 = vmatpush1.msra.mxu0 %v2886_v8 }
  0x16   :  { %346 = vmatpush1.msra.mxu1 %v3002_v28  ;;  %570 = vmatprep.subr.mxu0 %v2893_v9 }
  0x17   :  { %380 = vmatmul.mubr.f32.vlgmr.msra.gmra.mxu1 %v2829_v3  ;;  %448 = vmatprep.subr.mxu1 %v2881_v7 }
  0x18   :  { %449 = vmatpush1.msra.mxu1 %v2886_v8  ;;  %496 = vmatprep.mubr.f32.mxu1 %v2829_v3 }
  0x19   :  { %450 = vmatprep.subr.mxu1 %v2893_v9  ;;  %571 = vmatpush1.msra.mxu0 %v2900_v10 }
  0x1a   :  { %451 = vmatpush1.msra.mxu1 %v2900_v10  ;;  %572 = vmatprep.subr.mxu0 %v2913_v13 }
  0x1b   :  { %452 = vmatprep.subr.mxu1 %v2913_v13  ;;  %573 = vmatpush1.msra.mxu0 %v2919_v14 }
  0x1c   :  { %453 = vmatpush1.msra.mxu1 %v2919_v14  ;;  %574 = vmatprep.subr.mxu0 %v2927_v15 }
  0x1d   :  { %454 = vmatprep.subr.mxu1 %v2927_v15  ;;  %575 = vmatpush1.msra.mxu0 %v2934_v16 }
  0x1e   :  { %455 = vmatpush1.msra.mxu1 %v2934_v16  ;;  %576 = vmatprep.subr.mxu0 %v2947_v19 }
  0x1f   :  { %456 = vmatprep.subr.mxu1 %v2947_v19  ;;  %577 = vmatpush1.msra.mxu0 %v2954_v20 }
  0x20   :  { %457 = vmatpush1.msra.mxu1 %v2954_v20  ;;  %578 = vmatprep.subr.mxu0 %v2961_v21 }
  0x21   :  { %458 = vmatprep.subr.mxu1 %v2961_v21  ;;  %579 = vmatpush1.msra.mxu0 %v2968_v22 }
  0x22   :  { %459 = vmatpush1.msra.mxu1 %v2968_v22  ;;  %580 = vmatprep.subr.mxu0 %v2981_v25 }
  0x23   :  { %460 = vmatprep.subr.mxu1 %v2981_v25  ;;  %581 = vmatpush1.msra.mxu0 %v2988_v26 }
  0x24   :  { %461 = vmatpush1.msra.mxu1 %v2988_v26  ;;  %582 = vmatprep.subr.mxu0 %v2995_v27 }
  0x25   :  { %462 = vmatprep.subr.mxu1 %v2995_v27  ;;  %583 = vmatpush1.msra.mxu0 %v3002_v28 }
  0x26   :  { %463 = vmatpush1.msra.mxu1 %v3002_v28  ;;  %616 = vmatprep.mubr.f32.mxu0 %v2829_v3 }
  0x27   :  { %688 = vmatprep.subr.mxu1 %v2881_v7  ;;  %808 = vmatprep.subr.mxu0 %v2881_v7 }
  0xc6   :  { %v262_v37 = vpop.f32.mrf.mxu0  ;;  %v286_v38 = vpop.f32.mrf.mxu1 }
  0xc7   :  { %v3057_v39 = vadd.f32 %v286_v38, %v164_v34  ;;  %v3096_v1 = vadd.f32 %v262_v37, %v164_v34 }
  0xc8   :  { %v264_v41 = vpop.f32.mrf.mxu0  ;;  %v288_v42 = vpop.f32.mrf.mxu1 }
  0xc9   :  { %v3062_v43 = vadd.f32 %v288_v42, %v168_v36  ;;  %v3118_v23 = vadd.f32 %v264_v41, %v168_v36 }
  0xca   :  { %v268_v45 = vpop.f32.mrf.mxu0 }
  0xcb   :  { %v292_v46 = vpop.f32.mrf.mxu1  ;;  %v3072_v52 = vadd.f32 %v268_v45, %v164_v34 }
  0xcc   :  { %v3066_v48 = vadd.f32 %v292_v46, %v164_v34  ;;  %v270_v49 = vpop.f32.mrf.mxu0 }
  0xcd   :  { %v294_v50 = vpop.f32.mrf.mxu1  ;;  %v3082_v58 = vadd.f32 %v270_v49, %v168_v36 }
  0xce   :  { %v3074_v53 = vadd.f32 %v294_v50, %v168_v36  ;;  %v274_v54 = vpop.f32.mrf.mxu0 }
  0xcf   :  { %v3076_v55 = vadd.f32 %v274_v54, %v164_v34  ;;  %v298_v56 = vpop.f32.mrf.mxu1 }
  0xd0   :  { %v3084_v59 = vadd.f32 %v298_v56, %v164_v34  ;;  %v276_v60 = vpop.f32.mrf.mxu0 }
  0xd1   :  { %v3086_v61 = vadd.f32 %v276_v60, %v168_v36  ;;  %v300_v62 = vpop.f32.mrf.mxu1  ;;  %v547_v63 = vsel %vm3068_vm1, %v3076_v55, %v3066_v48 }
  0xd2   :  { %v3098_v2 = vadd.f32 %v300_v62, %v168_v36  ;;  %v280_v4 = vpop.f32.mrf.mxu0  ;;  %v427_v5 = vsel %vm3068_vm1, %v3072_v52, %v3084_v59 }
  0xd3   :  { %v3108_v11 = vadd.f32 %v280_v4, %v164_v34  ;;  %v304_v12 = vpop.f32.mrf.mxu1 }
  0xd4   :  { %v3120_v24 = vadd.f32 %v304_v12, %v164_v34  ;;  %v282_v29 = vpop.f32.mrf.mxu0  ;;  %v428_v32 = vsel %vm3078_vm2, %v3082_v58, %v3098_v2 }
  0xd5   :  { %v3130_v38 = vadd.f32 %v282_v29, %v168_v36  ;;  %v306_v42 = vpop.f32.mrf.mxu1 }
  0xd6   :  { %v3140_v44 = vadd.f32 %v306_v42, %v168_v36  ;;  %v309_v45 = vsel %vm3068_vm1, %v3096_v1, %v3120_v24 }
  0xd7   :  { %v381_v47 = vpop.f32.mrf.mxu1 }
  0xd8   :  { %v386_v50 = vadd.f32 %v381_v47, %v309_v45  ;;  %v310_v54 = vsel %vm3078_vm2, %v3118_v23, %v3140_v44  ;;  %v2830_v47 = vmov 0  }
  0xd9   :  { %v383_v60 = vpop.f32.mrf.mxu1  ;;  %2636 = vset.pattern.permute.xlu1 %v2830_v47  ;;  %2635 = vset.pattern.permute.xlu0 %v2830_v47 }
  0xda   :  { %v2521_v62 = vmul.f32 -1.442695, %v386_v50  ;;  %v387_v4 = vadd.f32 %v383_v60, %v310_v54  ;;  %125 = vperm.xlu1 %2636, %v118_v31  }
  0xdc   :  { %2637 = vpow2.f32 %v2521_v62  ;;  %v2522_v12 = vmul.f32 -1.442695, %v387_v4 }
  0xde   :  { %2639 = vpow2.f32 %v2522_v12 }
  0xdf   :  { %2641 = vtanh.f32 %v387_v4 }
  0xe9   :  { %v2638_v29 = vpop.eup %2637 }
  0xea   :  { %v394_v33 = vadd.f32 1.0, %v2638_v29 }
  0xeb   :  { %v2640_v42 = vpop.eup %2639 }
  0xec   :  { %v395_v45 = vadd.f32 1.0, %v2640_v42  ;;  %v2642_v50 = vpop.eup %2641 }
  0xee   :  { %2643 = vrcp.f32 %v395_v45 }
  0xef   :  { %2645 = vrcp.f32 %v394_v33  ;;  %v119_v33 = vsub.s32 8, %v118_v31 }
  0xfb   :  { %v2644_v54 = vpop.eup %2643 }
  0xfc   :  { %v2646_v60 = vpop.eup %2645  ;;  %v403_v62 = vsel %vm4148_vm3, %v2642_v50, %v2644_v54 }
  0xfd   :  { %v405_v12 = vmul.f32 %v2646_v60, %v403_v62  ;;  %v404_v4 = vmul.f32 0.0, %v2646_v60  ;;  %v4159_v60 = vmov 0 }
  0xff   :  { %407 = vrot.lane.b32.xlu0 %v405_v12, %s2831_s22 }
 0x103   :  { %121 = vperm.xlu0 %2635, %v119_v33  }
 0x155   :  { %v126_v45 = vpop.permute.xlu1 %125 }
 0x156   :  { %v127_v47 = vsel %vm4149_vm4, %v126_v45, 8 }
 0x157   :  { %vm132_vm5 = vcmp.gt.s32.totalorder %v127_v47, 1  ;;  %vm135_vm8 = vcmp.gt.s32.totalorder %v127_v47, 2  ;;  %vm138_vm10 = vcmp.gt.s32.totalorder %v127_v47, 3  ;;  %vm141_vm13 = vcmp.gt.s32.totalorder %v127_v47, 4 }
 0x158   :  { %vm144_vm0 = vcmp.gt.s32.totalorder %v127_v47, 5  ;;  %vm147_vm2 = vcmp.gt.s32.totalorder %v127_v47, 6 }
 0x171   :  { %v408_v29 = vpop.permute.xlu0 %407 }
 0x172   :  { %v410_v42 = vadd.f32 %v408_v29, %v404_v4 }
 0x174   :  { %2647 = vtanh.f32 %v410_v42 }
 0x17e   :  { %v122_v56 = vpop.permute.xlu0 %121 }
 0x17f   :  { %v123_v50 = vsel %vm4149_vm4, 0, %v122_v56  ;;  %v4163_v56 = vmov 0 }
 0x180   :  { %vm131_vm6 = vcmp.le.s32.totalorder %v123_v50, 1  ;;  %vm134_vm7 = vcmp.le.s32.totalorder %v123_v50, 2  ;;  %vm137_vm9 = vcmp.le.s32.totalorder %v123_v50, 3  ;;  %vm140_vm12 = vcmp.le.s32.totalorder %v123_v50, 4 }
 0x181   :  { %v2648_v31 = vpop.eup %2647  ;;  %vm3178_vm11 = vmand %vm131_vm6, %vm132_vm5  ;;  %vm143_vm15 = vcmp.le.s32.totalorder %v123_v50, 5  ;;  %vm146_vm4 = vcmp.le.s32.totalorder %v123_v50, 6  ;;  %vm149_vm6 = vcmp.le.s32.totalorder %v123_v50, 7 }
 0x182   :  { %v412_v54 = vmul.f32 %v2648_v31, %v403_v62  ;;  %v4160_v60 = vsel %vm3178_vm11, 4294967295, %v4159_v60  ;;  %vm3182_vm14 = vmand %vm134_vm7, %vm135_vm8  ;;  %v4165_v62 = vmov 0  ;;  %vm150_vm11 = vcmp.gt.s32.totalorder %v127_v47, 7 }
 0x183   :  { %vm3187_vm3 = vmand %vm137_vm9, %vm138_vm10  ;;  %vm311_vm10 = vcmask 523264  }
 0x184   :  { %414 = vrot.lane.b32.xlu1 %v412_v54, %s2831_s22  ;;  %v4164_v56 = vsel %vm3187_vm3, 4294967295, %v4163_v56  ;;  %vm3191_vm5 = vmand %vm140_vm12, %vm141_vm13  ;;  %vm128_vm12 = vcmp.le.s32.totalorder %v123_v50, 0  ;;  %vm129_vm13 = vcmp.gt.s32.totalorder %v127_v47, 0  ;;  %vm4173_vm3 = vcmp.lt.s32.totalorder %v3053_v35, 32 }
 0x185   :  { %v4166_v62 = vsel %vm3191_vm5, 4294967295, %v4165_v62  ;;  %vm3195_vm7 = vmand %vm143_vm15, %vm144_vm0  ;;  %vm2832_vm5 = vmmov 1  }
 0x186   :  { %vm3199_vm8 = vmand %vm146_vm4, %vm147_vm2 }
 0x187   :  { %vm3204_vm9 = vmand %vm149_vm6, %vm150_vm11  ;;  %vm4183_vm6 = vnez %v4160_v60 }
 0x188   :  { %419 = vrot.lane.b32.xlu1 %v410_v42, %s2831_s22  ;;  %vm117_vm15 = vmxor %vm4173_vm3, %vm2832_vm5  ;;  %vm4182_vm5 = vcmp.lt.s32.totalorder %v3060_v40, 192 }
 0x189   :  { %vm4174_vm0 = vmmov %vm4173_vm3  ;;  %vm4181_vm3 = vnez %v4158_v57 }
 0x18a   :  { %vm3213_vm2 = vmand %vm311_vm10, %vm4174_vm0 }
 0x18b   :  { %vm3217_vm4 = vmand %vm128_vm12, %vm129_vm13 }
 0x18c   :  { %vm3222_vm11 = vmand %vm311_vm10, %vm117_vm15  ;;  %vm4189_vm15 = vnez %v4164_v56 }
 0x18d   :  { %vm4185_vm12 = vmmov %vm4182_vm5 }
 0x18e   :  { %vm4188_vm13 = vmmov %vm4182_vm5 }
 0x18f   :  { %vm4192_vm0 = vmmov %vm4182_vm5 }
 0x1f6   :  { %v415_v47 = vpop.permute.xlu1 %414 }
 0x1f7   :  { %v417_v50 = vsel %vm3217_vm4, %v415_v47, 0.0 }
 0x1f8   :  { %424 = vst.msk [vmem:[#allocation2] sm:$0xff] %vm3213_vm2, %v417_v50  ;;  %2523 = vmatmul.mubr.msk.f32.vlgmr.msra.gmra.mxu1 %vm311_vm10, %v417_v50 }
 0x1f9   :  { %426 = vst.msk [vmem:[#allocation2 + $0x38] sm:$0xff] %vm3222_vm11, %v417_v50  ;;  %689 = vmatpush1.msra.mxu1 %v2886_v8  ;;  %736 = vmatprep.mubr.f32.mxu1 %v2829_v3 }
 0x1fa   :  { %v420_v35 = vpop.permute.xlu1 %419  ;;  %690 = vmatprep.subr.mxu1 %v2893_v9 }
 0x1fb   :  { %v422_v54 = vsel %vm3217_vm4, %v420_v35, 0.0  ;;  %691 = vmatpush1.msra.mxu1 %v2900_v10 }
 0x1fc   :  { %522 = vrot.lane.b32.xlu0 %v422_v54, %s2831_s22  ;;  %692 = vmatprep.subr.mxu1 %v2913_v13 }
 0x1fd   :  { %693 = vmatpush1.msra.mxu1 %v2919_v14 }
 0x1fe   :  { %694 = vmatprep.subr.mxu1 %v2927_v15 }
 0x1ff   :  { %695 = vmatpush1.msra.mxu1 %v2934_v16 }
 0x200   :  { %696 = vmatprep.subr.mxu1 %v2947_v19 }
 0x201   :  { %697 = vmatpush1.msra.mxu1 %v2954_v20 }
 0x202   :  { %698 = vmatprep.subr.mxu1 %v2961_v21 }
 0x203   :  { %699 = vmatpush1.msra.mxu1 %v2968_v22 }
 0x204   :  { %700 = vmatprep.subr.mxu1 %v2981_v25 }
 0x205   :  { %701 = vmatpush1.msra.mxu1 %v2988_v26 }
 0x206   :  { %702 = vmatprep.subr.mxu1 %v2995_v27 }
 0x207   :  { %703 = vmatpush1.msra.mxu1 %v3002_v28 }
 0x208   :  { %928 = vmatprep.subr.mxu1 %v2881_v7 }
 0x2b8   :  { %v498_v47 = vpop.f32.mrf.mxu1 }
 0x2b9   :  { %v503_v35 = vadd.f32 %v498_v47, %v427_v5 }
 0x2ba   :  { %v500_v46 = vpop.f32.mrf.mxu1 }
 0x2bb   :  { %v2524_v37 = vmul.f32 -1.442695, %v503_v35  ;;  %v504_v6 = vadd.f32 %v500_v46, %v428_v32  ;;  %v523_v32 = vpop.permute.xlu0 %522 }
 0x2bd   :  { %2649 = vpow2.f32 %v2524_v37  ;;  %v2525_v18 = vmul.f32 -1.442695, %v504_v6 }
 0x2bf   :  { %2651 = vpow2.f32 %v2525_v18 }
 0x2c0   :  { %2653 = vtanh.f32 %v504_v6 }
 0x2ca   :  { %v2650_v0 = vpop.eup %2649 }
 0x2cb   :  { %v511_v41 = vadd.f32 1.0, %v2650_v0 }
 0x2cc   :  { %v2652_v36 = vpop.eup %2651 }
 0x2cd   :  { %v512_v49 = vadd.f32 1.0, %v2652_v36  ;;  %v2654_v34 = vpop.eup %2653 }
 0x2cf   :  { %2655 = vrcp.f32 %v512_v49 }
 0x2d0   :  { %2657 = vrcp.f32 %v511_v41 }
 0x2dc   :  { %v2656_v5 = vpop.eup %2655 }
 0x2dd   :  { %v2658_v47 = vpop.eup %2657  ;;  %v520_v35 = vsel %vm4182_vm5, %v2654_v34, %v2656_v5  ;;  %vm4193_vm5 = vnez %v4166_v62 }
 0x2de   :  { %v526_v17 = vmul.f32 %v2658_v47, %v520_v35  ;;  %v525_v37 = vmul.f32 %v2658_v47, %v523_v32 }
 0x2e0   :  { %528 = vrot.lane.b32.xlu1 %v526_v17, %s2831_s22 }
 0x352   :  { %v529_v46 = vpop.permute.xlu1 %528 }
 0x353   :  { %v531_v18 = vadd.f32 %v529_v46, %v525_v37 }
 0x355   :  { %2659 = vtanh.f32 %v531_v18  ;;  %540 = vrot.lane.b32.xlu1 %v531_v18, %s2831_s22 }
 0x362   :  { %v2660_v0 = vpop.eup %2659 }
 0x363   :  { %v533_v6 = vmul.f32 %v2660_v0, %v520_v35  ;;  %v4184_v35 = vsel %vm4181_vm3, %v3086_v61, %v3074_v53 }
 0x365   :  { %535 = vrot.lane.b32.xlu0 %v533_v6, %s2831_s22 }
 0x3c7   :  { %v541_v41 = vpop.permute.xlu1 %540 }
 0x3c8   :  { %v543_v49 = vsel %vm4183_vm6, %v541_v41, %v422_v54 }
 0x3c9   :  { %642 = vrot.lane.b32.xlu0 %v543_v49, %s2831_s22 }
 0x3d7   :  { %v536_v34 = vpop.permute.xlu0 %535 }
 0x3d8   :  { %v538_v17 = vsel %vm4183_vm6, %v536_v34, %v417_v50  ;;  %v544_v36 = vsel %vm4183_vm6, %v536_v34, 0.0 }
 0x3d9   :  { %545 = vst.msk [vmem:[#allocation2 + $0x8] sm:$0xff] %vm3213_vm2, %v544_v36  ;;  %2526 = vmatmul.mubr.msk.f32.vlgmr.msra.gmra.mxu0 %vm311_vm10, %v538_v17 }
 0x3da   :  { %546 = vst.msk [vmem:[#allocation2 + $0x30] sm:$0xff] %vm3222_vm11, %v544_v36  ;;  %809 = vmatpush1.msra.mxu0 %v2886_v8  ;;  %856 = vmatprep.mubr.f32.mxu0 %v2829_v3 }
 0x3db   :  { %810 = vmatprep.subr.mxu0 %v2893_v9 }
 0x3dc   :  { %811 = vmatpush1.msra.mxu0 %v2900_v10 }
 0x3dd   :  { %812 = vmatprep.subr.mxu0 %v2913_v13 }
 0x3de   :  { %813 = vmatpush1.msra.mxu0 %v2919_v14 }
 0x3df   :  { %814 = vmatprep.subr.mxu0 %v2927_v15 }
 0x3e0   :  { %815 = vmatpush1.msra.mxu0 %v2934_v16 }
 0x3e1   :  { %816 = vmatprep.subr.mxu0 %v2947_v19 }
 0x3e2   :  { %817 = vmatpush1.msra.mxu0 %v2954_v20 }
 0x3e3   :  { %818 = vmatprep.subr.mxu0 %v2961_v21 }
 0x3e4   :  { %819 = vmatpush1.msra.mxu0 %v2968_v22 }
 0x3e5   :  { %820 = vmatprep.subr.mxu0 %v2981_v25 }
 0x3e6   :  { %821 = vmatpush1.msra.mxu0 %v2988_v26 }
 0x3e7   :  { %822 = vmatprep.subr.mxu0 %v2995_v27 }
 0x3e8   :  { %823 = vmatpush1.msra.mxu0 %v3002_v28 }
 0x3e9   :  { %1048 = vmatprep.subr.mxu0 %v2881_v7 }
 0x499   :  { %v618_v50 = vpop.f32.mrf.mxu0 }
 0x49a   :  { %v623_v54 = vadd.f32 %v618_v50, %v547_v63 }
 0x49b   :  { %v620_v5 = vpop.f32.mrf.mxu0 }
 0x49c   :  { %v2527_v47 = vmul.f32 -1.442695, %v623_v54  ;;  %v624_v32 = vadd.f32 %v620_v5, %v4184_v35  ;;  %v643_v54 = vpop.permute.xlu0 %642 }
 0x49e   :  { %2661 = vpow2.f32 %v2527_v47  ;;  %v2528_v37 = vmul.f32 -1.442695, %v624_v32 }
 0x4a0   :  { %2663 = vpow2.f32 %v2528_v37 }
 0x4a1   :  { %2665 = vtanh.f32 %v624_v32 }
 0x4ab   :  { %v2662_v46 = vpop.eup %2661 }
 0x4ac   :  { %v631_v0 = vadd.f32 1.0, %v2662_v46 }
 0x4ad   :  { %v2664_v18 = vpop.eup %2663 }
 0x4ae   :  { %v632_v6 = vadd.f32 1.0, %v2664_v18  ;;  %v2666_v41 = vpop.eup %2665 }
 0x4b0   :  { %2667 = vrcp.f32 %v632_v6 }
 0x4b1   :  { %2669 = vrcp.f32 %v631_v0 }
 0x4bd   :  { %v2668_v63 = vpop.eup %2667 }
 0x4be   :  { %v2670_v34 = vpop.eup %2669  ;;  %v640_v36 = vsel %vm4185_vm12, %v2666_v41, %v2668_v63  ;;  %vm4196_vm12 = vmmov %vm4192_vm0 }
 0x4bf   :  { %v646_v50 = vmul.f32 %v2670_v34, %v640_v36  ;;  %v645_v5 = vmul.f32 %v2670_v34, %v643_v54 }
 0x4c1   :  { %648 = vrot.lane.b32.xlu1 %v646_v50, %s2831_s22  ;;  %v4187_v50 = vsel %vm4181_vm3, %v3130_v38, %v3062_v43 }
 0x533   :  { %v649_v47 = vpop.permute.xlu1 %648 }
 0x534   :  { %v651_v35 = vadd.f32 %v649_v47, %v645_v5 }
 0x536   :  { %2671 = vtanh.f32 %v651_v35  ;;  %660 = vrot.lane.b32.xlu1 %v651_v35, %s2831_s22 }
 0x543   :  { %v2672_v37 = vpop.eup %2671 }
 0x544   :  { %v653_v32 = vmul.f32 %v2672_v37, %v640_v36 }
 0x546   :  { %655 = vrot.lane.b32.xlu0 %v653_v32, %s2831_s22 }
 0x5a8   :  { %v661_v46 = vpop.permute.xlu1 %660 }
 0x5a9   :  { %v663_v18 = vsel %vm3182_vm14, %v661_v46, %v543_v49 }
 0x5aa   :  { %762 = vrot.lane.b32.xlu0 %v663_v18, %s2831_s22 }
 0x5b8   :  { %v656_v0 = vpop.permute.xlu0 %655 }
 0x5b9   :  { %v658_v6 = vsel %vm3182_vm14, %v656_v0, %v538_v17  ;;  %v664_v41 = vsel %vm3182_vm14, %v656_v0, 0.0  ;;  %v4186_v17 = vsel %vm3068_vm1, %v3108_v11, %v3057_v39 }
 0x5ba   :  { %665 = vst.msk [vmem:[#allocation2 + $0x10] sm:$0xff] %vm3213_vm2, %v664_v41  ;;  %2529 = vmatmul.mubr.msk.f32.vlgmr.msra.gmra.mxu1 %vm311_vm10, %v658_v6 }
 0x5bb   :  { %666 = vst.msk [vmem:[#allocation2 + $0x28] sm:$0xff] %vm3222_vm11, %v664_v41  ;;  %929 = vmatpush1.msra.mxu1 %v2886_v8  ;;  %976 = vmatprep.mubr.f32.mxu1 %v2829_v3 }
 0x5bc   :  { %930 = vmatprep.subr.mxu1 %v2893_v9 }
 0x5bd   :  { %931 = vmatpush1.msra.mxu1 %v2900_v10 }
 0x5be   :  { %932 = vmatprep.subr.mxu1 %v2913_v13 }
 0x5bf   :  { %933 = vmatpush1.msra.mxu1 %v2919_v14 }
 0x5c0   :  { %934 = vmatprep.subr.mxu1 %v2927_v15 }
 0x5c1   :  { %935 = vmatpush1.msra.mxu1 %v2934_v16 }
 0x5c2   :  { %936 = vmatprep.subr.mxu1 %v2947_v19 }
 0x5c3   :  { %937 = vmatpush1.msra.mxu1 %v2954_v20 }
 0x5c4   :  { %938 = vmatprep.subr.mxu1 %v2961_v21 }
 0x5c5   :  { %939 = vmatpush1.msra.mxu1 %v2968_v22 }
 0x5c6   :  { %940 = vmatprep.subr.mxu1 %v2981_v25 }
 0x5c7   :  { %941 = vmatpush1.msra.mxu1 %v2988_v26 }
 0x5c8   :  { %942 = vmatprep.subr.mxu1 %v2995_v27 }
 0x5c9   :  { %943 = vmatpush1.msra.mxu1 %v3002_v28 }
 0x5ca   :  { %1168 = vmatprep.subr.mxu1 %v2881_v7 }
 0x67a   :  { %v738_v49 = vpop.f32.mrf.mxu1 }
 0x67b   :  { %v743_v63 = vadd.f32 %v738_v49, %v4186_v17  ;;  %v763_v17 = vpop.permute.xlu0 %762 }
 0x67c   :  { %v740_v34 = vpop.f32.mrf.mxu1 }
 0x67d   :  { %v2530_v36 = vmul.f32 -1.442695, %v743_v63  ;;  %v744_v54 = vadd.f32 %v740_v34, %v4187_v50 }
 0x67f   :  { %2673 = vpow2.f32 %v2530_v36  ;;  %v2531_v5 = vmul.f32 -1.442695, %v744_v54 }
 0x681   :  { %2675 = vpow2.f32 %v2531_v5 }
 0x682   :  { %2677 = vtanh.f32 %v744_v54 }
 0x68c   :  { %v2674_v47 = vpop.eup %2673 }
 0x68d   :  { %v751_v35 = vadd.f32 1.0, %v2674_v47 }
 0x68e   :  { %v2676_v7 = vpop.eup %2675 }
 0x68f   :  { %v752_v37 = vadd.f32 1.0, %v2676_v7  ;;  %v2678_v32 = vpop.eup %2677 }
 0x691   :  { %2679 = vrcp.f32 %v752_v37 }
 0x692   :  { %2681 = vrcp.f32 %v751_v35 }
 0x69e   :  { %v2680_v46 = vpop.eup %2679 }
 0x69f   :  { %v2682_v0 = vpop.eup %2681  ;;  %v760_v41 = vsel %vm4188_vm13, %v2678_v32, %v2680_v46  ;;  %vm4199_vm13 = vmmov %vm4192_vm0 }
 0x6a0   :  { %v766_v49 = vmul.f32 %v2682_v0, %v760_v41  ;;  %v765_v63 = vmul.f32 %v2682_v0, %v763_v17 }
 0x6a2   :  { %768 = vrot.lane.b32.xlu1 %v766_v49, %s2831_s22 }
 0x714   :  { %v769_v34 = vpop.permute.xlu1 %768 }
 0x715   :  { %v771_v36 = vadd.f32 %v769_v34, %v765_v63 }
 0x717   :  { %2683 = vtanh.f32 %v771_v36  ;;  %780 = vrot.lane.b32.xlu1 %v771_v36, %s2831_s22 }
 0x724   :  { %v2684_v50 = vpop.eup %2683 }
 0x725   :  { %v773_v54 = vmul.f32 %v2684_v50, %v760_v41  ;;  %v4191_v41 = vsel %vm4181_vm3, %v3062_v43, %v3130_v38 }
 0x727   :  { %775 = vrot.lane.b32.xlu0 %v773_v54, %s2831_s22 }
 0x789   :  { %v781_v5 = vpop.permute.xlu1 %780 }
 0x78a   :  { %v783_v47 = vsel %vm4189_vm15, %v781_v5, %v663_v18 }
 0x78b   :  { %882 = vrot.lane.b32.xlu0 %v783_v47, %s2831_s22 }
 0x799   :  { %v776_v7 = vpop.permute.xlu0 %775 }
 0x79a   :  { %v778_v35 = vsel %vm4189_vm15, %v776_v7, %v658_v6  ;;  %v784_v37 = vsel %vm4189_vm15, %v776_v7, 0.0  ;;  %v4190_v6 = vsel %vm3068_vm1, %v3057_v39, %v3108_v11 }
 0x79b   :  { %785 = vst.msk [vmem:[#allocation2 + $0x18] sm:$0xff] %vm3213_vm2, %v784_v37  ;;  %2532 = vmatmul.mubr.msk.f32.vlgmr.msra.gmra.mxu0 %vm311_vm10, %v778_v35 }
 0x79c   :  { %786 = vst.msk [vmem:[#allocation2 + $0x20] sm:$0xff] %vm3222_vm11, %v784_v37  ;;  %1049 = vmatpush1.msra.mxu0 %v2886_v8  ;;  %1096 = vmatprep.mubr.f32.mxu0 %v2829_v3 }
 0x79d   :  { %1050 = vmatprep.subr.mxu0 %v2893_v9 }
 0x79e   :  { %1051 = vmatpush1.msra.mxu0 %v2900_v10 }
 0x79f   :  { %1052 = vmatprep.subr.mxu0 %v2913_v13 }
 0x7a0   :  { %1053 = vmatpush1.msra.mxu0 %v2919_v14 }
 0x7a1   :  { %1054 = vmatprep.subr.mxu0 %v2927_v15 }
 0x7a2   :  { %1055 = vmatpush1.msra.mxu0 %v2934_v16 }
 0x7a3   :  { %1056 = vmatprep.subr.mxu0 %v2947_v19 }
 0x7a4   :  { %1057 = vmatpush1.msra.mxu0 %v2954_v20 }
 0x7a5   :  { %1058 = vmatprep.subr.mxu0 %v2961_v21 }
 0x7a6   :  { %1059 = vmatpush1.msra.mxu0 %v2968_v22 }
 0x7a7   :  { %1060 = vmatprep.subr.mxu0 %v2981_v25 }
 0x7a8   :  { %1061 = vmatpush1.msra.mxu0 %v2988_v26 }
 0x7a9   :  { %1062 = vmatprep.subr.mxu0 %v2995_v27 }
 0x7aa   :  { %1063 = vmatpush1.msra.mxu0 %v3002_v28 }
 0x7fd   :  { %v883_v43 = vpop.permute.xlu0 %882 }
 0x85b   :  { %v858_v18 = vpop.f32.mrf.mxu0 }
 0x85c   :  { %v863_v32 = vadd.f32 %v858_v18, %v4190_v6 }
 0x85d   :  { %v860_v46 = vpop.f32.mrf.mxu0 }
 0x85e   :  { %v2533_v0 = vmul.f32 -1.442695, %v863_v32  ;;  %v864_v49 = vadd.f32 %v860_v46, %v4191_v41 }
 0x860   :  { %2685 = vpow2.f32 %v2533_v0  ;;  %v2534_v17 = vmul.f32 -1.442695, %v864_v49 }
 0x862   :  { %2687 = vpow2.f32 %v2534_v17 }
 0x863   :  { %2689 = vtanh.f32 %v864_v49 }
 0x86d   :  { %v2686_v63 = vpop.eup %2685 }
 0x86e   :  { %v871_v36 = vadd.f32 1.0, %v2686_v63 }
 0x86f   :  { %v2688_v34 = vpop.eup %2687 }
 0x870   :  { %v872_v50 = vadd.f32 1.0, %v2688_v34  ;;  %v2690_v39 = vpop.eup %2689 }
 0x872   :  { %2691 = vrcp.f32 %v872_v50 }
 0x873   :  { %2693 = vrcp.f32 %v871_v36 }
 0x87f   :  { %v2692_v11 = vpop.eup %2691 }
 0x880   :  { %v2694_v54 = vpop.eup %2693  ;;  %v880_v5 = vsel %vm4192_vm0, %v2690_v39, %v2692_v11 }
 0x881   :  { %v886_v7 = vmul.f32 %v2694_v54, %v880_v5  ;;  %v885_v38 = vmul.f32 %v2694_v54, %v883_v43 }
 0x883   :  { %888 = vrot.lane.b32.xlu1 %v886_v7, %s2831_s22  ;;  %v4197_v7 = vsel %vm3068_vm1, %v3084_v59, %v3072_v52 }
 0x8f5   :  { %v889_v37 = vpop.permute.xlu1 %888 }
 0x8f6   :  { %v891_v18 = vadd.f32 %v889_v37, %v885_v38 }
 0x8f8   :  { %2695 = vtanh.f32 %v891_v18  ;;  %900 = vrot.lane.b32.xlu1 %v891_v18, %s2831_s22  ;;  %v4198_v18 = vsel %vm4181_vm3, %v3098_v2, %v3082_v58 }
 0x905   :  { %v2696_v6 = vpop.eup %2695 }
 0x906   :  { %v893_v32 = vmul.f32 %v2696_v6, %v880_v5 }
 0x908   :  { %895 = vrot.lane.b32.xlu0 %v893_v32, %s2831_s22 }
 0x96a   :  { %v901_v46 = vpop.permute.xlu1 %900 }
 0x96b   :  { %v903_v0 = vsel %vm4193_vm5, %v901_v46, %v783_v47 }
 0x96c   :  { %1002 = vrot.lane.b32.xlu0 %v903_v0, %s2831_s22 }
 0x97a   :  { %v896_v41 = vpop.permute.xlu0 %895 }
 0x97b   :  { %v898_v49 = vsel %vm4193_vm5, %v896_v41, %v778_v35  ;;  %v904_v17 = vsel %vm4193_vm5, %v896_v41, 0.0 }
 0x97c   :  { %905 = vst.msk [vmem:[#allocation2 + $0x20] sm:$0xff] %vm3213_vm2, %v904_v17  ;;  %2535 = vmatmul.mubr.msk.f32.vlgmr.msra.gmra.mxu1 %vm311_vm10, %v898_v49 }
 0x97d   :  { %906 = vst.msk [vmem:[#allocation2 + $0x18] sm:$0xff] %vm3222_vm11, %v904_v17  ;;  %1169 = vmatpush1.msra.mxu1 %v2886_v8  ;;  %1216 = vmatprep.mubr.f32.mxu1 %v2829_v3 }
 0x97e   :  { %1170 = vmatprep.subr.mxu1 %v2893_v9  ;;  %v4194_v9 = vsel %vm3068_vm1, %v3066_v48, %v3076_v55 }
 0x97f   :  { %1171 = vmatpush1.msra.mxu1 %v2900_v10 }
 0x980   :  { %1172 = vmatprep.subr.mxu1 %v2913_v13 }
 0x981   :  { %1173 = vmatpush1.msra.mxu1 %v2919_v14 }
 0x982   :  { %1174 = vmatprep.subr.mxu1 %v2927_v15  ;;  %v4195_v15 = vsel %vm4181_vm3, %v3074_v53, %v3086_v61 }
 0x983   :  { %1175 = vmatpush1.msra.mxu1 %v2934_v16 }
 0x984   :  { %1176 = vmatprep.subr.mxu1 %v2947_v19 }
 0x985   :  { %1177 = vmatpush1.msra.mxu1 %v2954_v20 }
 0x986   :  { %1178 = vmatprep.subr.mxu1 %v2961_v21 }
 0x987   :  { %1179 = vmatpush1.msra.mxu1 %v2968_v22 }
 0x988   :  { %1180 = vmatprep.subr.mxu1 %v2981_v25 }
 0x989   :  { %1181 = vmatpush1.msra.mxu1 %v2988_v26 }
 0x98a   :  { %1182 = vmatprep.subr.mxu1 %v2995_v27 }
 0x98b   :  { %1183 = vmatpush1.msra.mxu1 %v3002_v28 }
 0x9de   :  { %v1003_v53 = vpop.permute.xlu0 %1002 }
 0xa3c   :  { %v978_v8 = vpop.f32.mrf.mxu1 }
 0xa3d   :  { %v983_v10 = vadd.f32 %v978_v8, %v4194_v9 }
 0xa3e   :  { %v980_v13 = vpop.f32.mrf.mxu1 }
 0xa3f   :  { %v2536_v14 = vmul.f32 -1.442695, %v983_v10  ;;  %v984_v16 = vadd.f32 %v980_v13, %v4195_v15 }
 0xa41   :  { %2697 = vpow2.f32 %v2536_v14  ;;  %v2537_v19 = vmul.f32 -1.442695, %v984_v16 }
 0xa43   :  { %2699 = vpow2.f32 %v2537_v19 }
 0xa44   :  { %2701 = vtanh.f32 %v984_v16 }
 0xa4e   :  { %v2698_v20 = vpop.eup %2697 }
 0xa4f   :  { %v991_v22 = vadd.f32 1.0, %v2698_v20 }
 0xa50   :  { %v2700_v21 = vpop.eup %2699 }
 0xa51   :  { %v992_v25 = vadd.f32 1.0, %v2700_v21  ;;  %v2702_v26 = vpop.eup %2701 }
 0xa53   :  { %2703 = vrcp.f32 %v992_v25 }
 0xa54   :  { %2705 = vrcp.f32 %v991_v22 }
 0xa60   :  { %v2704_v27 = vpop.eup %2703 }
 0xa61   :  { %v2706_v28 = vpop.eup %2705  ;;  %v1000_v48 = vsel %vm4196_vm12, %v2702_v26, %v2704_v27  ;;  %v4200_v26 = vsel %vm3068_vm1, %v3120_v24, %v3096_v1  ;;  %vm4204_vm12 = vmmov %vm4192_vm0 }
 0xa62   :  { %v1006_v55 = vmul.f32 %v2706_v28, %v1000_v48  ;;  %v1005_v61 = vmul.f32 %v2706_v28, %v1003_v53 }
 0xa64   :  { %1008 = vrot.lane.b32.xlu1 %v1006_v55, %s2831_s22  ;;  %v4201_v55 = vsel %vm4181_vm3, %v3140_v44, %v3118_v23  ;;  %v36_v23 = vld [vmem:[%s4141_s2 + $0x98] sm:$0xff]  ;;  %v35_v44 = vld [vmem:[%s4141_s2 + $0x90] sm:$0xff] }
 0xa65   :  { %1320 = vmatprep.subr.mxu0 %v36_v23 }
 0xad6   :  { %v1009_v47 = vpop.permute.xlu1 %1008 }
 0xad7   :  { %v1011_v35 = vadd.f32 %v1009_v47, %v1005_v61 }
 0xad9   :  { %2707 = vtanh.f32 %v1011_v35  ;;  %1020 = vrot.lane.b32.xlu1 %v1011_v35, %s2831_s22 }
 0xae6   :  { %v2708_v63 = vpop.eup %2707 }
 0xae7   :  { %v1013_v34 = vmul.f32 %v2708_v63, %v1000_v48 }
 0xae9   :  { %1015 = vrot.lane.b32.xlu0 %v1013_v34, %s2831_s22 }
 0xb4b   :  { %v1021_v36 = vpop.permute.xlu1 %1020 }
 0xb4c   :  { %v1023_v50 = vsel %vm3195_vm7, %v1021_v36, %v903_v0 }
 0xb4d   :  { %1122 = vrot.lane.b32.xlu0 %v1023_v50, %s2831_s22 }
 0xb5b   :  { %v1016_v39 = vpop.permute.xlu0 %1015 }
 0xb5c   :  { %v1018_v11 = vsel %vm3195_vm7, %v1016_v39, %v898_v49  ;;  %v1024_v54 = vsel %vm3195_vm7, %v1016_v39, 0.0 }
 0xb5d   :  { %1025 = vst.msk [vmem:[#allocation2 + $0x28] sm:$0xff] %vm3213_vm2, %v1024_v54  ;;  %2538 = vmatmul.mubr.msk.f32.vlgmr.msra.gmra.mxu0 %vm311_vm10, %v1018_v11 }
 0xb5e   :  { %1026 = vst.msk [vmem:[#allocation2 + $0x10] sm:$0xff] %vm3222_vm11, %v1024_v54  ;;  %1368 = vmatprep.mubr.f32.mxu0 %v2829_v3  ;;  %v33_v54 = vld [vmem:[%s4141_s2 + $0x80] sm:$0xff]  ;;  %1321 = vmatpush1.msra.mxu0 %v35_v44 }
 0xbbf   :  { %v1123_v58 = vpop.permute.xlu0 %1122 }
 0xc1d   :  { %v1098_v5 = vpop.f32.mrf.mxu0 }
 0xc1e   :  { %v1103_v43 = vadd.f32 %v1098_v5, %v4197_v7  ;;  %v32_v5 = vld [vmem:[%s4141_s2 + $0x78] sm:$0xff]  ;;  %v31_v7 = vld [vmem:[%s4141_s2 + $0x70] sm:$0xff] }
 0xc1f   :  { %v1100_v38 = vpop.f32.mrf.mxu0 }
 0xc20   :  { %v2539_v37 = vmul.f32 -1.442695, %v1103_v43  ;;  %v1104_v6 = vadd.f32 %v1100_v38, %v4198_v18  ;;  %v30_v43 = vld [vmem:[%s4141_s2 + $0x68] sm:$0xff] }
 0xc22   :  { %2709 = vpow2.f32 %v2539_v37  ;;  %v2540_v32 = vmul.f32 -1.442695, %v1104_v6 }
 0xc24   :  { %2711 = vpow2.f32 %v2540_v32  ;;  %v29_v32 = vld [vmem:[%s4141_s2 + $0x60] sm:$0xff] }
 0xc25   :  { %2713 = vtanh.f32 %v1104_v6 }
 0xc2f   :  { %v2710_v46 = vpop.eup %2709 }
 0xc30   :  { %v1111_v41 = vadd.f32 1.0, %v2710_v46  ;;  %v28_v46 = vld [vmem:[%s4141_s2 + $0x58] sm:$0xff] }
 0xc31   :  { %v2712_v0 = vpop.eup %2711 }
 0xc32   :  { %v1112_v49 = vadd.f32 1.0, %v2712_v0  ;;  %v2714_v52 = vpop.eup %2713  ;;  %v27_v0 = vld [vmem:[%s4141_s2 + $0x50] sm:$0xff] }
 0xc34   :  { %2715 = vrcp.f32 %v1112_v49  ;;  %v25_v49 = vld [vmem:[%s4141_s2 + $0x40] sm:$0xff] }
 0xc35   :  { %2717 = vrcp.f32 %v1111_v41  ;;  %v26_v41 = vld [vmem:[%s4141_s2 + $0x48] sm:$0xff] }
 0xc41   :  { %v2716_v59 = vpop.eup %2715 }
 0xc42   :  { %v2718_v17 = vpop.eup %2717  ;;  %v1120_v8 = vsel %vm4199_vm13, %v2714_v52, %v2716_v59  ;;  %v24_v52 = vld [vmem:[%s4141_s2 + $0x38] sm:$0xff]  ;;  %v23_v59 = vld [vmem:[%s4141_s2 + $0x30] sm:$0xff] }
 0xc43   :  { %v1126_v9 = vmul.f32 %v2718_v17, %v1120_v8  ;;  %v1125_v2 = vmul.f32 %v2718_v17, %v1123_v58  ;;  %v22_v17 = vld [vmem:[%s4141_s2 + $0x28] sm:$0xff] }
 0xc45   :  { %1128 = vrot.lane.b32.xlu1 %v1126_v9, %s2831_s22 }
 0xcb7   :  { %v1129_v10 = vpop.permute.xlu1 %1128 }
 0xcb8   :  { %v1131_v13 = vadd.f32 %v1129_v10, %v1125_v2  ;;  %v3548_v2 = vld [vmem:[%s4141_s2 + $0x198] sm:$0xff]  ;;  %v3554_v10 = vld [vmem:[%s4141_s2 + $0x190] sm:$0xff] }
 0xcb9   :  { %1435 = vmatprep.subr.mxu1 %v3548_v2 }
 0xcba   :  { %2719 = vtanh.f32 %v1131_v13  ;;  %1140 = vrot.lane.b32.xlu1 %v1131_v13, %s2831_s22  ;;  %v3561_v13 = vld [vmem:[%s4141_s2 + $0x188] sm:$0xff] }
 0xcc7   :  { %v2720_v14 = vpop.eup %2719 }
 0xcc8   :  { %v1133_v15 = vmul.f32 %v2720_v14, %v1120_v8  ;;  %v21_v8 = vld [vmem:[%s4141_s2 + $0x20] sm:$0xff] }
 0xcc9   :  { %v3567_v14 = vld [vmem:[%s4141_s2 + $0x180] sm:$0xff] }
 0xcca   :  { %1135 = vrot.lane.b32.xlu0 %v1133_v15, %s2831_s22  ;;  %v3572_v15 = vld [vmem:[%s4141_s2 + $0x178] sm:$0xff] }
 0xd2c   :  { %v1141_v16 = vpop.permute.xlu1 %1140 }
 0xd2d   :  { %v1143_v19 = vsel %vm3199_vm8, %v1141_v16, %v1023_v50  ;;  %v3578_v16 = vld [vmem:[%s4141_s2 + $0x170] sm:$0xff] }
 0xd2e   :  { %1242 = vrot.lane.b32.xlu0 %v1143_v19, %s2831_s22  ;;  %v3585_v19 = vld [vmem:[%s4141_s2 + $0x168] sm:$0xff] }
 0xd3c   :  { %v1136_v20 = vpop.permute.xlu0 %1135 }
 0xd3d   :  { %v1138_v21 = vsel %vm3199_vm8, %v1136_v20, %v1018_v11  ;;  %v1144_v22 = vsel %vm3199_vm8, %v1136_v20, 0.0  ;;  %v34_v11 = vld [vmem:[%s4141_s2 + $0x88] sm:$0xff]  ;;  %v3591_v20 = vld [vmem:[%s4141_s2 + $0x160] sm:$0xff] }
 0xd3e   :  { %1145 = vst.msk [vmem:[#allocation2 + $0x30] sm:$0xff] %vm3213_vm2, %v1144_v22  ;;  %2541 = vmatmul.mubr.msk.f32.vlgmr.msra.gmra.mxu1 %vm311_vm10, %v1138_v21  ;;  %1322 = vmatprep.subr.mxu0 %v34_v11  ;;  %v3596_v21 = vld [vmem:[%s4141_s2 + $0x158] sm:$0xff]  ;;  %v4202_v11 = vsub.s32 0, %v3044_v30 }
 0xd3f   :  { %1146 = vst.msk [vmem:[#allocation2 + $0x8] sm:$0xff] %vm3222_vm11, %v1144_v22  ;;  %1483 = vmatprep.mubr.f32.mxu1 %v2829_v3  ;;  %1323 = vmatpush1.msra.mxu0 %v33_v54  ;;  %v3602_v22 = vld [vmem:[%s4141_s2 + $0x150] sm:$0xff] }
 0xd40   :  { %1324 = vmatprep.subr.mxu0 %v32_v5  ;;  %1436 = vmatpush1.msra.mxu1 %v3554_v10 }
 0xd41   :  { %1325 = vmatpush1.msra.mxu0 %v31_v7  ;;  %1437 = vmatprep.subr.mxu1 %v3561_v13  ;;  %v4203_v7 = vsub.s32 1, %v3044_v30 }
 0xd42   :  { %1326 = vmatprep.subr.mxu0 %v30_v43  ;;  %1438 = vmatpush1.msra.mxu1 %v3567_v14 }
 0xd43   :  { %1327 = vmatpush1.msra.mxu0 %v29_v32  ;;  %1439 = vmatprep.subr.mxu1 %v3572_v15 }
 0xd44   :  { %1328 = vmatprep.subr.mxu0 %v28_v46  ;;  %1440 = vmatpush1.msra.mxu1 %v3578_v16 }
 0xd45   :  { %1329 = vmatpush1.msra.mxu0 %v27_v0  ;;  %1441 = vmatprep.subr.mxu1 %v3585_v19 }
 0xd46   :  { %1330 = vmatprep.subr.mxu0 %v26_v41  ;;  %1442 = vmatpush1.msra.mxu1 %v3591_v20 }
 0xd47   :  { %1331 = vmatpush1.msra.mxu0 %v25_v49  ;;  %1443 = vmatprep.subr.mxu1 %v3596_v21 }
 0xd48   :  { %1332 = vmatprep.subr.mxu0 %v24_v52  ;;  %1444 = vmatpush1.msra.mxu1 %v3602_v22 }
 0xd49   :  { %1333 = vmatpush1.msra.mxu0 %v23_v59 }
 0xd4a   :  { %1334 = vmatprep.subr.mxu0 %v22_v17 }
 0xd4b   :  { %1335 = vmatpush1.msra.mxu0 %v21_v8 }
 0xd4c   :  { %1670 = vmatprep.subr.mxu0 %v3548_v2 }
 0xda0   :  { %v1243_v38 = vpop.permute.xlu0 %1242 }
 0xdfe   :  { %v1218_v25 = vpop.f32.mrf.mxu1 }
 0xdff   :  { %v1223_v27 = vadd.f32 %v1218_v25, %v4200_v26  ;;  %v3609_v25 = vld [vmem:[%s4141_s2 + $0x148] sm:$0xff]  ;;  %v3615_v26 = vld [vmem:[%s4141_s2 + $0x140] sm:$0xff] }
 0xe00   :  { %v1220_v28 = vpop.f32.mrf.mxu1  ;;  %1445 = vmatprep.subr.mxu1 %v3609_v25 }
 0xe01   :  { %v2542_v48 = vmul.f32 -1.442695, %v1223_v27  ;;  %v1224_v53 = vadd.f32 %v1220_v28, %v4201_v55  ;;  %v3620_v27 = vld [vmem:[%s4141_s2 + $0x138] sm:$0xff]  ;;  %1446 = vmatpush1.msra.mxu1 %v3615_v26  ;;  %v3626_v28 = vld [vmem:[%s4141_s2 + $0x130] sm:$0xff]  ;;  %v3639_v55 = vld [vmem:[%s4141_s2 + $0x120] sm:$0xff] }
 0xe02   :  { %1447 = vmatprep.subr.mxu1 %v3620_v27 }
 0xe03   :  { %2721 = vpow2.f32 %v2542_v48  ;;  %v2543_v61 = vmul.f32 -1.442695, %v1224_v53  ;;  %1448 = vmatpush1.msra.mxu1 %v3626_v28  ;;  %v3633_v48 = vld [vmem:[%s4141_s2 + $0x128] sm:$0xff] }
 0xe04   :  { %1449 = vmatprep.subr.mxu1 %v3633_v48 }
 0xe05   :  { %2723 = vpow2.f32 %v2543_v61  ;;  %1450 = vmatpush1.msra.mxu1 %v3639_v55 }
 0xe06   :  { %2725 = vtanh.f32 %v1224_v53  ;;  %1484 = vmatmul.mubr.f32.vlgmr.msra.gmra.mxu1 %v2829_v3  ;;  %1550 = vmatprep.subr.mxu1 %v3548_v2 }
 0xe07   :  { %1551 = vmatpush1.msra.mxu1 %v3554_v10  ;;  %1598 = vmatprep.mubr.f32.mxu1 %v2829_v3 }
 0xe08   :  { %1552 = vmatprep.subr.mxu1 %v3561_v13 }
 0xe09   :  { %1553 = vmatpush1.msra.mxu1 %v3567_v14 }
 0xe0a   :  { %1554 = vmatprep.subr.mxu1 %v3572_v15 }
 0xe0b   :  { %1555 = vmatpush1.msra.mxu1 %v3578_v16 }
 0xe0c   :  { %1556 = vmatprep.subr.mxu1 %v3585_v19 }
 0xe0d   :  { %1557 = vmatpush1.msra.mxu1 %v3591_v20 }
 0xe0e   :  { %1558 = vmatprep.subr.mxu1 %v3596_v21 }
 0xe0f   :  { %1559 = vmatpush1.msra.mxu1 %v3602_v22 }
 0xe10   :  { %v2722_v47 = vpop.eup %2721  ;;  %1560 = vmatprep.subr.mxu1 %v3609_v25 }
 0xe11   :  { %v1231_v63 = vadd.f32 1.0, %v2722_v47  ;;  %1561 = vmatpush1.msra.mxu1 %v3615_v26 }
 0xe12   :  { %v2724_v35 = vpop.eup %2723  ;;  %1562 = vmatprep.subr.mxu1 %v3620_v27 }
 0xe13   :  { %v1232_v34 = vadd.f32 1.0, %v2724_v35  ;;  %v2726_v1 = vpop.eup %2725  ;;  %1563 = vmatpush1.msra.mxu1 %v3626_v28  ;;  %v1262_v35 = vld [vmem:[#allocation2 + $0x8] sm:$0xff] }
 0xe14   :  { %1564 = vmatprep.subr.mxu1 %v3633_v48 }
 0xe15   :  { %2727 = vrcp.f32 %v1232_v34  ;;  %1565 = vmatpush1.msra.mxu1 %v3639_v55  ;;  %v1264_v34 = vld [vmem:[#allocation2 + $0x18] sm:$0xff] }
 0xe16   :  { %2729 = vrcp.f32 %v1231_v63  ;;  %1790 = vmatprep.subr.mxu1 %v3548_v2  ;;  %v1263_v63 = vld [vmem:[#allocation2 + $0x10] sm:$0xff] }
 0xe22   :  { %v2728_v24 = vpop.eup %2727 }
 0xe23   :  { %v2730_v36 = vpop.eup %2729  ;;  %v1240_v50 = vsel %vm4192_vm0, %v2726_v1, %v2728_v24  ;;  %v1265_v1 = vld [vmem:[#allocation2 + $0x20] sm:$0xff]  ;;  %v1266_v24 = vld [vmem:[#allocation2 + $0x28] sm:$0xff] }
 0xe24   :  { %v1246_v39 = vmul.f32 %v2730_v36, %v1240_v50  ;;  %v1245_v37 = vmul.f32 %v2730_v36, %v1243_v38  ;;  %v1267_v36 = vld [vmem:[#allocation2 + $0x30] sm:$0xff] }
 0xe26   :  { %1248 = vrot.lane.b32.xlu1 %v1246_v39, %s2831_s22  ;;  %v2512_v39 = vld [vmem:[%s4143_s3 + $0x1] ss:$8 sm:$0x3] }
 0xe27   :  { %v1273_v54 = vrot.slane %v2512_v39, %v4202_v11  ;;  %v1277_v43 = vrot.slane %v2512_v39, %v4203_v7 }
 0xe98   :  { %v1249_v18 = vpop.permute.xlu1 %1248 }
 0xe99   :  { %v1251_v6 = vadd.f32 %v1249_v18, %v1245_v37 }
 0xe9b   :  { %2731 = vtanh.f32 %v1251_v6 }
 0xea8   :  { %v2732_v9 = vpop.eup %2731 }
 0xea9   :  { %v1253_v58 = vmul.f32 %v2732_v9, %v1240_v50 }
 0xeab   :  { %1255 = vrot.lane.b32.xlu0 %v1253_v58, %s2831_s22 }
 0xf1d   :  { %v1256_v53 = vpop.permute.xlu0 %1255 }
 0xf1e   :  { %v1258_v61 = vsel %vm3204_vm9, %v1256_v53, 0.0 }
 0xf1f   :  { %1259 = vst.msk [vmem:[#allocation2 + $0x38] sm:$0xff] %vm3213_vm2, %v1258_v61 }
 0xf20   :  { %1260 = vst.msk [vmem:[#allocation2] sm:$0xff] %vm3222_vm11, %v1258_v61 }
 0xf26   :  { %v1268_v50 = vld [vmem:[#allocation2 + $0x38] sm:$0xff] }
 0xf27   :  { %v1261_v47 = vld [vmem:[#allocation2] sm:$0xff] }
 0xf28   :  { %2544 = vmatmul.mubr.msk.f32.vlgmr.msra.gmra.mxu0 %vm311_vm10, %v1261_v47 }
 0xf29   :  { %1374 = vmatprep.mubr.f32.mxu0 %v2829_v3  ;;  %1671 = vmatpush1.msra.mxu0 %v3554_v10 }
 0xf2a   :  { %1672 = vmatprep.subr.mxu0 %v3561_v13 }
 0xf2b   :  { %1673 = vmatpush1.msra.mxu0 %v3567_v14 }
 0xf2c   :  { %2545 = vmatmul.mubr.msk.f32.gmra.mxu0 %vm311_vm10, %v1262_v35  ;;  %1674 = vmatprep.subr.mxu0 %v3572_v15 }
 0xf2d   :  { %1380 = vmatprep.mubr.f32.mxu0 %v2829_v3  ;;  %1675 = vmatpush1.msra.mxu0 %v3578_v16 }
 0xf2e   :  { %1676 = vmatprep.subr.mxu0 %v3585_v19 }
 0xf2f   :  { %1677 = vmatpush1.msra.mxu0 %v3591_v20 }
 0xf30   :  { %2546 = vmatmul.mubr.msk.f32.gmra.mxu0 %vm311_vm10, %v1263_v63  ;;  %1678 = vmatprep.subr.mxu0 %v3596_v21 }
 0xf31   :  { %1386 = vmatprep.mubr.f32.mxu0 %v2829_v3  ;;  %1679 = vmatpush1.msra.mxu0 %v3602_v22 }
 0xf32   :  { %1680 = vmatprep.subr.mxu0 %v3609_v25 }
 0xf33   :  { %1681 = vmatpush1.msra.mxu0 %v3615_v26 }
 0xf34   :  { %2547 = vmatmul.mubr.msk.f32.gmra.mxu0 %vm311_vm10, %v1264_v34  ;;  %1682 = vmatprep.subr.mxu0 %v3620_v27 }
 0xf35   :  { %1392 = vmatprep.mubr.f32.mxu0 %v2829_v3  ;;  %1683 = vmatpush1.msra.mxu0 %v3626_v28 }
 0xf36   :  { %1684 = vmatprep.subr.mxu0 %v3633_v48 }
 0xf37   :  { %1685 = vmatpush1.msra.mxu0 %v3639_v55 }
 0xf38   :  { %2548 = vmatmul.mubr.msk.f32.gmra.mxu0 %vm311_vm10, %v1265_v1  ;;  %1910 = vmatprep.subr.mxu0 %v3548_v2 }
 0xf39   :  { %1398 = vmatprep.mubr.f32.mxu0 %v2829_v3 }
 0xf3c   :  { %2549 = vmatmul.mubr.msk.f32.gmra.mxu0 %vm311_vm10, %v1266_v24 }
 0xf3d   :  { %1404 = vmatprep.mubr.f32.mxu0 %v2829_v3 }
 0xf40   :  { %2550 = vmatmul.mubr.msk.f32.gmra.mxu0 %vm311_vm10, %v1267_v36 }
 0xf41   :  { %1410 = vmatprep.mubr.f32.mxu0 %v2829_v3 }
 0xf44   :  { %2551 = vmatmul.mubr.msk.f32.gmra.mxu0 %vm311_vm10, %v1268_v50 }
 0xf45   :  { %1718 = vmatprep.mubr.f32.mxu0 %v2829_v3 }
 0xfe8   :  { %v1370_v23 = vpop.f32.mrf.mxu0 }
 0xfea   :  { %v1372_v44 = vpop.f32.mrf.mxu0 }
 0xfec   :  { %v1376_v5 = vpop.f32.mrf.mxu0 }
 0xfed   :  { %v3706_v38 = vadd.f32 %v1376_v5, %v1273_v54 }
 0xfee   :  { %v1378_v37 = vpop.f32.mrf.mxu0 }
 0xfef   :  { %v3708_v18 = vadd.f32 %v1378_v37, %v1277_v43 }
 0xff0   :  { %v1382_v6 = vpop.f32.mrf.mxu0 }
 0xff1   :  { %v3710_v32 = vadd.f32 %v1382_v6, %v1273_v54 }
 0xff2   :  { %v1384_v46 = vpop.f32.mrf.mxu0 }
 0xff3   :  { %v3712_v0 = vadd.f32 %v1384_v46, %v1277_v43 }
 0xff4   :  { %v1388_v41 = vpop.f32.mrf.mxu0 }
 0xff5   :  { %v3714_v49 = vadd.f32 %v1388_v41, %v1273_v54 }
 0xff6   :  { %v1390_v52 = vpop.f32.mrf.mxu0 }
 0xff7   :  { %v3716_v59 = vadd.f32 %v1390_v52, %v1277_v43  ;;  %v3770_v52 = vadd.f32 %v1370_v23, %v1273_v54 }
 0xff8   :  { %v1394_v17 = vpop.f32.mrf.mxu0 }
 0xff9   :  { %v3718_v30 = vadd.f32 %v1394_v17, %v1273_v54 }
 0xffa   :  { %v1396_v8 = vpop.f32.mrf.mxu0 }
 0xffb   :  { %v3720_v9 = vadd.f32 %v1396_v8, %v1277_v43  ;;  %v1485_v8 = vpop.f32.mrf.mxu1 }
 0xffc   :  { %v1400_v61 = vpop.f32.mrf.mxu0 }
 0xffd   :  { %v3730_v47 = vadd.f32 %v1400_v61, %v1273_v54 }
 0xffe   :  { %v1402_v34 = vpop.f32.mrf.mxu0 }
 0xfff   :  { %v3740_v1 = vadd.f32 %v1402_v34, %v1277_v43  ;;  %v4215_v62 = vsel %vm3068_vm1, %v3730_v47, %v3710_v32 }
0x1000   :  { %v1406_v50 = vpop.f32.mrf.mxu0 }
0x1001   :  { %v3750_v39 = vadd.f32 %v1406_v50, %v1273_v54 }
0x1002   :  { %v1408_v7 = vpop.f32.mrf.mxu0 }
0x1003   :  { %v3760_v37 = vadd.f32 %v1408_v7, %v1277_v43  ;;  %v1529_v6 = vsel %vm3068_vm1, %v3706_v38, %v3750_v39  ;;  %v3782_v7 = vadd.f32 %v1372_v44, %v1277_v43  ;;  %v1487_v44 = vpop.f32.mrf.mxu1 }
0x1004   :  { %v1412_v41 = vpop.f32.mrf.mxu0 }
0x1005   :  { %v3772_v17 = vadd.f32 %v1412_v41, %v1273_v54  ;;  %v1530_v61 = vsel %vm4181_vm3, %v3708_v18, %v3760_v37  ;;  %v4219_v33 = vsel %vm4181_vm3, %v3760_v37, %v3708_v18 }
0x1006   :  { %v1414_v50 = vpop.f32.mrf.mxu0 }
0x1007   :  { %v3784_v46 = vadd.f32 %v1414_v50, %v1277_v43  ;;  %v1417_v23 = vsel %vm3068_vm1, %v3770_v52, %v3772_v17 }
0x1008   :  { %v1490_v41 = vadd.f32 %v1485_v8, %v1417_v23 }
0x1009   :  { %v1418_v34 = vsel %vm4181_vm3, %v3782_v7, %v3784_v46  ;;  %v2250_v43 = vsel %vm4181_vm3, %v3784_v46, %v3782_v7  ;;  %v76_v46 = vld [vmem:[%s4141_s2 + $0x210] sm:$0xff]  ;;  %v75_v7 = vld [vmem:[%s4141_s2 + $0x200] sm:$0xff] }
0x100a   :  { %v2552_v50 = vmul.f32 -1.442695, %v1490_v41  ;;  %v1491_v5 = vadd.f32 %v1487_v44, %v1418_v34 }
0x100c   :  { %2733 = vpow2.f32 %v2552_v50  ;;  %v2553_v36 = vmul.f32 -1.442695, %v1491_v5 }
0x100e   :  { %2735 = vpow2.f32 %v2553_v36 }
0x100f   :  { %2737 = vtanh.f32 %v1491_v5 }
0x1019   :  { %v2734_v63 = vpop.eup %2733 }
0x101a   :  { %v1498_v54 = vadd.f32 1.0, %v2734_v63 }
0x101b   :  { %v2736_v53 = vpop.eup %2735 }
0x101c   :  { %v1499_v8 = vadd.f32 1.0, %v2736_v53  ;;  %v2738_v23 = vpop.eup %2737 }
0x101e   :  { %2739 = vrcp.f32 %v1499_v8 }
0x101f   :  { %2741 = vrcp.f32 %v1498_v54 }
0x102b   :  { %v2740_v35 = vpop.eup %2739 }
0x102c   :  { %v2742_v58 = vpop.eup %2741  ;;  %v1507_v11 = vsel %vm4204_vm12, %v2738_v23, %v2740_v35 }
0x102d   :  { %v1509_v24 = vmul.f32 %v2742_v58, %v1507_v11  ;;  %v1508_v34 = vmul.f32 0.0, %v2742_v58 }
0x102f   :  { %1511 = vrot.lane.b32.xlu1 %v1509_v24, %s2831_s22 }
0x10a1   :  { %v1512_v41 = vpop.permute.xlu1 %1511 }
0x10a2   :  { %v1514_v44 = vadd.f32 %v1512_v41, %v1508_v34 }
0x10a4   :  { %2743 = vtanh.f32 %v1514_v44  ;;  %1523 = vrot.lane.b32.xlu1 %v1514_v44, %s2831_s22 }
0x10b1   :  { %v2744_v63 = vpop.eup %2743 }
0x10b2   :  { %v1516_v53 = vmul.f32 %v2744_v63, %v1507_v11 }
0x10b4   :  { %1518 = vrot.lane.b32.xlu0 %v1516_v53, %s2831_s22 }
0x1116   :  { %v1524_v36 = vpop.permute.xlu1 %1523 }
0x1117   :  { %v1526_v5 = vsel %vm3217_vm4, %v1524_v36, 0.0 }
0x1118   :  { %1624 = vrot.lane.b32.xlu0 %v1526_v5, %s2831_s22 }
0x1126   :  { %v1519_v35 = vpop.permute.xlu0 %1518 }
0x1127   :  { %v1521_v24 = vsel %vm3217_vm4, %v1519_v35, 0.0  ;;  %vm4205_vm4 = vmmov %vm4192_vm0 }
0x1128   :  { %1527 = vst.msk [vmem:[#allocation3] sm:$0xff] %vm3213_vm2, %v1521_v24  ;;  %2554 = vmatmul.mubr.msk.f32.vlgmr.msra.gmra.mxu1 %vm311_vm10, %v1521_v24 }
0x1129   :  { %1528 = vst.msk [vmem:[#allocation3 + $0x38] sm:$0xff] %vm3222_vm11, %v1521_v24  ;;  %1791 = vmatpush1.msra.mxu1 %v3554_v10  ;;  %1838 = vmatprep.mubr.f32.mxu1 %v2829_v3 }
0x112a   :  { %1792 = vmatprep.subr.mxu1 %v3561_v13 }
0x112b   :  { %1793 = vmatpush1.msra.mxu1 %v3567_v14 }
0x112c   :  { %1794 = vmatprep.subr.mxu1 %v3572_v15 }
0x112d   :  { %1795 = vmatpush1.msra.mxu1 %v3578_v16 }
0x112e   :  { %1796 = vmatprep.subr.mxu1 %v3585_v19 }
0x112f   :  { %1797 = vmatpush1.msra.mxu1 %v3591_v20 }
0x1130   :  { %1798 = vmatprep.subr.mxu1 %v3596_v21 }
0x1131   :  { %1799 = vmatpush1.msra.mxu1 %v3602_v22 }
0x1132   :  { %1800 = vmatprep.subr.mxu1 %v3609_v25 }
0x1133   :  { %1801 = vmatpush1.msra.mxu1 %v3615_v26 }
0x1134   :  { %1802 = vmatprep.subr.mxu1 %v3620_v27 }
0x1135   :  { %1803 = vmatpush1.msra.mxu1 %v3626_v28 }
0x1136   :  { %1804 = vmatprep.subr.mxu1 %v3633_v48 }
0x1137   :  { %1805 = vmatpush1.msra.mxu1 %v3639_v55 }
0x1138   :  { %2030 = vmatprep.subr.mxu1 %v3548_v2 }
0x11e8   :  { %v1600_v42 = vpop.f32.mrf.mxu1 }
0x11e9   :  { %v1605_v58 = vadd.f32 %v1600_v42, %v1529_v6 }
0x11ea   :  { %v1602_v11 = vpop.f32.mrf.mxu1 }
0x11eb   :  { %v2555_v54 = vmul.f32 -1.442695, %v1605_v58  ;;  %v1606_v50 = vadd.f32 %v1602_v11, %v1530_v61  ;;  %v1625_v61 = vpop.permute.xlu0 %1624 }
0x11ed   :  { %2745 = vpow2.f32 %v2555_v54  ;;  %v2556_v8 = vmul.f32 -1.442695, %v1606_v50 }
0x11ef   :  { %2747 = vpow2.f32 %v2556_v8 }
0x11f0   :  { %2749 = vtanh.f32 %v1606_v50 }
0x11fa   :  { %v2746_v23 = vpop.eup %2745 }
0x11fb   :  { %v1613_v41 = vadd.f32 1.0, %v2746_v23 }
0x11fc   :  { %v2748_v34 = vpop.eup %2747 }
0x11fd   :  { %v1614_v44 = vadd.f32 1.0, %v2748_v34  ;;  %v2750_v63 = vpop.eup %2749 }
0x11ff   :  { %2751 = vrcp.f32 %v1614_v44 }
0x1200   :  { %2753 = vrcp.f32 %v1613_v41 }
0x120c   :  { %v2752_v6 = vpop.eup %2751 }
0x120d   :  { %v2754_v53 = vpop.eup %2753  ;;  %v1622_v36 = vsel %vm4205_vm4, %v2750_v63, %v2752_v6 }
0x120e   :  { %v1628_v35 = vmul.f32 %v2754_v53, %v1622_v36  ;;  %v1627_v42 = vmul.f32 %v2754_v53, %v1625_v61  ;;  %v4207_v53 = vsel %vm4181_vm3, %v3712_v0, %v3740_v1 }
0x1210   :  { %1630 = vrot.lane.b32.xlu1 %v1628_v35, %s2831_s22 }
0x1282   :  { %v1631_v58 = vpop.permute.xlu1 %1630 }
0x1283   :  { %v1633_v11 = vadd.f32 %v1631_v58, %v1627_v42 }
0x1285   :  { %2755 = vtanh.f32 %v1633_v11  ;;  %1642 = vrot.lane.b32.xlu1 %v1633_v11, %s2831_s22 }
0x1292   :  { %v2756_v54 = vpop.eup %2755 }
0x1293   :  { %v1635_v50 = vmul.f32 %v2756_v54, %v1622_v36 }
0x1295   :  { %1637 = vrot.lane.b32.xlu0 %v1635_v50, %s2831_s22 }
0x12f7   :  { %v1643_v8 = vpop.permute.xlu1 %1642 }
0x12f8   :  { %v1645_v23 = vsel %vm4183_vm6, %v1643_v8, %v1526_v5  ;;  %v4206_v5 = vsel %vm3068_vm1, %v3710_v32, %v3730_v47 }
0x12f9   :  { %1744 = vrot.lane.b32.xlu0 %v1645_v23, %s2831_s22 }
0x1307   :  { %v1638_v34 = vpop.permute.xlu0 %1637 }
0x1308   :  { %v1640_v41 = vsel %vm4183_vm6, %v1638_v34, %v1521_v24  ;;  %v1646_v44 = vsel %vm4183_vm6, %v1638_v34, 0.0  ;;  %vm4208_vm6 = vmmov %vm4192_vm0 }
0x1309   :  { %1647 = vst.msk [vmem:[#allocation3 + $0x8] sm:$0xff] %vm3213_vm2, %v1646_v44  ;;  %2557 = vmatmul.mubr.msk.f32.vlgmr.msra.gmra.mxu0 %vm311_vm10, %v1640_v41 }
0x130a   :  { %1648 = vst.msk [vmem:[#allocation3 + $0x30] sm:$0xff] %vm3222_vm11, %v1646_v44  ;;  %1911 = vmatpush1.msra.mxu0 %v3554_v10  ;;  %1958 = vmatprep.mubr.f32.mxu0 %v2829_v3 }
0x130b   :  { %1912 = vmatprep.subr.mxu0 %v3561_v13 }
0x130c   :  { %1913 = vmatpush1.msra.mxu0 %v3567_v14 }
0x130d   :  { %1914 = vmatprep.subr.mxu0 %v3572_v15 }
0x130e   :  { %1915 = vmatpush1.msra.mxu0 %v3578_v16 }
0x130f   :  { %1916 = vmatprep.subr.mxu0 %v3585_v19 }
0x1310   :  { %1917 = vmatpush1.msra.mxu0 %v3591_v20 }
0x1311   :  { %1918 = vmatprep.subr.mxu0 %v3596_v21 }
0x1312   :  { %1919 = vmatpush1.msra.mxu0 %v3602_v22 }
0x1313   :  { %1920 = vmatprep.subr.mxu0 %v3609_v25 }
0x1314   :  { %1921 = vmatpush1.msra.mxu0 %v3615_v26 }
0x1315   :  { %1922 = vmatprep.subr.mxu0 %v3620_v27 }
0x1316   :  { %1923 = vmatpush1.msra.mxu0 %v3626_v28 }
0x1317   :  { %1924 = vmatprep.subr.mxu0 %v3633_v48 }
0x1318   :  { %1925 = vmatpush1.msra.mxu0 %v3639_v55 }
0x1319   :  { %2150 = vmatprep.subr.mxu0 %v3548_v2 }
0x13c9   :  { %v1720_v60 = vpop.f32.mrf.mxu0 }
0x13ca   :  { %v1725_v24 = vadd.f32 %v1720_v60, %v4206_v5  ;;  %v1745_v60 = vpop.permute.xlu0 %1744 }
0x13cb   :  { %v1722_v63 = vpop.f32.mrf.mxu0 }
0x13cc   :  { %v2558_v6 = vmul.f32 -1.442695, %v1725_v24  ;;  %v1726_v36 = vadd.f32 %v1722_v63, %v4207_v53 }
0x13ce   :  { %2757 = vpow2.f32 %v2558_v6  ;;  %v2559_v35 = vmul.f32 -1.442695, %v1726_v36 }
0x13d0   :  { %2759 = vpow2.f32 %v2559_v35 }
0x13d1   :  { %2761 = vtanh.f32 %v1726_v36 }
0x13db   :  { %v2758_v61 = vpop.eup %2757 }
0x13dc   :  { %v1733_v58 = vadd.f32 1.0, %v2758_v61 }
0x13dd   :  { %v2760_v42 = vpop.eup %2759 }
0x13de   :  { %v1734_v11 = vadd.f32 1.0, %v2760_v42  ;;  %v2762_v54 = vpop.eup %2761 }
0x13e0   :  { %2763 = vrcp.f32 %v1734_v11 }
0x13e1   :  { %2765 = vrcp.f32 %v1733_v58 }
0x13ed   :  { %v2764_v50 = vpop.eup %2763 }
0x13ee   :  { %v2766_v8 = vpop.eup %2765  ;;  %v1742_v34 = vsel %vm4208_vm6, %v2762_v54, %v2764_v50  ;;  %v4210_v50 = vsel %vm4181_vm3, %v3716_v59, %v3720_v9 }
0x13ef   :  { %v1748_v44 = vmul.f32 %v2766_v8, %v1742_v34  ;;  %v1747_v5 = vmul.f32 %v2766_v8, %v1745_v60 }
0x13f1   :  { %1750 = vrot.lane.b32.xlu1 %v1748_v44, %s2831_s22 }
0x1463   :  { %v1751_v24 = vpop.permute.xlu1 %1750 }
0x1464   :  { %v1753_v63 = vadd.f32 %v1751_v24, %v1747_v5 }
0x1466   :  { %2767 = vtanh.f32 %v1753_v63  ;;  %1762 = vrot.lane.b32.xlu1 %v1753_v63, %s2831_s22 }
0x1473   :  { %v2768_v6 = vpop.eup %2767 }
0x1474   :  { %v1755_v53 = vmul.f32 %v2768_v6, %v1742_v34 }
0x1476   :  { %1757 = vrot.lane.b32.xlu0 %v1755_v53, %s2831_s22 }
0x14d8   :  { %v1763_v36 = vpop.permute.xlu1 %1762 }
0x14d9   :  { %v1765_v35 = vsel %vm3182_vm14, %v1763_v36, %v1645_v23  ;;  %v4209_v23 = vsel %vm3068_vm1, %v3714_v49, %v3718_v30 }
0x14da   :  { %1864 = vrot.lane.b32.xlu0 %v1765_v35, %s2831_s22 }
0x14e8   :  { %v1758_v61 = vpop.permute.xlu0 %1757 }
0x14e9   :  { %v1760_v42 = vsel %vm3182_vm14, %v1758_v61, %v1640_v41  ;;  %v1766_v58 = vsel %vm3182_vm14, %v1758_v61, 0.0  ;;  %vm4211_vm14 = vmmov %vm4192_vm0 }
0x14ea   :  { %1767 = vst.msk [vmem:[#allocation3 + $0x10] sm:$0xff] %vm3213_vm2, %v1766_v58  ;;  %2560 = vmatmul.mubr.msk.f32.vlgmr.msra.gmra.mxu1 %vm311_vm10, %v1760_v42 }
0x14eb   :  { %1768 = vst.msk [vmem:[#allocation3 + $0x28] sm:$0xff] %vm3222_vm11, %v1766_v58  ;;  %2031 = vmatpush1.msra.mxu1 %v3554_v10  ;;  %2078 = vmatprep.mubr.f32.mxu1 %v2829_v3 }
0x14ec   :  { %2032 = vmatprep.subr.mxu1 %v3561_v13 }
0x14ed   :  { %2033 = vmatpush1.msra.mxu1 %v3567_v14 }
0x14ee   :  { %2034 = vmatprep.subr.mxu1 %v3572_v15 }
0x14ef   :  { %2035 = vmatpush1.msra.mxu1 %v3578_v16 }
0x14f0   :  { %2036 = vmatprep.subr.mxu1 %v3585_v19 }
0x14f1   :  { %2037 = vmatpush1.msra.mxu1 %v3591_v20 }
0x14f2   :  { %2038 = vmatprep.subr.mxu1 %v3596_v21 }
0x14f3   :  { %2039 = vmatpush1.msra.mxu1 %v3602_v22 }
0x14f4   :  { %2040 = vmatprep.subr.mxu1 %v3609_v25 }
0x14f5   :  { %2041 = vmatpush1.msra.mxu1 %v3615_v26 }
0x14f6   :  { %2042 = vmatprep.subr.mxu1 %v3620_v27 }
0x14f7   :  { %2043 = vmatpush1.msra.mxu1 %v3626_v28 }
0x14f8   :  { %2044 = vmatprep.subr.mxu1 %v3633_v48 }
0x14f9   :  { %2045 = vmatpush1.msra.mxu1 %v3639_v55 }
0x14fa   :  { %2270 = vmatprep.subr.mxu1 %v3548_v2 }
0x154c   :  { %v1865_v61 = vpop.permute.xlu0 %1864 }
0x15aa   :  { %v1840_v12 = vpop.f32.mrf.mxu1 }
0x15ab   :  { %v1845_v41 = vadd.f32 %v1840_v12, %v4209_v23 }
0x15ac   :  { %v1842_v11 = vpop.f32.mrf.mxu1 }
0x15ad   :  { %v2561_v54 = vmul.f32 -1.442695, %v1845_v41  ;;  %v1846_v8 = vadd.f32 %v1842_v11, %v4210_v50 }
0x15af   :  { %2769 = vpow2.f32 %v2561_v54  ;;  %v2562_v34 = vmul.f32 -1.442695, %v1846_v8 }
0x15b1   :  { %2771 = vpow2.f32 %v2562_v34 }
0x15b2   :  { %2773 = vtanh.f32 %v1846_v8 }
0x15bc   :  { %v2770_v44 = vpop.eup %2769 }
0x15bd   :  { %v1853_v60 = vadd.f32 1.0, %v2770_v44 }
0x15be   :  { %v2772_v2 = vpop.eup %2771 }
0x15bf   :  { %v1854_v5 = vadd.f32 1.0, %v2772_v2  ;;  %v2774_v24 = vpop.eup %2773 }
0x15c1   :  { %2775 = vrcp.f32 %v1854_v5  ;;  %v4213_v5 = vsel %vm4181_vm3, %v3720_v9, %v3716_v59 }
0x15c2   :  { %2777 = vrcp.f32 %v1853_v60 }
0x15ce   :  { %v2776_v63 = vpop.eup %2775 }
0x15cf   :  { %v2778_v6 = vpop.eup %2777  ;;  %v1862_v53 = vsel %vm4211_vm14, %v2774_v24, %v2776_v63 }
0x15d0   :  { %v1868_v36 = vmul.f32 %v2778_v6, %v1862_v53  ;;  %v1867_v58 = vmul.f32 %v2778_v6, %v1865_v61 }
0x15d2   :  { %1870 = vrot.lane.b32.xlu1 %v1868_v36, %s2831_s22 }
0x1644   :  { %v1871_v12 = vpop.permute.xlu1 %1870 }
0x1645   :  { %v1873_v23 = vadd.f32 %v1871_v12, %v1867_v58 }
0x1647   :  { %2779 = vtanh.f32 %v1873_v23  ;;  %1882 = vrot.lane.b32.xlu1 %v1873_v23, %s2831_s22 }
0x1654   :  { %v2780_v41 = vpop.eup %2779 }
0x1655   :  { %v1875_v11 = vmul.f32 %v2780_v41, %v1862_v53 }
0x1657   :  { %1877 = vrot.lane.b32.xlu0 %v1875_v11, %s2831_s22 }
0x16b9   :  { %v1883_v54 = vpop.permute.xlu1 %1882 }
0x16ba   :  { %v1885_v50 = vsel %vm4189_vm15, %v1883_v54, %v1765_v35  ;;  %v4212_v35 = vsel %vm3068_vm1, %v3718_v30, %v3714_v49 }
0x16bb   :  { %1984 = vrot.lane.b32.xlu0 %v1885_v50, %s2831_s22 }
0x16c9   :  { %v1878_v8 = vpop.permute.xlu0 %1877 }
0x16ca   :  { %v1880_v34 = vsel %vm4189_vm15, %v1878_v8, %v1760_v42  ;;  %v1886_v44 = vsel %vm4189_vm15, %v1878_v8, 0.0  ;;  %vm4214_vm15 = vmmov %vm4192_vm0 }
0x16cb   :  { %1887 = vst.msk [vmem:[#allocation3 + $0x18] sm:$0xff] %vm3213_vm2, %v1886_v44  ;;  %2563 = vmatmul.mubr.msk.f32.vlgmr.msra.gmra.mxu0 %vm311_vm10, %v1880_v34 }
0x16cc   :  { %1888 = vst.msk [vmem:[#allocation3 + $0x20] sm:$0xff] %vm3222_vm11, %v1886_v44  ;;  %2151 = vmatpush1.msra.mxu0 %v3554_v10  ;;  %2198 = vmatprep.mubr.f32.mxu0 %v2829_v3 }
0x16cd   :  { %2152 = vmatprep.subr.mxu0 %v3561_v13 }
0x16ce   :  { %2153 = vmatpush1.msra.mxu0 %v3567_v14 }
0x16cf   :  { %2154 = vmatprep.subr.mxu0 %v3572_v15 }
0x16d0   :  { %2155 = vmatpush1.msra.mxu0 %v3578_v16 }
0x16d1   :  { %2156 = vmatprep.subr.mxu0 %v3585_v19 }
0x16d2   :  { %2157 = vmatpush1.msra.mxu0 %v3591_v20 }
0x16d3   :  { %2158 = vmatprep.subr.mxu0 %v3596_v21 }
0x16d4   :  { %2159 = vmatpush1.msra.mxu0 %v3602_v22 }
0x16d5   :  { %2160 = vmatprep.subr.mxu0 %v3609_v25 }
0x16d6   :  { %2161 = vmatpush1.msra.mxu0 %v3615_v26 }
0x16d7   :  { %2162 = vmatprep.subr.mxu0 %v3620_v27 }
0x16d8   :  { %2163 = vmatpush1.msra.mxu0 %v3626_v28 }
0x16d9   :  { %2164 = vmatprep.subr.mxu0 %v3633_v48 }
0x16da   :  { %2165 = vmatpush1.msra.mxu0 %v3639_v55 }
0x16db   :  { %2599 = vmatprep.subr.mxu0 %v76_v46 }
0x172d   :  { %v1985_v59 = vpop.permute.xlu0 %1984 }
0x178b   :  { %v1960_v56 = vpop.f32.mrf.mxu0 }
0x178c   :  { %v1965_v42 = vadd.f32 %v1960_v56, %v4212_v35 }
0x178d   :  { %v1962_v2 = vpop.f32.mrf.mxu0 }
0x178e   :  { %v2564_v60 = vmul.f32 -1.442695, %v1965_v42  ;;  %v1966_v24 = vadd.f32 %v1962_v2, %v4213_v5 }
0x1790   :  { %2781 = vpow2.f32 %v2564_v60  ;;  %v2565_v63 = vmul.f32 -1.442695, %v1966_v24 }
0x1792   :  { %2783 = vpow2.f32 %v2565_v63 }
0x1793   :  { %2785 = vtanh.f32 %v1966_v24 }
0x179d   :  { %v2782_v6 = vpop.eup %2781 }
0x179e   :  { %v1973_v36 = vadd.f32 1.0, %v2782_v6 }
0x179f   :  { %v2784_v53 = vpop.eup %2783 }
0x17a0   :  { %v1974_v61 = vadd.f32 1.0, %v2784_v53  ;;  %v2786_v49 = vpop.eup %2785 }
0x17a2   :  { %2787 = vrcp.f32 %v1974_v61 }
0x17a3   :  { %2789 = vrcp.f32 %v1973_v36  ;;  %v4218_v36 = vsel %vm3068_vm1, %v3750_v39, %v3706_v38 }
0x17af   :  { %v2788_v30 = vpop.eup %2787 }
0x17b0   :  { %v2790_v58 = vpop.eup %2789  ;;  %v1982_v12 = vsel %vm4214_vm15, %v2786_v49, %v2788_v30 }
0x17b1   :  { %v1988_v23 = vmul.f32 %v2790_v58, %v1982_v12  ;;  %v1987_v9 = vmul.f32 %v2790_v58, %v1985_v59 }
0x17b3   :  { %1990 = vrot.lane.b32.xlu1 %v1988_v23, %s2831_s22 }
0x1825   :  { %v1991_v41 = vpop.permute.xlu1 %1990 }
0x1826   :  { %v1993_v11 = vadd.f32 %v1991_v41, %v1987_v9 }
0x1828   :  { %2791 = vtanh.f32 %v1993_v11  ;;  %2002 = vrot.lane.b32.xlu1 %v1993_v11, %s2831_s22 }
0x1835   :  { %v2792_v54 = vpop.eup %2791 }
0x1836   :  { %v1995_v8 = vmul.f32 %v2792_v54, %v1982_v12 }
0x1838   :  { %1997 = vrot.lane.b32.xlu0 %v1995_v8, %s2831_s22 }
0x189a   :  { %v2003_v44 = vpop.permute.xlu1 %2002 }
0x189b   :  { %v2005_v56 = vsel %vm4193_vm5, %v2003_v44, %v1885_v50 }
0x189c   :  { %2104 = vrot.lane.b32.xlu0 %v2005_v56, %s2831_s22 }
0x18aa   :  { %v1998_v35 = vpop.permute.xlu0 %1997 }
0x18ab   :  { %v2000_v42 = vsel %vm4193_vm5, %v1998_v35, %v1880_v34  ;;  %v2006_v2 = vsel %vm4193_vm5, %v1998_v35, 0.0  ;;  %vm4217_vm5 = vmmov %vm4192_vm0 }
0x18ac   :  { %2007 = vst.msk [vmem:[#allocation3 + $0x20] sm:$0xff] %vm3213_vm2, %v2006_v2  ;;  %2566 = vmatmul.mubr.msk.f32.vlgmr.msra.gmra.mxu1 %vm311_vm10, %v2000_v42 }
0x18ad   :  { %2008 = vst.msk [vmem:[#allocation3 + $0x18] sm:$0xff] %vm3222_vm11, %v2006_v2  ;;  %2271 = vmatpush1.msra.mxu1 %v3554_v10  ;;  %2318 = vmatprep.mubr.f32.mxu1 %v2829_v3 }
0x18ae   :  { %2272 = vmatprep.subr.mxu1 %v3561_v13 }
0x18af   :  { %2273 = vmatpush1.msra.mxu1 %v3567_v14 }
0x18b0   :  { %2274 = vmatprep.subr.mxu1 %v3572_v15  ;;  %v4216_v15 = vsel %vm4181_vm3, %v3740_v1, %v3712_v0 }
0x18b1   :  { %2275 = vmatpush1.msra.mxu1 %v3578_v16 }
0x18b2   :  { %2276 = vmatprep.subr.mxu1 %v3585_v19 }
0x18b3   :  { %2277 = vmatpush1.msra.mxu1 %v3591_v20  ;;  %v2367_v29 = vld [vmem:[#allocation3 + $0x20] sm:$0xff] }
0x18b4   :  { %2278 = vmatprep.subr.mxu1 %v3596_v21 }
0x18b5   :  { %2279 = vmatpush1.msra.mxu1 %v3602_v22 }
0x18b6   :  { %2280 = vmatprep.subr.mxu1 %v3609_v25 }
0x18b7   :  { %2281 = vmatpush1.msra.mxu1 %v3615_v26 }
0x18b8   :  { %2282 = vmatprep.subr.mxu1 %v3620_v27 }
0x18b9   :  { %2283 = vmatpush1.msra.mxu1 %v3626_v28 }
0x18ba   :  { %2284 = vmatprep.subr.mxu1 %v3633_v48 }
0x18bb   :  { %2285 = vmatpush1.msra.mxu1 %v3639_v55 }
0x190e   :  { %v2105_v32 = vpop.permute.xlu0 %2104 }
0x196c   :  { %v2080_v3 = vpop.f32.mrf.mxu1 }
0x196d   :  { %v2085_v10 = vadd.f32 %v2080_v3, %v4215_v62 }
0x196e   :  { %v2082_v13 = vpop.f32.mrf.mxu1 }
0x196f   :  { %v2567_v14 = vmul.f32 -1.442695, %v2085_v10  ;;  %v2086_v16 = vadd.f32 %v2082_v13, %v4216_v15  ;;  %v4221_v15 = vsel %vm3068_vm1, %v3772_v17, %v3770_v52  ;;  %vm4222_vm1 = vmmov %vm4192_vm0 }
0x1971   :  { %2793 = vpow2.f32 %v2567_v14  ;;  %v2568_v19 = vmul.f32 -1.442695, %v2086_v16 }
0x1973   :  { %2795 = vpow2.f32 %v2568_v19 }
0x1974   :  { %2797 = vtanh.f32 %v2086_v16 }
0x197e   :  { %v2794_v20 = vpop.eup %2793 }
0x197f   :  { %v2093_v22 = vadd.f32 1.0, %v2794_v20 }
0x1980   :  { %v2796_v21 = vpop.eup %2795 }
0x1981   :  { %v2094_v25 = vadd.f32 1.0, %v2796_v21  ;;  %v2798_v26 = vpop.eup %2797 }
0x1983   :  { %2799 = vrcp.f32 %v2094_v25 }
0x1984   :  { %2801 = vrcp.f32 %v2093_v22 }
0x1990   :  { %v2800_v27 = vpop.eup %2799 }
0x1991   :  { %v2802_v28 = vpop.eup %2801  ;;  %v2102_v48 = vsel %vm4217_vm5, %v2798_v26, %v2800_v27 }
0x1992   :  { %v2108_v55 = vmul.f32 %v2802_v28, %v2102_v48  ;;  %v2107_v0 = vmul.f32 %v2802_v28, %v2105_v32 }
0x1994   :  { %2110 = vrot.lane.b32.xlu1 %v2108_v55, %s2831_s22 }
0x1a06   :  { %v2111_v47 = vpop.permute.xlu1 %2110 }
0x1a07   :  { %v2113_v1 = vadd.f32 %v2111_v47, %v2107_v0  ;;  %v73_v0 = vld [vmem:[%s4141_s2 + $0x1e0] sm:$0xff]  ;;  %v72_v47 = vld [vmem:[%s4141_s2 + $0x1d0] sm:$0xff] }
0x1a09   :  { %2803 = vtanh.f32 %v2113_v1  ;;  %2122 = vrot.lane.b32.xlu1 %v2113_v1, %s2831_s22  ;;  %v71_v1 = vld [vmem:[%s4141_s2 + $0x1c0] sm:$0xff] }
0x1a16   :  { %v2804_v50 = vpop.eup %2803 }
0x1a17   :  { %v2115_v34 = vmul.f32 %v2804_v50, %v2102_v48  ;;  %v70_v50 = vld [vmem:[%s4141_s2 + $0x1b0] sm:$0xff] }
0x1a19   :  { %2117 = vrot.lane.b32.xlu0 %v2115_v34, %s2831_s22  ;;  %v69_v34 = vld [vmem:[%s4141_s2 + $0x1a0] sm:$0xff] }
0x1a7b   :  { %v2123_v60 = vpop.permute.xlu1 %2122 }
0x1a7c   :  { %v2125_v5 = vsel %vm3195_vm7, %v2123_v60, %v2005_v56 }
0x1a7d   :  { %2224 = vrot.lane.b32.xlu0 %v2125_v5, %s2831_s22 }
0x1a8b   :  { %v2118_v24 = vpop.permute.xlu0 %2117 }
0x1a8c   :  { %v2120_v63 = vsel %vm3195_vm7, %v2118_v24, %v2000_v42  ;;  %v2126_v6 = vsel %vm3195_vm7, %v2118_v24, 0.0  ;;  %vm4220_vm7 = vmmov %vm4192_vm0 }
0x1a8d   :  { %2127 = vst.msk [vmem:[#allocation3 + $0x28] sm:$0xff] %vm3213_vm2, %v2126_v6  ;;  %2569 = vmatmul.mubr.msk.f32.vlgmr.msra.gmra.mxu0 %vm311_vm10, %v2120_v63 }
0x1a8e   :  { %2128 = vst.msk [vmem:[#allocation3 + $0x10] sm:$0xff] %vm3222_vm11, %v2126_v6  ;;  %2600 = vmatpush3.msra.mxu0 %v76_v46 }
0x1a8f   :  { %2601 = vmatprep.subr.mxu0 %v75_v7 }
0x1a90   :  { %2602 = vmatpush3.msra.mxu0 %v75_v7 }
0x1a94   :  { %v2368_v45 = vld [vmem:[#allocation3 + $0x28] sm:$0xff] }
0x1aef   :  { %v2225_v18 = vpop.permute.xlu0 %2224 }
0x1b4d   :  { %v2200_v53 = vpop.f32.mrf.mxu0 }
0x1b4e   :  { %v2205_v61 = vadd.f32 %v2200_v53, %v4218_v36  ;;  %v2365_v36 = vld [vmem:[#allocation3 + $0x10] sm:$0xff] }
0x1b4f   :  { %v2202_v49 = vpop.f32.mrf.mxu0 }
0x1b50   :  { %v2570_v30 = vmul.f32 -1.442695, %v2205_v61  ;;  %v2206_v58 = vadd.f32 %v2202_v49, %v4219_v33  ;;  %v2366_v61 = vld [vmem:[#allocation3 + $0x18] sm:$0xff] }
0x1b52   :  { %2805 = vpow2.f32 %v2570_v30  ;;  %v2571_v12 = vmul.f32 -1.442695, %v2206_v58  ;;  %v80_v30 = vld [vmem:[%s4143_s3 + $0x2] ss:$0 sm:$0xff] }
0x1b54   :  { %2807 = vpow2.f32 %v2571_v12 }
0x1b55   :  { %2809 = vtanh.f32 %v2206_v58 }
0x1b5f   :  { %v2806_v23 = vpop.eup %2805 }
0x1b60   :  { %v2213_v9 = vadd.f32 1.0, %v2806_v23 }
0x1b61   :  { %v2808_v59 = vpop.eup %2807 }
0x1b62   :  { %v2214_v41 = vadd.f32 1.0, %v2808_v59  ;;  %v2810_v38 = vpop.eup %2809 }
0x1b64   :  { %2811 = vrcp.f32 %v2214_v41 }
0x1b65   :  { %2813 = vrcp.f32 %v2213_v9 }
0x1b71   :  { %v2812_v39 = vpop.eup %2811 }
0x1b72   :  { %v2814_v11 = vpop.eup %2813  ;;  %v2222_v54 = vsel %vm4220_vm7, %v2810_v38, %v2812_v39 }
0x1b73   :  { %v2228_v8 = vmul.f32 %v2814_v11, %v2222_v54  ;;  %v2227_v37 = vmul.f32 %v2814_v11, %v2225_v18 }
0x1b75   :  { %2230 = vrot.lane.b32.xlu1 %v2228_v8, %s2831_s22 }
0x1be7   :  { %v2231_v44 = vpop.permute.xlu1 %2230 }
0x1be8   :  { %v2233_v56 = vadd.f32 %v2231_v44, %v2227_v37 }
0x1bea   :  { %2815 = vtanh.f32 %v2233_v56  ;;  %2242 = vrot.lane.b32.xlu1 %v2233_v56, %s2831_s22 }
0x1bf7   :  { %v2816_v35 = vpop.eup %2815 }
0x1bf8   :  { %v2235_v42 = vmul.f32 %v2816_v35, %v2222_v54 }
0x1bfa   :  { %2237 = vrot.lane.b32.xlu0 %v2235_v42, %s2831_s22 }
0x1c5c   :  { %v2243_v2 = vpop.permute.xlu1 %2242 }
0x1c5d   :  { %v2245_v3 = vsel %vm3199_vm8, %v2243_v2, %v2125_v5 }
0x1c5e   :  { %2344 = vrot.lane.b32.xlu0 %v2245_v3, %s2831_s22 }
0x1c6c   :  { %v2238_v62 = vpop.permute.xlu0 %2237 }
0x1c6d   :  { %v2240_v10 = vsel %vm3199_vm8, %v2238_v62, %v2120_v63  ;;  %v2246_v13 = vsel %vm3199_vm8, %v2238_v62, 0.0 }
0x1c6e   :  { %2247 = vst.msk [vmem:[#allocation3 + $0x30] sm:$0xff] %vm3213_vm2, %v2246_v13  ;;  %2572 = vmatmul.mubr.msk.f32.vlgmr.msra.gmra.mxu1 %vm311_vm10, %v2240_v10 }
0x1c6f   :  { %2248 = vst.msk [vmem:[#allocation3 + $0x8] sm:$0xff] %vm3222_vm11, %v2246_v13 }
0x1c75   :  { %v2369_v31 = vld [vmem:[#allocation3 + $0x30] sm:$0xff] }
0x1c76   :  { %v2364_v53 = vld [vmem:[#allocation3 + $0x8] sm:$0xff] }
0x1cd0   :  { %v2345_v40 = vpop.permute.xlu0 %2344 }
0x1d2e   :  { %v2320_v14 = vpop.f32.mrf.mxu1 }
0x1d2f   :  { %v2325_v16 = vadd.f32 %v2320_v14, %v4221_v15 }
0x1d30   :  { %v2322_v19 = vpop.f32.mrf.mxu1 }
0x1d31   :  { %v2573_v20 = vmul.f32 -1.442695, %v2325_v16  ;;  %v2326_v4 = vadd.f32 %v2322_v19, %v2250_v43  ;;  %v74_v43 = vld [vmem:[%s4141_s2 + $0x1f0] sm:$0xff] }
0x1d32   :  { %2603 = vmatprep.subr.mxu0 %v74_v43 }
0x1d33   :  { %2817 = vpow2.f32 %v2573_v20  ;;  %v2574_v21 = vmul.f32 -1.442695, %v2326_v4  ;;  %2604 = vmatpush3.msra.mxu0 %v74_v43 }
0x1d34   :  { %2605 = vmatprep.subr.mxu0 %v73_v0 }
0x1d35   :  { %2819 = vpow2.f32 %v2574_v21  ;;  %2606 = vmatpush3.msra.mxu0 %v73_v0 }
0x1d36   :  { %2821 = vtanh.f32 %v2326_v4  ;;  %2607 = vmatprep.subr.mxu0 %v72_v47 }
0x1d37   :  { %2608 = vmatpush3.msra.mxu0 %v72_v47 }
0x1d38   :  { %2609 = vmatprep.subr.mxu0 %v71_v1 }
0x1d39   :  { %2610 = vmatpush3.msra.mxu0 %v71_v1 }
0x1d3a   :  { %2611 = vmatprep.subr.mxu0 %v70_v50 }
0x1d3b   :  { %2612 = vmatpush3.msra.mxu0 %v70_v50 }
0x1d3c   :  { %2613 = vmatprep.subr.mxu0 %v69_v34 }
0x1d3d   :  { %2614 = vmatpush3.msra.mxu0 %v69_v34 }
0x1d40   :  { %v2818_v22 = vpop.eup %2817 }
0x1d41   :  { %v2333_v26 = vadd.f32 1.0, %v2818_v22 }
0x1d42   :  { %v2820_v25 = vpop.eup %2819 }
0x1d43   :  { %v2334_v27 = vadd.f32 1.0, %v2820_v25  ;;  %v2822_v51 = vpop.eup %2821 }
0x1d45   :  { %2823 = vrcp.f32 %v2334_v27 }
0x1d46   :  { %2825 = vrcp.f32 %v2333_v26 }
0x1d52   :  { %v2824_v52 = vpop.eup %2823 }
0x1d53   :  { %v2826_v17 = vpop.eup %2825  ;;  %v2342_v57 = vsel %vm4222_vm1, %v2822_v51, %v2824_v52 }
0x1d54   :  { %v2348_v28 = vmul.f32 %v2826_v17, %v2342_v57  ;;  %v2347_v48 = vmul.f32 %v2826_v17, %v2345_v40 }
0x1d56   :  { %2350 = vrot.lane.b32.xlu1 %v2348_v28, %s2831_s22 }
0x1dc8   :  { %v2351_v55 = vpop.permute.xlu1 %2350 }
0x1dc9   :  { %v2353_v32 = vadd.f32 %v2351_v55, %v2347_v48 }
0x1dcb   :  { %2827 = vtanh.f32 %v2353_v32 }
0x1dd8   :  { %v2828_v60 = vpop.eup %2827 }
0x1dd9   :  { %v2355_v5 = vmul.f32 %v2828_v60, %v2342_v57 }
0x1ddb   :  { %2357 = vrot.lane.b32.xlu0 %v2355_v5, %s2831_s22 }
0x1e4d   :  { %v2358_v24 = vpop.permute.xlu0 %2357 }
0x1e4e   :  { %v2360_v63 = vsel %vm3204_vm9, %v2358_v24, 0.0 }
0x1e4f   :  { %2361 = vst.msk [vmem:[#allocation3 + $0x38] sm:$0xff] %vm3213_vm2, %v2360_v63 }
0x1e50   :  { %2362 = vst.msk [vmem:[#allocation3] sm:$0xff] %vm3222_vm11, %v2360_v63 }
0x1e56   :  { %v2370_v49 = vld [vmem:[#allocation3 + $0x38] sm:$0xff] }
0x1e57   :  { %v2363_v6 = vld [vmem:[#allocation3] sm:$0xff] }
0x1e58   :  { %2615 = vmatprep.mubr.msk.f32.mxu0 %vm311_vm10, %v2363_v6 }
0x1e59   :  { %2616 = vmatmul.mubr.msk.f32.vlgmr.msra.gmra.mxu0 %vm311_vm10, %v2364_v53 }
0x1e5a   :  { %2618 = vmatprep.mubr.msk.f32.mxu0 %vm311_vm10, %v2365_v36 }
0x1e5d   :  { %2619 = vmatmul.mubr.msk.f32.gmra.mxu0 %vm311_vm10, %v2366_v61 }
0x1e5e   :  { %2621 = vmatprep.mubr.msk.f32.mxu0 %vm311_vm10, %v2367_v29 }
0x1e61   :  { %2622 = vmatmul.mubr.msk.f32.gmra.mxu0 %vm311_vm10, %v2368_v45 }
0x1e62   :  { %2624 = vmatprep.mubr.msk.f32.mxu0 %vm311_vm10, %v2369_v31 }
0x1e65   :  { %2625 = vmatmul.mubr.msk.f32.gmra.mxu0 %vm311_vm10, %v2370_v49 }
0x1f19   :  { %v2617_v33 = vpop.f32.mrf.mxu0 }
0x1f1a   :  { %v2467_v58 = vadd.f32 %v2617_v33, %v80_v30 }
0x1f1b   :  { %v2461_v12 = vpop.f32.mrf.mxu0 }
0x1f1c   :  { %2501 = vst [vmem:[%s4145_s4 + $0x8] sm:$0xff] %v2467_v58  ;;  %v2462_v23 = vadd.f32 %v2461_v12, %v80_v30 }
0x1f1d   :  { %v2620_v59 = vpop.f32.mrf.mxu0 }
0x1f1e   :  { %2500 = vst [vmem:[%s4145_s4] sm:$0xff] %v2462_v23  ;;  %v2477_v9 = vadd.f32 %v2620_v59, %v80_v30 }
0x1f1f   :  { %v2471_v41 = vpop.f32.mrf.mxu0 }
0x1f20   :  { %2503 = vst [vmem:[%s4145_s4 + $0x18] sm:$0xff] %v2477_v9  ;;  %v2472_v38 = vadd.f32 %v2471_v41, %v80_v30 }
0x1f21   :  { %v2623_v39 = vpop.f32.mrf.mxu0 }
0x1f22   :  { %2502 = vst [vmem:[%s4145_s4 + $0x10] sm:$0xff] %v2472_v38  ;;  %v2487_v11 = vadd.f32 %v2623_v39, %v80_v30 }
0x1f23   :  { %v2481_v54 = vpop.f32.mrf.mxu0 }
0x1f24   :  { %2505 = vst [vmem:[%s4145_s4 + $0x28] sm:$0xff] %v2487_v11  ;;  %v2482_v8 = vadd.f32 %v2481_v54, %v80_v30 }
0x1f25   :  { %v2626_v18 = vpop.f32.mrf.mxu0 }
0x1f26   :  { %2504 = vst [vmem:[%s4145_s4 + $0x20] sm:$0xff] %v2482_v8  ;;  %v2497_v37 = vadd.f32 %v2626_v18, %v80_v30 }
0x1f27   :  { %v2491_v44 = vpop.f32.mrf.mxu0 }
0x1f28   :  { %2507 = vst [vmem:[%s4145_s4 + $0x38] sm:$0xff] %v2497_v37  ;;  %v2492_v56 = vadd.f32 %v2491_v44, %v80_v30 }
0x1f2a   :  { %2506 = vst [vmem:[%s4145_s4 + $0x30] sm:$0xff] %v2492_v56 }

</bundles_post_ra>
